<compile_context>
chip_gen: v7x
topology: tpu7x:2x2x1
jax: 0.10.0
libtpu: 0.0.40
codegen_flags: <defaults>
</compile_context>

<pallas_src>
import functools

import jax
import jax.numpy as jnp
import numpy as np
from jax import lax
from jax.experimental import pallas as pl
from jax.experimental.pallas import tpu as pltpu

_LANE = 128
_VMEM_LIMIT = 48 * 1024 * 1024  # explicit budget; fits v5e/v6e/v7x


# ---------------------------------------------------------------------------
# helpers: tiling / padding
# ---------------------------------------------------------------------------

def _round_up(n, m):
    return ((n + m - 1) // m) * m


def _dim_tile(n, pref):
    """Pick a tile (multiple of 128) and padded extent for a node dimension."""
    t = min(pref, _round_up(n, _LANE))
    return t, _round_up(n, t)


def _pad_to(a, shape):
    pads = tuple((0, s - d) for d, s in zip(a.shape, shape))
    if all(p == (0, 0) for p in pads):
        return a
    return jnp.pad(a, pads)


# ---------------------------------------------------------------------------
# Pallas kernels
# ---------------------------------------------------------------------------

def _fuse3_kernel(a1_ref, a2_ref, a3_ref, x_ref, res_ref,
                  xout_ref, out_ref, acc_ref, *, tk):
    # out = res + (A1 + A2 + A3) @ x / 3  (K-tiled; single MXU pass per tile)
    k = pl.program_id(1)

    @pl.when(k == 0)
    def _():
        acc_ref[...] = jnp.zeros_like(acc_ref)

    start = pl.multiple_of(k * tk, tk)
    xk = x_ref[pl.ds(start, tk), :]
    a_sum = a1_ref[...] + a2_ref[...] + a3_ref[...]
    acc_ref[...] += jnp.dot(a_sum, xk, preferred_element_type=jnp.float32)

    @pl.when(k == pl.num_programs(1) - 1)
    def _():
        val = res_ref[...] + acc_ref[...] * (1.0 / 3.0)
        xout_ref[...] = val.astype(xout_ref.dtype)   # bf16 state for next matmul
        out_ref[...] = val                            # f32 running accumulator seed


def _single_conv_kernel(a_ref, x_ref, res_ref, xout_ref, out_ref, acc_ref, *, tk):
    # out = res + A @ x   (K-tiled)
    k = pl.program_id(1)

    @pl.when(k == 0)
    def _():
        acc_ref[...] = jnp.zeros_like(acc_ref)

    start = pl.multiple_of(k * tk, tk)
    acc_ref[...] += jnp.dot(a_ref[...], x_ref[pl.ds(start, tk), :],
                            preferred_element_type=jnp.float32)

    @pl.when(k == pl.num_programs(1) - 1)
    def _():
        val = res_ref[...] + acc_ref[...]
        xout_ref[...] = val.astype(xout_ref.dtype)
        out_ref[...] = val


def _prop_fwd_kernel(a_ref, x_ref, res_ref, newx_ref, out_ref, acc_ref,
                     *, tk, scale):
    # new_x = A @ x ;  out = (res + new_x) * scale   (A blocks (tm, tk))
    k = pl.program_id(1)

    @pl.when(k == 0)
    def _():
        acc_ref[...] = jnp.zeros_like(acc_ref)

    start = pl.multiple_of(k * tk, tk)
    acc_ref[...] += jnp.dot(a_ref[...], x_ref[pl.ds(start, tk), :],
                            preferred_element_type=jnp.float32)

    @pl.when(k == pl.num_programs(1) - 1)
    def _():
        acc = acc_ref[...]
        newx_ref[...] = acc.astype(newx_ref.dtype)
        val = res_ref[...] + acc
        if scale != 1.0:
            val = val * scale
        out_ref[...] = val


def _prop_t_kernel(a_ref, x_ref, res_ref, newx_ref, out_ref, acc_ref,
                   *, tk, scale):
    # new_x = A^T @ x without materializing A^T: A blocks are (tk, tm) column
    # blocks of A; contract dim 0 of A with dim 0 of x on the MXU.
    k = pl.program_id(1)

    @pl.when(k == 0)
    def _():
        acc_ref[...] = jnp.zeros_like(acc_ref)

    start = pl.multiple_of(k * tk, tk)
    acc_ref[...] += lax.dot_general(
        a_ref[...], x_ref[pl.ds(start, tk), :],
        dimension_numbers=(((0,), (0,)), ((), ())),
        preferred_element_type=jnp.float32)

    @pl.when(k == pl.num_programs(1) - 1)
    def _():
        acc = acc_ref[...]
        newx_ref[...] = acc.astype(newx_ref.dtype)
        val = res_ref[...] + acc
        if scale != 1.0:
            val = val * scale
        out_ref[...] = val


# ---------------------------------------------------------------------------
# pallas_call wrappers
# ---------------------------------------------------------------------------

def _conv_call(kernel, a_list, x_bf, res_f32, tile_rows, tile_red):
    """Initial GCNLightConv(s) + residual. Returns (x_bf16, out_f32)."""
    M, K = a_list[0].shape
    H = x_bf.shape[1]

    a_spec = pl.BlockSpec((tile_rows, tile_red), lambda i, k: (i, k))
    x_spec = pl.BlockSpec((K, H), lambda i, k: (0, 0))       # resident in VMEM
    row_spec = pl.BlockSpec((tile_rows, H), lambda i, k: (i, 0))

    return pl.pallas_call(
        functools.partial(kernel, tk=tile_red),
        out_shape=(jax.ShapeDtypeStruct((M, H), jnp.bfloat16),
                   jax.ShapeDtypeStruct((M, H), jnp.float32)),
        grid_spec=pltpu.PrefetchScalarGridSpec(
            num_scalar_prefetch=0,
            grid=(M // tile_rows, K // tile_red),
            in_specs=[a_spec] * len(a_list) + [x_spec, row_spec],
            out_specs=[row_spec, row_spec],
            scratch_shapes=[pltpu.VMEM((tile_rows, H), jnp.float32)]),
        compiler_params=pltpu.CompilerParams(
            dimension_semantics=("parallel", "arbitrary"),
            vmem_limit_bytes=_VMEM_LIMIT),
    )(*a_list, x_bf, res_f32)


def _propagate_accum(a, x_bf, out_prev, *, scale, transpose_a,
                     tile_rows, tile_red):
    """Bipartite UserSpotConv step fused with the running-output accumulation.

    Returns (new_x_bf16, new_out_f32) where new_out = (out_prev + new_x)*scale.
    The out accumulator is updated in place (input_output_aliases).
    """
    if transpose_a:
        K, M = a.shape
        a_spec = pl.BlockSpec((tile_red, tile_rows), lambda i, k: (k, i))
        kern = _prop_t_kernel
    else:
        M, K = a.shape
        a_spec = pl.BlockSpec((tile_rows, tile_red), lambda i, k: (i, k))
        kern = _prop_fwd_kernel
    H = x_bf.shape[1]

    x_spec = pl.BlockSpec((K, H), lambda i, k: (0, 0))        # resident in VMEM
    row_spec = pl.BlockSpec((tile_rows, H), lambda i, k: (i, 0))

    return pl.pallas_call(
        functools.partial(kern, tk=tile_red, scale=scale),
        out_shape=(jax.ShapeDtypeStruct((M, H), jnp.bfloat16),
                   jax.ShapeDtypeStruct((M, H), jnp.float32)),
        grid_spec=pltpu.PrefetchScalarGridSpec(
            num_scalar_prefetch=0,
            grid=(M // tile_rows, K // tile_red),
            in_specs=[a_spec, x_spec, row_spec],
            out_specs=[row_spec, row_spec],
            scratch_shapes=[pltpu.VMEM((tile_rows, H), jnp.float32)]),
        compiler_params=pltpu.CompilerParams(
            dimension_semantics=("parallel", "arbitrary"),
            vmem_limit_bytes=_VMEM_LIMIT),
        input_output_aliases={2: 1},   # out_prev buffer reused for new out
    )(a, x_bf, out_prev)


# ---------------------------------------------------------------------------
# forward pass
# ---------------------------------------------------------------------------

def bimultigcn_forward(spot_emb, user_emb, a_cat, a_cit, a_sta, a_user, a_us,
                       num_layers, *, tile_pref=512):
    Ms, H = spot_emb.shape
    Nu, _ = user_emb.shape

    ts, Ms_p = _dim_tile(Ms, tile_pref)   # spot-dimension tile / padded extent
    tu, Nu_p = _dim_tile(Nu, tile_pref)   # user-dimension tile / padded extent

    # bf16 adjacencies, zero-padded to tile multiples (f32 MXU accumulation).
    a_cat_p = _pad_to(a_cat, (Ms_p, Ms_p)).astype(jnp.bfloat16)
    a_cit_p = _pad_to(a_cit, (Ms_p, Ms_p)).astype(jnp.bfloat16)
    a_sta_p = _pad_to(a_sta, (Ms_p, Ms_p)).astype(jnp.bfloat16)
    a_user_p = _pad_to(a_user, (Nu_p, Nu_p)).astype(jnp.bfloat16)
    a_us_p = _pad_to(a_us, (Nu_p, Ms_p)).astype(jnp.bfloat16)   # used un-transposed

    spot_res = _pad_to(spot_emb, (Ms_p, H)).astype(jnp.float32)
    user_res = _pad_to(user_emb, (Nu_p, H)).astype(jnp.float32)
    spot_x0 = spot_res.astype(jnp.bfloat16)
    user_x0 = user_res.astype(jnp.bfloat16)

    # spot_x = emb + (A_cat + A_cit + A_sta) @ emb / 3
    spot_x, spot_out = _conv_call(_fuse3_kernel, [a_cat_p, a_cit_p, a_sta_p],
                                  spot_x0, spot_res, ts, ts)
    # user_x = emb + A_user @ emb
    user_x, user_out = _conv_call(_single_conv_kernel, [a_user_p],
                                  user_x0, user_res, tu, tu)

    for layer in range(num_layers):
        scale = 1.0 / (num_layers + 1) if layer == num_layers - 1 else 1.0
        # user_new = A_us @ spot_x  ;  user_out = (user_out + user_new) [*scale]
        user_x_new, user_out = _propagate_accum(
            a_us_p, spot_x, user_out, scale=scale, transpose_a=False,
            tile_rows=tu, tile_red=ts)
        # spot_new = A_us^T @ user_x (column blocks, no transpose in HBM)
        spot_x_new, spot_out = _propagate_accum(
            a_us_p, user_x, spot_out, scale=scale, transpose_a=True,
            tile_rows=ts, tile_red=tu)
        spot_x, user_x = spot_x_new, user_x_new

    return spot_out[:Ms], user_out[:Nu]


# ---------------------------------------------------------------------------
# pure-JAX reference (f32)
# ---------------------------------------------------------------------------

def _reference_forward(spot_emb, user_emb, a_cat, a_cit, a_sta, a_user,
                       a_us, num_layers):
    spot_x = spot_emb + (a_cat @ spot_emb + a_cit @ spot_emb
                         + a_sta @ spot_emb) / 3.0
    user_x = user_emb + a_user @ user_emb
    spot_out, user_out = spot_x, user_x
    for _ in range(num_layers):
        user_new = a_us @ spot_x
        spot_new = a_us.T @ user_x
        spot_x, user_x = spot_new, user_new
        spot_out = spot_out + spot_x
        user_out = user_out + user_x
    s = 1.0 / (num_layers + 1)
    return spot_out * s, user_out * s


# ---------------------------------------------------------------------------
# synthetic graph construction
# ---------------------------------------------------------------------------

def _make_weighted_graph(key, n, e):
    k1, k2, k3 = jax.random.split(key, 3)
    src = jax.random.randint(k1, (e,), 0, n)
    tgt = jax.random.randint(k2, (e,), 0, n)
    w = jax.random.uniform(k3, (e,), minval=0.1, maxval=1.0, dtype=jnp.float32)
    return jnp.zeros((n, n), jnp.float32).at[tgt, src].add(w)


def _make_bipartite_graph(key, n_user, m_spot, e):
    k1, k2 = jax.random.split(key)
    u = jax.random.randint(k1, (e,), 0, n_user)
    s = jax.random.randint(k2, (e,), 0, m_spot)
    user_div = jnp.zeros((n_user,), jnp.float32).at[u].add(1.0)
    spot_div = jnp.zeros((m_spot,), jnp.float32).at[s].add(1.0)
    div = jnp.sqrt(user_div[u] * spot_div[s])
    return jnp.zeros((n_user, m_spot), jnp.float32).at[u, s].add(1.0 / div)


if __name__ == "__main__":
    # Small synthetic sizes (real module: n_users=27094, m_items=42852).
    N_USERS = 128
    M_SPOTS = 256
    HIDDEN = 128
    NUM_LAYERS = 2
    N_EDGES_BI = 512
    N_EDGES_G = 384

    key = jax.random.PRNGKey(0)
    (k_ue, k_se, k_cat, k_cit, k_sta, k_usr, k_bi) = jax.random.split(key, 7)

    # Embedding weights: normal_(std=0.1), like the module __init__.
    user_emb = 0.1 * jax.random.normal(k_ue, (N_USERS, HIDDEN), jnp.float32)
    spot_emb = 0.1 * jax.random.normal(k_se, (M_SPOTS, HIDDEN), jnp.float32)

    # Dense weighted adjacencies for the GCNLightConv graphs.
    a_cat = _make_weighted_graph(k_cat, M_SPOTS, N_EDGES_G)
    a_cit = _make_weighted_graph(k_cit, M_SPOTS, N_EDGES_G)
    a_sta = _make_weighted_graph(k_sta, M_SPOTS, N_EDGES_G)
    a_user = _make_weighted_graph(k_usr, N_USERS, N_EDGES_G)

    # Bipartite user-spot graph with symmetric sqrt-degree normalization.
    a_us = _make_bipartite_graph(k_bi, N_USERS, M_SPOTS, N_EDGES_BI)

    fwd = jax.jit(functools.partial(bimultigcn_forward, num_layers=NUM_LAYERS))
    spot_out, user_out = fwd(spot_emb, user_emb, a_cat, a_cit, a_sta,
                             a_user, a_us)
    jax.block_until_ready((spot_out, user_out))

    # Correctness check against an f32 pure-JAX reference (bf16 adjacencies /
    # features in the kernel -> relaxed tolerance; accumulation is f32).
    spot_ref, user_ref = _reference_forward(spot_emb, user_emb, a_cat, a_cit,
                                            a_sta, a_user, a_us, NUM_LAYERS)
    np.testing.assert_allclose(np.asarray(spot_out), np.asarray(spot_ref),
                               rtol=3e-2, atol=3e-2)
    np.testing.assert_allclose(np.asarray(user_out), np.asarray(user_ref),
                               rtol=3e-2, atol=3e-2)

    print("KERNEL_OK")
</pallas_src>

<mosaic_0001>
module attributes {stable_mosaic.version = 11 : i64} {
  func.func @_fuse3_kernel(%arg0: i32, %arg1: i32, %arg2: memref<256x256xbf16, #tpu.memory_space<vmem>>, %arg3: memref<256x256xbf16, #tpu.memory_space<vmem>>, %arg4: memref<256x256xbf16, #tpu.memory_space<vmem>>, %arg5: memref<256x128xbf16, #tpu.memory_space<vmem>>, %arg6: memref<256x128xf32, #tpu.memory_space<vmem>>, %arg7: memref<256x128xbf16, #tpu.memory_space<vmem>>, %arg8: memref<256x128xf32, #tpu.memory_space<vmem>>, %arg9: memref<256x128xf32, #tpu.memory_space<vmem>>) attributes {dimension_semantics = [#tpu.dimension_semantics<parallel>, #tpu.dimension_semantics<arbitrary>], iteration_bounds = array<i64: 1, 1>, scalar_prefetch = 0 : i64, scratch_operands = 1 : i64, tpu.core_type = #tpu.core_type<tc>, window_params = [{transform_indices = @transform_0, window_bounds = array<i64: 256, 256>}, {transform_indices = @transform_1, window_bounds = array<i64: 256, 256>}, {transform_indices = @transform_2, window_bounds = array<i64: 256, 256>}, {pipeline_mode = #tpu.pipeline_mode<synchronous>, transform_indices = @transform_3, window_bounds = array<i64: 256, 128>}, {transform_indices = @transform_4, window_bounds = array<i64: 256, 128>}, {transform_indices = @transform_5, window_bounds = array<i64: 256, 128>}, {transform_indices = @transform_6, window_bounds = array<i64: 256, 128>}]} {
    %c0_i32 = arith.constant 0 : i32
    %0 = arith.cmpi eq, %arg1, %c0_i32 : i32
    %1 = arith.extui %0 : i1 to i32
    %c0_i32_0 = arith.constant 0 : i32
    %2 = arith.cmpi ne, %1, %c0_i32_0 : i32
    scf.if %2 {
      %cst_13 = arith.constant 0.000000e+00 : f32
      %19 = vector.broadcast %cst_13 : f32 to vector<256x128xf32>
      %c0_14 = arith.constant 0 : index
      %c0_15 = arith.constant 0 : index
      %20 = vector.load %arg9[%c0_14, %c0_15] : memref<256x128xf32, #tpu.memory_space<vmem>>, vector<256x128xf32>
      tpu.vector_store %arg9[%c0_14, %c0_15], %19 {strides = array<i32>} : memref<256x128xf32, #tpu.memory_space<vmem>>, vector<256x128xf32>,
    } else {
    }
    %c256_i32 = arith.constant 256 : i32
    %3 = arith.muli %arg1, %c256_i32 : i32
    %4 = tpu.assume_multiple %3, 256 : i32
    %5 = arith.index_cast %4 : i32 to index
    %c0 = arith.constant 0 : index
    %6 = vector.load %arg5[%5, %c0] : memref<256x128xbf16, #tpu.memory_space<vmem>>, vector<256x128xbf16>
    %c0_1 = arith.constant 0 : index
    %c0_2 = arith.constant 0 : index
    %7 = vector.load %arg2[%c0_1, %c0_2] : memref<256x256xbf16, #tpu.memory_space<vmem>>, vector<256x256xbf16>
    %c0_3 = arith.constant 0 : index
    %c0_4 = arith.constant 0 : index
    %8 = vector.load %arg3[%c0_3, %c0_4] : memref<256x256xbf16, #tpu.memory_space<vmem>>, vector<256x256xbf16>
    %9 = arith.addf %7, %8 : vector<256x256xbf16>
    %c0_5 = arith.constant 0 : index
    %c0_6 = arith.constant 0 : index
    %10 = vector.load %arg4[%c0_5, %c0_6] : memref<256x256xbf16, #tpu.memory_space<vmem>>, vector<256x256xbf16>
    %11 = arith.addf %9, %10 : vector<256x256xbf16>
    %c0_7 = arith.constant 0 : index
    %c0_8 = arith.constant 0 : index
    %12 = vector.load %arg9[%c0_7, %c0_8] : memref<256x128xf32, #tpu.memory_space<vmem>>, vector<256x128xf32>
    %cst = arith.constant dense<0.000000e+00> : vector<256x128xf32>
    %13 = tpu.matmul %11, %6, %cst {dimension_numbers = #tpu.dot_dimension_numbers<[1], [0], [0], [1], [0, 0, 1, 1], [], []>} : vector<256x256xbf16>, vector<256x128xbf16>, vector<256x128xf32> -> vector<256x128xf32>
    %14 = arith.addf %12, %13 : vector<256x128xf32>
    %c0_9 = arith.constant 0 : index
    %c0_10 = arith.constant 0 : index
    %15 = vector.load %arg9[%c0_9, %c0_10] : memref<256x128xf32, #tpu.memory_space<vmem>>, vector<256x128xf32>
    tpu.vector_store %arg9[%c0_9, %c0_10], %14 {strides = array<i32>} : memref<256x128xf32, #tpu.memory_space<vmem>>, vector<256x128xf32>,
    %c0_i32_11 = arith.constant 0 : i32
    %16 = arith.cmpi eq, %arg1, %c0_i32_11 : i32
    %17 = arith.extui %16 : i1 to i32
    %c0_i32_12 = arith.constant 0 : i32
    %18 = arith.cmpi ne, %17, %c0_i32_12 : i32
    scf.if %18 {
      %c0_13 = arith.constant 0 : index
      %c0_14 = arith.constant 0 : index
      %19 = vector.load %arg6[%c0_13, %c0_14] : memref<256x128xf32, #tpu.memory_space<vmem>>, vector<256x128xf32>
      %c0_15 = arith.constant 0 : index
      %c0_16 = arith.constant 0 : index
      %20 = vector.load %arg9[%c0_15, %c0_16] : memref<256x128xf32, #tpu.memory_space<vmem>>, vector<256x128xf32>
      %cst_17 = arith.constant 0.333333343 : f32
      %21 = vector.broadcast %cst_17 : f32 to vector<256x128xf32>
      %22 = arith.mulf %20, %21 : vector<256x128xf32>
      %23 = arith.addf %19, %22 : vector<256x128xf32>
      %24 = arith.truncf %23 : vector<256x128xf32> to vector<256x128xbf16>
      %c0_18 = arith.constant 0 : index
      %c0_19 = arith.constant 0 : index
      %25 = vector.load %arg7[%c0_18, %c0_19] : memref<256x128xbf16, #tpu.memory_space<vmem>>, vector<256x128xbf16>
      tpu.vector_store %arg7[%c0_18, %c0_19], %24 {strides = array<i32>} : memref<256x128xbf16, #tpu.memory_space<vmem>>, vector<256x128xbf16>,
      %c0_20 = arith.constant 0 : index
      %c0_21 = arith.constant 0 : index
      %26 = vector.load %arg8[%c0_20, %c0_21] : memref<256x128xf32, #tpu.memory_space<vmem>>, vector<256x128xf32>
      tpu.vector_store %arg8[%c0_20, %c0_21], %23 {strides = array<i32>} : memref<256x128xf32, #tpu.memory_space<vmem>>, vector<256x128xf32>,
    } else {
    }
    return
  }
  func.func @transform_0(%arg0: i32, %arg1: i32) -> (i32, i32) {
    %c0_i32 = arith.constant 0 : i32
    return %arg0, %arg1 : i32, i32
  }
  func.func @transform_1(%arg0: i32, %arg1: i32) -> (i32, i32) {
    %c0_i32 = arith.constant 0 : i32
    return %arg0, %arg1 : i32, i32
  }
  func.func @transform_2(%arg0: i32, %arg1: i32) -> (i32, i32) {
    %c0_i32 = arith.constant 0 : i32
    return %arg0, %arg1 : i32, i32
  }
  func.func @transform_3(%arg0: i32, %arg1: i32) -> (i32, i32) {
    %c0_i32 = arith.constant 0 : i32
    %c0_i32_0 = arith.constant 0 : i32
    %c0_i32_1 = arith.constant 0 : i32
    return %c0_i32, %c0_i32_0 : i32, i32
  }
  func.func @transform_4(%arg0: i32, %arg1: i32) -> (i32, i32) {
    %c0_i32 = arith.constant 0 : i32
    %c0_i32_0 = arith.constant 0 : i32
    return %arg0, %c0_i32 : i32, i32
  }
  func.func @transform_5(%arg0: i32, %arg1: i32) -> (i32, i32) {
    %c0_i32 = arith.constant 0 : i32
    %c0_i32_0 = arith.constant 0 : i32
    return %arg0, %c0_i32 : i32, i32
  }
  func.func @transform_6(%arg0: i32, %arg1: i32) -> (i32, i32) {
    %c0_i32 = arith.constant 0 : i32
    %c0_i32_0 = arith.constant 0 : i32
    return %arg0, %c0_i32 : i32, i32
  }
}

module attributes {stable_mosaic.version = 11 : i64} {
  func.func @_single_conv_kernel(%arg0: i32, %arg1: i32, %arg2: memref<128x128xbf16, #tpu.memory_space<vmem>>, %arg3: memref<128x128xbf16, #tpu.memory_space<vmem>>, %arg4: memref<128x128xf32, #tpu.memory_space<vmem>>, %arg5: memref<128x128xbf16, #tpu.memory_space<vmem>>, %arg6: memref<128x128xf32, #tpu.memory_space<vmem>>, %arg7: memref<128x128xf32, #tpu.memory_space<vmem>>) attributes {dimension_semantics = [#tpu.dimension_semantics<parallel>, #tpu.dimension_semantics<arbitrary>], iteration_bounds = array<i64: 1, 1>, scalar_prefetch = 0 : i64, scratch_operands = 1 : i64, tpu.core_type = #tpu.core_type<tc>, window_params = [{transform_indices = @transform_0, window_bounds = array<i64: 128, 128>}, {pipeline_mode = #tpu.pipeline_mode<synchronous>, transform_indices = @transform_1, window_bounds = array<i64: 128, 128>}, {transform_indices = @transform_2, window_bounds = array<i64: 128, 128>}, {transform_indices = @transform_3, window_bounds = array<i64: 128, 128>}, {transform_indices = @transform_4, window_bounds = array<i64: 128, 128>}]} {
    %c0_i32 = arith.constant 0 : i32
    %0 = arith.cmpi eq, %arg1, %c0_i32 : i32
    %1 = arith.extui %0 : i1 to i32
    %c0_i32_0 = arith.constant 0 : i32
    %2 = arith.cmpi ne, %1, %c0_i32_0 : i32
    scf.if %2 {
      %cst_9 = arith.constant 0.000000e+00 : f32
      %15 = vector.broadcast %cst_9 : f32 to vector<128x128xf32>
      %c0_10 = arith.constant 0 : index
      %c0_11 = arith.constant 0 : index
      %16 = vector.load %arg7[%c0_10, %c0_11] : memref<128x128xf32, #tpu.memory_space<vmem>>, vector<128x128xf32>
      tpu.vector_store %arg7[%c0_10, %c0_11], %15 {strides = array<i32>} : memref<128x128xf32, #tpu.memory_space<vmem>>, vector<128x128xf32>,
    } else {
    }
    %c128_i32 = arith.constant 128 : i32
    %3 = arith.muli %arg1, %c128_i32 : i32
    %4 = tpu.assume_multiple %3, 128 : i32
    %c0 = arith.constant 0 : index
    %c0_1 = arith.constant 0 : index
    %5 = vector.load %arg7[%c0, %c0_1] : memref<128x128xf32, #tpu.memory_space<vmem>>, vector<128x128xf32>
    %c0_2 = arith.constant 0 : index
    %c0_3 = arith.constant 0 : index
    %6 = vector.load %arg2[%c0_2, %c0_3] : memref<128x128xbf16, #tpu.memory_space<vmem>>, vector<128x128xbf16>
    %7 = arith.index_cast %4 : i32 to index
    %c0_4 = arith.constant 0 : index
    %8 = vector.load %arg3[%7, %c0_4] : memref<128x128xbf16, #tpu.memory_space<vmem>>, vector<128x128xbf16>
    %cst = arith.constant dense<0.000000e+00> : vector<128x128xf32>
    %9 = tpu.matmul %6, %8, %cst {dimension_numbers = #tpu.dot_dimension_numbers<[1], [0], [0], [1], [0, 0, 1, 1], [], []>} : vector<128x128xbf16>, vector<128x128xbf16>, vector<128x128xf32> -> vector<128x128xf32>
    %10 = arith.addf %5, %9 : vector<128x128xf32>
    %c0_5 = arith.constant 0 : index
    %c0_6 = arith.constant 0 : index
    %11 = vector.load %arg7[%c0_5, %c0_6] : memref<128x128xf32, #tpu.memory_space<vmem>>, vector<128x128xf32>
    tpu.vector_store %arg7[%c0_5, %c0_6], %10 {strides = array<i32>} : memref<128x128xf32, #tpu.memory_space<vmem>>, vector<128x128xf32>,
    %c0_i32_7 = arith.constant 0 : i32
    %12 = arith.cmpi eq, %arg1, %c0_i32_7 : i32
    %13 = arith.extui %12 : i1 to i32
    %c0_i32_8 = arith.constant 0 : i32
    %14 = arith.cmpi ne, %13, %c0_i32_8 : i32
    scf.if %14 {
      %c0_9 = arith.constant 0 : index
      %c0_10 = arith.constant 0 : index
      %15 = vector.load %arg4[%c0_9, %c0_10] : memref<128x128xf32, #tpu.memory_space<vmem>>, vector<128x128xf32>
      %c0_11 = arith.constant 0 : index
      %c0_12 = arith.constant 0 : index
      %16 = vector.load %arg7[%c0_11, %c0_12] : memref<128x128xf32, #tpu.memory_space<vmem>>, vector<128x128xf32>
      %17 = arith.addf %15, %16 : vector<128x128xf32>
      %18 = arith.truncf %17 : vector<128x128xf32> to vector<128x128xbf16>
      %c0_13 = arith.constant 0 : index
      %c0_14 = arith.constant 0 : index
      %19 = vector.load %arg5[%c0_13, %c0_14] : memref<128x128xbf16, #tpu.memory_space<vmem>>, vector<128x128xbf16>
      tpu.vector_store %arg5[%c0_13, %c0_14], %18 {strides = array<i32>} : memref<128x128xbf16, #tpu.memory_space<vmem>>, vector<128x128xbf16>,
      %c0_15 = arith.constant 0 : index
      %c0_16 = arith.constant 0 : index
      %20 = vector.load %arg6[%c0_15, %c0_16] : memref<128x128xf32, #tpu.memory_space<vmem>>, vector<128x128xf32>
      tpu.vector_store %arg6[%c0_15, %c0_16], %17 {strides = array<i32>} : memref<128x128xf32, #tpu.memory_space<vmem>>, vector<128x128xf32>,
    } else {
    }
    return
  }
  func.func @transform_0(%arg0: i32, %arg1: i32) -> (i32, i32) {
    %c0_i32 = arith.constant 0 : i32
    return %arg0, %arg1 : i32, i32
  }
  func.func @transform_1(%arg0: i32, %arg1: i32) -> (i32, i32) {
    %c0_i32 = arith.constant 0 : i32
    %c0_i32_0 = arith.constant 0 : i32
    %c0_i32_1 = arith.constant 0 : i32
    return %c0_i32, %c0_i32_0 : i32, i32
  }
  func.func @transform_2(%arg0: i32, %arg1: i32) -> (i32, i32) {
    %c0_i32 = arith.constant 0 : i32
    %c0_i32_0 = arith.constant 0 : i32
    return %arg0, %c0_i32 : i32, i32
  }
  func.func @transform_3(%arg0: i32, %arg1: i32) -> (i32, i32) {
    %c0_i32 = arith.constant 0 : i32
    %c0_i32_0 = arith.constant 0 : i32
    return %arg0, %c0_i32 : i32, i32
  }
  func.func @transform_4(%arg0: i32, %arg1: i32) -> (i32, i32) {
    %c0_i32 = arith.constant 0 : i32
    %c0_i32_0 = arith.constant 0 : i32
    return %arg0, %c0_i32 : i32, i32
  }
}

module attributes {stable_mosaic.version = 11 : i64} {
  func.func @_prop_t_kernel(%arg0: i32, %arg1: i32, %arg2: memref<128x256xbf16, #tpu.memory_space<vmem>>, %arg3: memref<128x128xbf16, #tpu.memory_space<vmem>>, %arg4: memref<256x128xf32, #tpu.memory_space<vmem>>, %arg5: memref<256x128xbf16, #tpu.memory_space<vmem>>, %arg6: memref<256x128xf32, #tpu.memory_space<vmem>>, %arg7: memref<256x128xf32, #tpu.memory_space<vmem>>) attributes {dimension_semantics = [#tpu.dimension_semantics<parallel>, #tpu.dimension_semantics<arbitrary>], iteration_bounds = array<i64: 1, 1>, scalar_prefetch = 0 : i64, scratch_operands = 1 : i64, tpu.core_type = #tpu.core_type<tc>, window_params = [{transform_indices = @transform_0, window_bounds = array<i64: 128, 256>}, {pipeline_mode = #tpu.pipeline_mode<synchronous>, transform_indices = @transform_1, window_bounds = array<i64: 128, 128>}, {transform_indices = @transform_2, window_bounds = array<i64: 256, 128>}, {transform_indices = @transform_3, window_bounds = array<i64: 256, 128>}, {transform_indices = @transform_4, window_bounds = array<i64: 256, 128>}]} {
    %c0_i32 = arith.constant 0 : i32
    %0 = arith.cmpi eq, %arg1, %c0_i32 : i32
    %1 = arith.extui %0 : i1 to i32
    %c0_i32_0 = arith.constant 0 : i32
    %2 = arith.cmpi ne, %1, %c0_i32_0 : i32
    scf.if %2 {
      %cst_9 = arith.constant 0.000000e+00 : f32
      %15 = vector.broadcast %cst_9 : f32 to vector<256x128xf32>
      %c0_10 = arith.constant 0 : index
      %c0_11 = arith.constant 0 : index
      %16 = vector.load %arg7[%c0_10, %c0_11] : memref<256x128xf32, #tpu.memory_space<vmem>>, vector<256x128xf32>
      tpu.vector_store %arg7[%c0_10, %c0_11], %15 {strides = array<i32>} : memref<256x128xf32, #tpu.memory_space<vmem>>, vector<256x128xf32>,
    } else {
    }
    %c128_i32 = arith.constant 128 : i32
    %3 = arith.muli %arg1, %c128_i32 : i32
    %4 = tpu.assume_multiple %3, 128 : i32
    %c0 = arith.constant 0 : index
    %c0_1 = arith.constant 0 : index
    %5 = vector.load %arg7[%c0, %c0_1] : memref<256x128xf32, #tpu.memory_space<vmem>>, vector<256x128xf32>
    %c0_2 = arith.constant 0 : index
    %c0_3 = arith.constant 0 : index
    %6 = vector.load %arg2[%c0_2, %c0_3] : memref<128x256xbf16, #tpu.memory_space<vmem>>, vector<128x256xbf16>
    %7 = arith.index_cast %4 : i32 to index
    %c0_4 = arith.constant 0 : index
    %8 = vector.load %arg3[%7, %c0_4] : memref<128x128xbf16, #tpu.memory_space<vmem>>, vector<128x128xbf16>
    %cst = arith.constant dense<0.000000e+00> : vector<256x128xf32>
    %9 = tpu.matmul %6, %8, %cst {dimension_numbers = #tpu.dot_dimension_numbers<[0], [0], [1], [1], [0, 1, 1, 1], [], []>} : vector<128x256xbf16>, vector<128x128xbf16>, vector<256x128xf32> -> vector<256x128xf32>
    %10 = arith.addf %5, %9 : vector<256x128xf32>
    %c0_5 = arith.constant 0 : index
    %c0_6 = arith.constant 0 : index
    %11 = vector.load %arg7[%c0_5, %c0_6] : memref<256x128xf32, #tpu.memory_space<vmem>>, vector<256x128xf32>
    tpu.vector_store %arg7[%c0_5, %c0_6], %10 {strides = array<i32>} : memref<256x128xf32, #tpu.memory_space<vmem>>, vector<256x128xf32>,
    %c0_i32_7 = arith.constant 0 : i32
    %12 = arith.cmpi eq, %arg1, %c0_i32_7 : i32
    %13 = arith.extui %12 : i1 to i32
    %c0_i32_8 = arith.constant 0 : i32
    %14 = arith.cmpi ne, %13, %c0_i32_8 : i32
    scf.if %14 {
      %c0_9 = arith.constant 0 : index
      %c0_10 = arith.constant 0 : index
      %15 = vector.load %arg7[%c0_9, %c0_10] : memref<256x128xf32, #tpu.memory_space<vmem>>, vector<256x128xf32>
      %16 = arith.truncf %15 : vector<256x128xf32> to vector<256x128xbf16>
      %c0_11 = arith.constant 0 : index
      %c0_12 = arith.constant 0 : index
      %17 = vector.load %arg5[%c0_11, %c0_12] : memref<256x128xbf16, #tpu.memory_space<vmem>>, vector<256x128xbf16>
      tpu.vector_store %arg5[%c0_11, %c0_12], %16 {strides = array<i32>} : memref<256x128xbf16, #tpu.memory_space<vmem>>, vector<256x128xbf16>,
      %c0_13 = arith.constant 0 : index
      %c0_14 = arith.constant 0 : index
      %18 = vector.load %arg4[%c0_13, %c0_14] : memref<256x128xf32, #tpu.memory_space<vmem>>, vector<256x128xf32>
      %19 = arith.addf %18, %15 : vector<256x128xf32>
      %c0_15 = arith.constant 0 : index
      %c0_16 = arith.constant 0 : index
      %20 = vector.load %arg6[%c0_15, %c0_16] : memref<256x128xf32, #tpu.memory_space<vmem>>, vector<256x128xf32>
      tpu.vector_store %arg6[%c0_15, %c0_16], %19 {strides = array<i32>} : memref<256x128xf32, #tpu.memory_space<vmem>>, vector<256x128xf32>,
    } else {
    }
    return
  }
  func.func @transform_0(%arg0: i32, %arg1: i32) -> (i32, i32) {
    %c0_i32 = arith.constant 0 : i32
    return %arg1, %arg0 : i32, i32
  }
  func.func @transform_1(%arg0: i32, %arg1: i32) -> (i32, i32) {
    %c0_i32 = arith.constant 0 : i32
    %c0_i32_0 = arith.constant 0 : i32
    %c0_i32_1 = arith.constant 0 : i32
    return %c0_i32, %c0_i32_0 : i32, i32
  }
  func.func @transform_2(%arg0: i32, %arg1: i32) -> (i32, i32) {
    %c0_i32 = arith.constant 0 : i32
    %c0_i32_0 = arith.constant 0 : i32
    return %arg0, %c0_i32 : i32, i32
  }
  func.func @transform_3(%arg0: i32, %arg1: i32) -> (i32, i32) {
    %c0_i32 = arith.constant 0 : i32
    %c0_i32_0 = arith.constant 0 : i32
    return %arg0, %c0_i32 : i32, i32
  }
  func.func @transform_4(%arg0: i32, %arg1: i32) -> (i32, i32) {
    %c0_i32 = arith.constant 0 : i32
    %c0_i32_0 = arith.constant 0 : i32
    return %arg0, %c0_i32 : i32, i32
  }
}

module attributes {stable_mosaic.version = 11 : i64} {
  func.func @_prop_fwd_kernel(%arg0: i32, %arg1: i32, %arg2: memref<128x256xbf16, #tpu.memory_space<vmem>>, %arg3: memref<256x128xbf16, #tpu.memory_space<vmem>>, %arg4: memref<128x128xf32, #tpu.memory_space<vmem>>, %arg5: memref<128x128xbf16, #tpu.memory_space<vmem>>, %arg6: memref<128x128xf32, #tpu.memory_space<vmem>>, %arg7: memref<128x128xf32, #tpu.memory_space<vmem>>) attributes {dimension_semantics = [#tpu.dimension_semantics<parallel>, #tpu.dimension_semantics<arbitrary>], iteration_bounds = array<i64: 1, 1>, scalar_prefetch = 0 : i64, scratch_operands = 1 : i64, tpu.core_type = #tpu.core_type<tc>, window_params = [{transform_indices = @transform_0, window_bounds = array<i64: 128, 256>}, {pipeline_mode = #tpu.pipeline_mode<synchronous>, transform_indices = @transform_1, window_bounds = array<i64: 256, 128>}, {transform_indices = @transform_2, window_bounds = array<i64: 128, 128>}, {transform_indices = @transform_3, window_bounds = array<i64: 128, 128>}, {transform_indices = @transform_4, window_bounds = array<i64: 128, 128>}]} {
    %c0_i32 = arith.constant 0 : i32
    %0 = arith.cmpi eq, %arg1, %c0_i32 : i32
    %1 = arith.extui %0 : i1 to i32
    %c0_i32_0 = arith.constant 0 : i32
    %2 = arith.cmpi ne, %1, %c0_i32_0 : i32
    scf.if %2 {
      %cst_9 = arith.constant 0.000000e+00 : f32
      %15 = vector.broadcast %cst_9 : f32 to vector<128x128xf32>
      %c0_10 = arith.constant 0 : index
      %c0_11 = arith.constant 0 : index
      %16 = vector.load %arg7[%c0_10, %c0_11] : memref<128x128xf32, #tpu.memory_space<vmem>>, vector<128x128xf32>
      tpu.vector_store %arg7[%c0_10, %c0_11], %15 {strides = array<i32>} : memref<128x128xf32, #tpu.memory_space<vmem>>, vector<128x128xf32>,
    } else {
    }
    %c256_i32 = arith.constant 256 : i32
    %3 = arith.muli %arg1, %c256_i32 : i32
    %4 = tpu.assume_multiple %3, 256 : i32
    %c0 = arith.constant 0 : index
    %c0_1 = arith.constant 0 : index
    %5 = vector.load %arg7[%c0, %c0_1] : memref<128x128xf32, #tpu.memory_space<vmem>>, vector<128x128xf32>
    %c0_2 = arith.constant 0 : index
    %c0_3 = arith.constant 0 : index
    %6 = vector.load %arg2[%c0_2, %c0_3] : memref<128x256xbf16, #tpu.memory_space<vmem>>, vector<128x256xbf16>
    %7 = arith.index_cast %4 : i32 to index
    %c0_4 = arith.constant 0 : index
    %8 = vector.load %arg3[%7, %c0_4] : memref<256x128xbf16, #tpu.memory_space<vmem>>, vector<256x128xbf16>
    %cst = arith.constant dense<0.000000e+00> : vector<128x128xf32>
    %9 = tpu.matmul %6, %8, %cst {dimension_numbers = #tpu.dot_dimension_numbers<[1], [0], [0], [1], [0, 0, 1, 1], [], []>} : vector<128x256xbf16>, vector<256x128xbf16>, vector<128x128xf32> -> vector<128x128xf32>
    %10 = arith.addf %5, %9 : vector<128x128xf32>
    %c0_5 = arith.constant 0 : index
    %c0_6 = arith.constant 0 : index
    %11 = vector.load %arg7[%c0_5, %c0_6] : memref<128x128xf32, #tpu.memory_space<vmem>>, vector<128x128xf32>
    tpu.vector_store %arg7[%c0_5, %c0_6], %10 {strides = array<i32>} : memref<128x128xf32, #tpu.memory_space<vmem>>, vector<128x128xf32>,
    %c0_i32_7 = arith.constant 0 : i32
    %12 = arith.cmpi eq, %arg1, %c0_i32_7 : i32
    %13 = arith.extui %12 : i1 to i32
    %c0_i32_8 = arith.constant 0 : i32
    %14 = arith.cmpi ne, %13, %c0_i32_8 : i32
    scf.if %14 {
      %c0_9 = arith.constant 0 : index
      %c0_10 = arith.constant 0 : index
      %15 = vector.load %arg7[%c0_9, %c0_10] : memref<128x128xf32, #tpu.memory_space<vmem>>, vector<128x128xf32>
      %16 = arith.truncf %15 : vector<128x128xf32> to vector<128x128xbf16>
      %c0_11 = arith.constant 0 : index
      %c0_12 = arith.constant 0 : index
      %17 = vector.load %arg5[%c0_11, %c0_12] : memref<128x128xbf16, #tpu.memory_space<vmem>>, vector<128x128xbf16>
      tpu.vector_store %arg5[%c0_11, %c0_12], %16 {strides = array<i32>} : memref<128x128xbf16, #tpu.memory_space<vmem>>, vector<128x128xbf16>,
      %c0_13 = arith.constant 0 : index
      %c0_14 = arith.constant 0 : index
      %18 = vector.load %arg4[%c0_13, %c0_14] : memref<128x128xf32, #tpu.memory_space<vmem>>, vector<128x128xf32>
      %19 = arith.addf %18, %15 : vector<128x128xf32>
      %c0_15 = arith.constant 0 : index
      %c0_16 = arith.constant 0 : index
      %20 = vector.load %arg6[%c0_15, %c0_16] : memref<128x128xf32, #tpu.memory_space<vmem>>, vector<128x128xf32>
      tpu.vector_store %arg6[%c0_15, %c0_16], %19 {strides = array<i32>} : memref<128x128xf32, #tpu.memory_space<vmem>>, vector<128x128xf32>,
    } else {
    }
    return
  }
  func.func @transform_0(%arg0: i32, %arg1: i32) -> (i32, i32) {
    %c0_i32 = arith.constant 0 : i32
    return %arg0, %arg1 : i32, i32
  }
  func.func @transform_1(%arg0: i32, %arg1: i32) -> (i32, i32) {
    %c0_i32 = arith.constant 0 : i32
    %c0_i32_0 = arith.constant 0 : i32
    %c0_i32_1 = arith.constant 0 : i32
    return %c0_i32, %c0_i32_0 : i32, i32
  }
  func.func @transform_2(%arg0: i32, %arg1: i32) -> (i32, i32) {
    %c0_i32 = arith.constant 0 : i32
    %c0_i32_0 = arith.constant 0 : i32
    return %arg0, %c0_i32 : i32, i32
  }
  func.func @transform_3(%arg0: i32, %arg1: i32) -> (i32, i32) {
    %c0_i32 = arith.constant 0 : i32
    %c0_i32_0 = arith.constant 0 : i32
    return %arg0, %c0_i32 : i32, i32
  }
  func.func @transform_4(%arg0: i32, %arg1: i32) -> (i32, i32) {
    %c0_i32 = arith.constant 0 : i32
    %c0_i32_0 = arith.constant 0 : i32
    return %arg0, %c0_i32 : i32, i32
  }
}

module attributes {stable_mosaic.version = 11 : i64} {
  func.func @_prop_fwd_kernel(%arg0: i32, %arg1: i32, %arg2: memref<128x256xbf16, #tpu.memory_space<vmem>>, %arg3: memref<256x128xbf16, #tpu.memory_space<vmem>>, %arg4: memref<128x128xf32, #tpu.memory_space<vmem>>, %arg5: memref<128x128xbf16, #tpu.memory_space<vmem>>, %arg6: memref<128x128xf32, #tpu.memory_space<vmem>>, %arg7: memref<128x128xf32, #tpu.memory_space<vmem>>) attributes {dimension_semantics = [#tpu.dimension_semantics<parallel>, #tpu.dimension_semantics<arbitrary>], iteration_bounds = array<i64: 1, 1>, scalar_prefetch = 0 : i64, scratch_operands = 1 : i64, tpu.core_type = #tpu.core_type<tc>, window_params = [{transform_indices = @transform_0, window_bounds = array<i64: 128, 256>}, {pipeline_mode = #tpu.pipeline_mode<synchronous>, transform_indices = @transform_1, window_bounds = array<i64: 256, 128>}, {transform_indices = @transform_2, window_bounds = array<i64: 128, 128>}, {transform_indices = @transform_3, window_bounds = array<i64: 128, 128>}, {transform_indices = @transform_4, window_bounds = array<i64: 128, 128>}]} {
    %c0_i32 = arith.constant 0 : i32
    %0 = arith.cmpi eq, %arg1, %c0_i32 : i32
    %1 = arith.extui %0 : i1 to i32
    %c0_i32_0 = arith.constant 0 : i32
    %2 = arith.cmpi ne, %1, %c0_i32_0 : i32
    scf.if %2 {
      %cst_9 = arith.constant 0.000000e+00 : f32
      %15 = vector.broadcast %cst_9 : f32 to vector<128x128xf32>
      %c0_10 = arith.constant 0 : index
      %c0_11 = arith.constant 0 : index
      %16 = vector.load %arg7[%c0_10, %c0_11] : memref<128x128xf32, #tpu.memory_space<vmem>>, vector<128x128xf32>
      tpu.vector_store %arg7[%c0_10, %c0_11], %15 {strides = array<i32>} : memref<128x128xf32, #tpu.memory_space<vmem>>, vector<128x128xf32>,
    } else {
    }
    %c256_i32 = arith.constant 256 : i32
    %3 = arith.muli %arg1, %c256_i32 : i32
    %4 = tpu.assume_multiple %3, 256 : i32
    %c0 = arith.constant 0 : index
    %c0_1 = arith.constant 0 : index
    %5 = vector.load %arg7[%c0, %c0_1] : memref<128x128xf32, #tpu.memory_space<vmem>>, vector<128x128xf32>
    %c0_2 = arith.constant 0 : index
    %c0_3 = arith.constant 0 : index
    %6 = vector.load %arg2[%c0_2, %c0_3] : memref<128x256xbf16, #tpu.memory_space<vmem>>, vector<128x256xbf16>
    %7 = arith.index_cast %4 : i32 to index
    %c0_4 = arith.constant 0 : index
    %8 = vector.load %arg3[%7, %c0_4] : memref<256x128xbf16, #tpu.memory_space<vmem>>, vector<256x128xbf16>
    %cst = arith.constant dense<0.000000e+00> : vector<128x128xf32>
    %9 = tpu.matmul %6, %8, %cst {dimension_numbers = #tpu.dot_dimension_numbers<[1], [0], [0], [1], [0, 0, 1, 1], [], []>} : vector<128x256xbf16>, vector<256x128xbf16>, vector<128x128xf32> -> vector<128x128xf32>
    %10 = arith.addf %5, %9 : vector<128x128xf32>
    %c0_5 = arith.constant 0 : index
    %c0_6 = arith.constant 0 : index
    %11 = vector.load %arg7[%c0_5, %c0_6] : memref<128x128xf32, #tpu.memory_space<vmem>>, vector<128x128xf32>
    tpu.vector_store %arg7[%c0_5, %c0_6], %10 {strides = array<i32>} : memref<128x128xf32, #tpu.memory_space<vmem>>, vector<128x128xf32>,
    %c0_i32_7 = arith.constant 0 : i32
    %12 = arith.cmpi eq, %arg1, %c0_i32_7 : i32
    %13 = arith.extui %12 : i1 to i32
    %c0_i32_8 = arith.constant 0 : i32
    %14 = arith.cmpi ne, %13, %c0_i32_8 : i32
    scf.if %14 {
      %c0_9 = arith.constant 0 : index
      %c0_10 = arith.constant 0 : index
      %15 = vector.load %arg7[%c0_9, %c0_10] : memref<128x128xf32, #tpu.memory_space<vmem>>, vector<128x128xf32>
      %16 = arith.truncf %15 : vector<128x128xf32> to vector<128x128xbf16>
      %c0_11 = arith.constant 0 : index
      %c0_12 = arith.constant 0 : index
      %17 = vector.load %arg5[%c0_11, %c0_12] : memref<128x128xbf16, #tpu.memory_space<vmem>>, vector<128x128xbf16>
      tpu.vector_store %arg5[%c0_11, %c0_12], %16 {strides = array<i32>} : memref<128x128xbf16, #tpu.memory_space<vmem>>, vector<128x128xbf16>,
      %c0_13 = arith.constant 0 : index
      %c0_14 = arith.constant 0 : index
      %18 = vector.load %arg4[%c0_13, %c0_14] : memref<128x128xf32, #tpu.memory_space<vmem>>, vector<128x128xf32>
      %19 = arith.addf %18, %15 : vector<128x128xf32>
      %cst_15 = arith.constant 0.333333343 : f32
      %20 = vector.broadcast %cst_15 : f32 to vector<128x128xf32>
      %21 = arith.mulf %19, %20 : vector<128x128xf32>
      %c0_16 = arith.constant 0 : index
      %c0_17 = arith.constant 0 : index
      %22 = vector.load %arg6[%c0_16, %c0_17] : memref<128x128xf32, #tpu.memory_space<vmem>>, vector<128x128xf32>
      tpu.vector_store %arg6[%c0_16, %c0_17], %21 {strides = array<i32>} : memref<128x128xf32, #tpu.memory_space<vmem>>, vector<128x128xf32>,
    } else {
    }
    return
  }
  func.func @transform_0(%arg0: i32, %arg1: i32) -> (i32, i32) {
    %c0_i32 = arith.constant 0 : i32
    return %arg0, %arg1 : i32, i32
  }
  func.func @transform_1(%arg0: i32, %arg1: i32) -> (i32, i32) {
    %c0_i32 = arith.constant 0 : i32
    %c0_i32_0 = arith.constant 0 : i32
    %c0_i32_1 = arith.constant 0 : i32
    return %c0_i32, %c0_i32_0 : i32, i32
  }
  func.func @transform_2(%arg0: i32, %arg1: i32) -> (i32, i32) {
    %c0_i32 = arith.constant 0 : i32
    %c0_i32_0 = arith.constant 0 : i32
    return %arg0, %c0_i32 : i32, i32
  }
  func.func @transform_3(%arg0: i32, %arg1: i32) -> (i32, i32) {
    %c0_i32 = arith.constant 0 : i32
    %c0_i32_0 = arith.constant 0 : i32
    return %arg0, %c0_i32 : i32, i32
  }
  func.func @transform_4(%arg0: i32, %arg1: i32) -> (i32, i32) {
    %c0_i32 = arith.constant 0 : i32
    %c0_i32_0 = arith.constant 0 : i32
    return %arg0, %c0_i32 : i32, i32
  }
}

module attributes {stable_mosaic.version = 11 : i64} {
  func.func @_prop_t_kernel(%arg0: i32, %arg1: i32, %arg2: memref<128x256xbf16, #tpu.memory_space<vmem>>, %arg3: memref<128x128xbf16, #tpu.memory_space<vmem>>, %arg4: memref<256x128xf32, #tpu.memory_space<vmem>>, %arg5: memref<256x128xbf16, #tpu.memory_space<vmem>>, %arg6: memref<256x128xf32, #tpu.memory_space<vmem>>, %arg7: memref<256x128xf32, #tpu.memory_space<vmem>>) attributes {dimension_semantics = [#tpu.dimension_semantics<parallel>, #tpu.dimension_semantics<arbitrary>], iteration_bounds = array<i64: 1, 1>, scalar_prefetch = 0 : i64, scratch_operands = 1 : i64, tpu.core_type = #tpu.core_type<tc>, window_params = [{transform_indices = @transform_0, window_bounds = array<i64: 128, 256>}, {pipeline_mode = #tpu.pipeline_mode<synchronous>, transform_indices = @transform_1, window_bounds = array<i64: 128, 128>}, {transform_indices = @transform_2, window_bounds = array<i64: 256, 128>}, {transform_indices = @transform_3, window_bounds = array<i64: 256, 128>}, {transform_indices = @transform_4, window_bounds = array<i64: 256, 128>}]} {
    %c0_i32 = arith.constant 0 : i32
    %0 = arith.cmpi eq, %arg1, %c0_i32 : i32
    %1 = arith.extui %0 : i1 to i32
    %c0_i32_0 = arith.constant 0 : i32
    %2 = arith.cmpi ne, %1, %c0_i32_0 : i32
    scf.if %2 {
      %cst_9 = arith.constant 0.000000e+00 : f32
      %15 = vector.broadcast %cst_9 : f32 to vector<256x128xf32>
      %c0_10 = arith.constant 0 : index
      %c0_11 = arith.constant 0 : index
      %16 = vector.load %arg7[%c0_10, %c0_11] : memref<256x128xf32, #tpu.memory_space<vmem>>, vector<256x128xf32>
      tpu.vector_store %arg7[%c0_10, %c0_11], %15 {strides = array<i32>} : memref<256x128xf32, #tpu.memory_space<vmem>>, vector<256x128xf32>,
    } else {
    }
    %c128_i32 = arith.constant 128 : i32
    %3 = arith.muli %arg1, %c128_i32 : i32
    %4 = tpu.assume_multiple %3, 128 : i32
    %c0 = arith.constant 0 : index
    %c0_1 = arith.constant 0 : index
    %5 = vector.load %arg7[%c0, %c0_1] : memref<256x128xf32, #tpu.memory_space<vmem>>, vector<256x128xf32>
    %c0_2 = arith.constant 0 : index
    %c0_3 = arith.constant 0 : index
    %6 = vector.load %arg2[%c0_2, %c0_3] : memref<128x256xbf16, #tpu.memory_space<vmem>>, vector<128x256xbf16>
    %7 = arith.index_cast %4 : i32 to index
    %c0_4 = arith.constant 0 : index
    %8 = vector.load %arg3[%7, %c0_4] : memref<128x128xbf16, #tpu.memory_space<vmem>>, vector<128x128xbf16>
    %cst = arith.constant dense<0.000000e+00> : vector<256x128xf32>
    %9 = tpu.matmul %6, %8, %cst {dimension_numbers = #tpu.dot_dimension_numbers<[0], [0], [1], [1], [0, 1, 1, 1], [], []>} : vector<128x256xbf16>, vector<128x128xbf16>, vector<256x128xf32> -> vector<256x128xf32>
    %10 = arith.addf %5, %9 : vector<256x128xf32>
    %c0_5 = arith.constant 0 : index
    %c0_6 = arith.constant 0 : index
    %11 = vector.load %arg7[%c0_5, %c0_6] : memref<256x128xf32, #tpu.memory_space<vmem>>, vector<256x128xf32>
    tpu.vector_store %arg7[%c0_5, %c0_6], %10 {strides = array<i32>} : memref<256x128xf32, #tpu.memory_space<vmem>>, vector<256x128xf32>,
    %c0_i32_7 = arith.constant 0 : i32
    %12 = arith.cmpi eq, %arg1, %c0_i32_7 : i32
    %13 = arith.extui %12 : i1 to i32
    %c0_i32_8 = arith.constant 0 : i32
    %14 = arith.cmpi ne, %13, %c0_i32_8 : i32
    scf.if %14 {
      %c0_9 = arith.constant 0 : index
      %c0_10 = arith.constant 0 : index
      %15 = vector.load %arg7[%c0_9, %c0_10] : memref<256x128xf32, #tpu.memory_space<vmem>>, vector<256x128xf32>
      %16 = arith.truncf %15 : vector<256x128xf32> to vector<256x128xbf16>
      %c0_11 = arith.constant 0 : index
      %c0_12 = arith.constant 0 : index
      %17 = vector.load %arg5[%c0_11, %c0_12] : memref<256x128xbf16, #tpu.memory_space<vmem>>, vector<256x128xbf16>
      tpu.vector_store %arg5[%c0_11, %c0_12], %16 {strides = array<i32>} : memref<256x128xbf16, #tpu.memory_space<vmem>>, vector<256x128xbf16>,
      %c0_13 = arith.constant 0 : index
      %c0_14 = arith.constant 0 : index
      %18 = vector.load %arg4[%c0_13, %c0_14] : memref<256x128xf32, #tpu.memory_space<vmem>>, vector<256x128xf32>
      %19 = arith.addf %18, %15 : vector<256x128xf32>
      %cst_15 = arith.constant 0.333333343 : f32
      %20 = vector.broadcast %cst_15 : f32 to vector<256x128xf32>
      %21 = arith.mulf %19, %20 : vector<256x128xf32>
      %c0_16 = arith.constant 0 : index
      %c0_17 = arith.constant 0 : index
      %22 = vector.load %arg6[%c0_16, %c0_17] : memref<256x128xf32, #tpu.memory_space<vmem>>, vector<256x128xf32>
      tpu.vector_store %arg6[%c0_16, %c0_17], %21 {strides = array<i32>} : memref<256x128xf32, #tpu.memory_space<vmem>>, vector<256x128xf32>,
    } else {
    }
    return
  }
  func.func @transform_0(%arg0: i32, %arg1: i32) -> (i32, i32) {
    %c0_i32 = arith.constant 0 : i32
    return %arg1, %arg0 : i32, i32
  }
  func.func @transform_1(%arg0: i32, %arg1: i32) -> (i32, i32) {
    %c0_i32 = arith.constant 0 : i32
    %c0_i32_0 = arith.constant 0 : i32
    %c0_i32_1 = arith.constant 0 : i32
    return %c0_i32, %c0_i32_0 : i32, i32
  }
  func.func @transform_2(%arg0: i32, %arg1: i32) -> (i32, i32) {
    %c0_i32 = arith.constant 0 : i32
    %c0_i32_0 = arith.constant 0 : i32
    return %arg0, %c0_i32 : i32, i32
  }
  func.func @transform_3(%arg0: i32, %arg1: i32) -> (i32, i32) {
    %c0_i32 = arith.constant 0 : i32
    %c0_i32_0 = arith.constant 0 : i32
    return %arg0, %c0_i32 : i32, i32
  }
  func.func @transform_4(%arg0: i32, %arg1: i32) -> (i32, i32) {
    %c0_i32 = arith.constant 0 : i32
    %c0_i32_0 = arith.constant 0 : i32
    return %arg0, %c0_i32 : i32, i32
  }
}

</mosaic_0001>

<bundles_post_ra>
// kernel: bimultigcn_forward.7
= control target key start
LH: loop header
LB: loop body
LE: loop exit
PB: predicated region body
PF: predicated region fallthrough
CT: control target
= control target key end

     0   :  { %s840_s1 = inlined_call_operand.vmem [shape: bf16[128,128], index: 1, kind: input, shape index: {}]   ;;  %s841_s0 = inlined_call_operand.vmem [shape: bf16[128,128], index: 0, kind: input, shape index: {}]   ;;  %s842_s2 = inlined_call_operand.vmem [shape: f32[128,128], index: 2, kind: input, shape index: {}]   ;;  %s843_s4 = inlined_call_operand.vmem [shape: f32[128,128], index: 4, kind: output, shape index: {1}]   ;;  %s844_s3 = inlined_call_operand.vmem [shape: bf16[128,128], index: 3, kind: output, shape index: {0}]  }
   0x1   :  { %v631_v0 = vld [vmem:[%s840_s1] sm:$0xff]   ;;  %v632_v1 = vld [vmem:[%s840_s1 + $0x8] sm:$0xff]   ;;  %v633_v2 = vld [vmem:[%s840_s1 + $0x10] sm:$0xff]  }
   0x2   :  { %583 = vmatprep.subr.bf16.mxu0 %v631_v0  ;;  %615 = vmatprep.subr.bf16.mxu1 %v631_v0  ;;  %v634_v3 = vld [vmem:[%s840_s1 + $0x18] sm:$0xff]   ;;  %v639_v4 = vld [vmem:[%s841_s0] sm:$0xff]   ;;  %v636_v7 = vld [vmem:[%s840_s1 + $0x28] sm:$0xff]  }
   0x3   :  { %584 = vmatpush3.bf16.msra.mxu0 %v631_v0  ;;  %623 = vmatpush3.bf16.msra.mxu1 %v631_v0  ;;  %v640_v5 = vld [vmem:[%s841_s0 + $0x20] sm:$0xff]   ;;  %v637_v8 = vld [vmem:[%s840_s1 + $0x30] sm:$0xff]   ;;  %v638_v9 = vld [vmem:[%s840_s1 + $0x38] sm:$0xff]  }
   0x4   :  { %585 = vmatprep.subr.bf16.mxu0 %v632_v1  ;;  %616 = vmatprep.subr.bf16.mxu1 %v632_v1  ;;  %v635_v6 = vld [vmem:[%s840_s1 + $0x20] sm:$0xff]   ;;  %v641_v10 = vld [vmem:[%s841_s0 + $0x8] sm:$0xff]   ;;  %v643_v12 = vld [vmem:[%s841_s0 + $0x10] sm:$0xff]  }
   0x5   :  { %599 = vmatprep.mubr.bf16.mxu0 %v639_v4  ;;  %607 = vmatprep.mubr.bf16.mxu1 %v640_v5  ;;  %v642_v11 = vld [vmem:[%s841_s0 + $0x28] sm:$0xff]   ;;  %v644_v13 = vld [vmem:[%s841_s0 + $0x30] sm:$0xff]   ;;  %v645_v14 = vld [vmem:[%s841_s0 + $0x18] sm:$0xff]  }
   0x6   :  { %v646_v15 = vld [vmem:[%s841_s0 + $0x38] sm:$0xff]   ;;  %v320_v16 = vld [vmem:[%s842_s2 + $0x10] sm:$0xff]  ;;  %v318_v18 = vld [vmem:[%s842_s2] sm:$0xff] }
   0x7   :  { %586 = vmatpush3.bf16.msra.mxu0 %v632_v1  ;;  %624 = vmatpush3.bf16.msra.mxu1 %v632_v1  ;;  %v328_v17 = vld [vmem:[%s842_s2 + $0x50] sm:$0xff]  ;;  %v326_v19 = vld [vmem:[%s842_s2 + $0x40] sm:$0xff]  ;;  %v321_v22 = vld [vmem:[%s842_s2 + $0x18] sm:$0xff] }
   0x8   :  { %587 = vmatprep.subr.bf16.mxu0 %v633_v2  ;;  %617 = vmatprep.subr.bf16.mxu1 %v633_v2  ;;  %v329_v23 = vld [vmem:[%s842_s2 + $0x58] sm:$0xff]  ;;  %v319_v28 = vld [vmem:[%s842_s2 + $0x8] sm:$0xff]  ;;  %v324_v44 = vld [vmem:[%s842_s2 + $0x30] sm:$0xff] }
   0x9   :  { %v327_v29 = vld [vmem:[%s842_s2 + $0x48] sm:$0xff]  ;;  %v332_v45 = vld [vmem:[%s842_s2 + $0x70] sm:$0xff]  ;;  %v322_v46 = vld [vmem:[%s842_s2 + $0x20] sm:$0xff] }
   0xa   :  { %v330_v47 = vld [vmem:[%s842_s2 + $0x60] sm:$0xff]  ;;  %v325_v50 = vld [vmem:[%s842_s2 + $0x38] sm:$0xff]  ;;  %v323_v56 = vld [vmem:[%s842_s2 + $0x28] sm:$0xff] }
   0xb   :  { %588 = vmatpush3.bf16.msra.mxu0 %v633_v2  ;;  %625 = vmatpush3.bf16.msra.mxu1 %v633_v2  ;;  %v333_v51 = vld [vmem:[%s842_s2 + $0x78] sm:$0xff]  ;;  %v331_v57 = vld [vmem:[%s842_s2 + $0x68] sm:$0xff] }
   0xc   :  { %589 = vmatprep.subr.bf16.mxu0 %v634_v3  ;;  %618 = vmatprep.subr.bf16.mxu1 %v634_v3 }
   0xf   :  { %590 = vmatpush3.bf16.msra.mxu0 %v634_v3  ;;  %626 = vmatpush3.bf16.msra.mxu1 %v634_v3 }
  0x10   :  { %591 = vmatprep.subr.bf16.mxu0 %v635_v6  ;;  %619 = vmatprep.subr.bf16.mxu1 %v635_v6 }
  0x13   :  { %592 = vmatpush3.bf16.msra.mxu0 %v635_v6  ;;  %627 = vmatpush3.bf16.msra.mxu1 %v635_v6 }
  0x14   :  { %593 = vmatprep.subr.bf16.mxu0 %v636_v7  ;;  %620 = vmatprep.subr.bf16.mxu1 %v636_v7 }
  0x17   :  { %594 = vmatpush3.bf16.msra.mxu0 %v636_v7  ;;  %628 = vmatpush3.bf16.msra.mxu1 %v636_v7 }
  0x18   :  { %595 = vmatprep.subr.bf16.mxu0 %v637_v8  ;;  %621 = vmatprep.subr.bf16.mxu1 %v637_v8 }
  0x1b   :  { %596 = vmatpush3.bf16.msra.mxu0 %v637_v8  ;;  %629 = vmatpush3.bf16.msra.mxu1 %v637_v8 }
  0x1c   :  { %597 = vmatprep.subr.bf16.mxu0 %v638_v9  ;;  %622 = vmatprep.subr.bf16.mxu1 %v638_v9 }
  0x1f   :  { %598 = vmatpush3.bf16.msra.mxu0 %v638_v9  ;;  %630 = vmatpush3.bf16.msra.mxu1 %v638_v9 }
  0x22   :  { %600 = vmatmul.mubr.bf16.vlgmr.msra.gmra.mrb[0].mxu0 %v641_v10  ;;  %608 = vmatmul.mubr.bf16.vlgmr.msra.gmra.mrb[0].mxu1 %v642_v11 }
  0x23   :  { %603 = vmatprep.mubr.bf16.mxu0 %v643_v12  ;;  %611 = vmatprep.mubr.bf16.mxu1 %v644_v13 }
  0x2a   :  { %604 = vmatmul.mubr.bf16.gmra.mrb[4].mxu0 %v645_v14  ;;  %612 = vmatmul.mubr.bf16.gmra.mrb[4].mxu1 %v646_v15 }
  0xf5   :  { %v601_v20 = vpop.f32.mrb[0].mxu0  ;;  %v609_v21 = vpop.f32.mrb[0].mxu1 }
  0xf6   :  { %v352_v24 = vadd.f32 %v601_v20, %v320_v16  ;;  %v360_v25 = vadd.f32 %v609_v21, %v328_v17  ;;  %v220_v26 = vpop.f32.mrb[1].mxu0  ;;  %v252_v27 = vpop.f32.mrb[1].mxu1 }
  0xf7   :  { %v350_v30 = vadd.f32 %v318_v18, %v220_v26  ;;  %v358_v31 = vadd.f32 %v326_v19, %v252_v27  ;;  %v602_v32 = vpop.f32.mrb[2].mxu0  ;;  %v610_v33 = vpop.f32.mrb[2].mxu1 }
  0xf8   :  { %448 = vst [vmem:[%s843_s4 + $0x10] sm:$0xff] %v352_v24  ;;  %456 = vst [vmem:[%s843_s4 + $0x50] sm:$0xff] %v360_v25  ;;  %v353_v34 = vadd.f32 %v602_v32, %v321_v22  ;;  %v361_v35 = vadd.f32 %v610_v33, %v329_v23  ;;  %v223_v36 = vpop.f32.mrb[3].mxu0  ;;  %v255_v37 = vpop.f32.mrb[3].mxu1 }
  0xf9   :  { %446 = vst [vmem:[%s843_s4] sm:$0xff] %v350_v30  ;;  %454 = vst [vmem:[%s843_s4 + $0x40] sm:$0xff] %v358_v31  ;;  %v351_v38 = vadd.f32 %v319_v28, %v223_v36  ;;  %v359_v39 = vadd.f32 %v327_v29, %v255_v37 }
  0xfa   :  { %v528_v40 = vpack.c.bf16 %v353_v34, %v352_v24  ;;  %449 = vst [vmem:[%s843_s4 + $0x18] sm:$0xff] %v353_v34  ;;  %v548_v41 = vpack.c.bf16 %v361_v35, %v360_v25  ;;  %457 = vst [vmem:[%s843_s4 + $0x58] sm:$0xff] %v361_v35 }
  0xfb   :  { %v523_v42 = vpack.c.bf16 %v351_v38, %v350_v30  ;;  %447 = vst [vmem:[%s843_s4 + $0x8] sm:$0xff] %v351_v38  ;;  %v543_v43 = vpack.c.bf16 %v359_v39, %v358_v31  ;;  %455 = vst [vmem:[%s843_s4 + $0x48] sm:$0xff] %v359_v39 }
  0xfc   :  { %560 = vst [vmem:[%s844_s3 + $0x8] sm:$0xff] %v528_v40   ;;  %564 = vst [vmem:[%s844_s3 + $0x28] sm:$0xff] %v548_v41  }
  0xfd   :  { %524 = vst [vmem:[%s844_s3] sm:$0xff] %v523_v42   ;;  %563 = vst [vmem:[%s844_s3 + $0x20] sm:$0xff] %v543_v43   ;;  %v605_v48 = vpop.f32.mrb[4].mxu0  ;;  %v613_v49 = vpop.f32.mrb[4].mxu1 }
  0xfe   :  { %v356_v52 = vadd.f32 %v605_v48, %v324_v44  ;;  %v364_v53 = vadd.f32 %v613_v49, %v332_v45  ;;  %v236_v54 = vpop.f32.mrb[5].mxu0  ;;  %v268_v55 = vpop.f32.mrb[5].mxu1 }
  0xff   :  { %v354_v58 = vadd.f32 %v322_v46, %v236_v54  ;;  %v362_v59 = vadd.f32 %v330_v47, %v268_v55  ;;  %v606_v60 = vpop.f32.mrb[6].mxu0  ;;  %v614_v61 = vpop.f32.mrb[6].mxu1 }
 0x100   :  { %452 = vst [vmem:[%s843_s4 + $0x30] sm:$0xff] %v356_v52  ;;  %460 = vst [vmem:[%s843_s4 + $0x70] sm:$0xff] %v364_v53  ;;  %v357_v62 = vadd.f32 %v606_v60, %v325_v50  ;;  %v365_v63 = vadd.f32 %v614_v61, %v333_v51  ;;  %v239_v0 = vpop.f32.mrb[7].mxu0  ;;  %v271_v1 = vpop.f32.mrb[7].mxu1 }
 0x101   :  { %450 = vst [vmem:[%s843_s4 + $0x20] sm:$0xff] %v354_v58  ;;  %458 = vst [vmem:[%s843_s4 + $0x60] sm:$0xff] %v362_v59  ;;  %v355_v2 = vadd.f32 %v323_v56, %v239_v0  ;;  %v363_v3 = vadd.f32 %v331_v57, %v271_v1 }
 0x102   :  { %v538_v4 = vpack.c.bf16 %v357_v62, %v356_v52  ;;  %453 = vst [vmem:[%s843_s4 + $0x38] sm:$0xff] %v357_v62  ;;  %v558_v5 = vpack.c.bf16 %v365_v63, %v364_v53  ;;  %461 = vst [vmem:[%s843_s4 + $0x78] sm:$0xff] %v365_v63 }
 0x103   :  { %v533_v6 = vpack.c.bf16 %v355_v2, %v354_v58  ;;  %451 = vst [vmem:[%s843_s4 + $0x28] sm:$0xff] %v355_v2  ;;  %v553_v7 = vpack.c.bf16 %v363_v3, %v362_v59  ;;  %459 = vst [vmem:[%s843_s4 + $0x68] sm:$0xff] %v363_v3 }
 0x104   :  { %562 = vst [vmem:[%s844_s3 + $0x18] sm:$0xff] %v538_v4   ;;  %566 = vst [vmem:[%s844_s3 + $0x38] sm:$0xff] %v558_v5  }
 0x105   :  { %561 = vst [vmem:[%s844_s3 + $0x10] sm:$0xff] %v533_v6   ;;  %565 = vst [vmem:[%s844_s3 + $0x30] sm:$0xff] %v553_v7  }

// kernel: bimultigcn_forward.8
= control target key start
LH: loop header
LB: loop body
LE: loop exit
PB: predicated region body
PF: predicated region fallthrough
CT: control target
= control target key end

     0   :  { %s1040_s1 = inlined_call_operand.vmem [shape: bf16[256,128], index: 1, kind: input, shape index: {}]   ;;  %s1041_s0 = inlined_call_operand.vmem [shape: bf16[128,256], index: 0, kind: input, shape index: {}]   ;;  %s1042_s2 = inlined_call_operand.vmem [shape: f32[128,128], index: 2, kind: input, shape index: {}, may-alias: {2,4}]   ;;  %s1043_s4 = inlined_call_operand.vmem [shape: f32[128,128], index: 4, kind: output, shape index: {1}, may-alias: {2,4}]   ;;  %s1044_s3 = inlined_call_operand.vmem [shape: bf16[128,128], index: 3, kind: output, shape index: {0}]  }
   0x1   :  { %v759_v0 = vld [vmem:[%s1040_s1 + $0x40] sm:$0xff]   ;;  %v761_v2 = vld [vmem:[%s1040_s1 + $0x48] sm:$0xff]   ;;  %v763_v4 = vld [vmem:[%s1040_s1 + $0x50] sm:$0xff]  }
   0x2   :  { %v760_v1 = vld [vmem:[%s1040_s1] sm:$0xff]   ;;  %679 = vmatprep.subr.bf16.mxu0 %v759_v0  ;;  %743 = vmatprep.subr.bf16.mxu1 %v759_v0  ;;  %v762_v3 = vld [vmem:[%s1040_s1 + $0x8] sm:$0xff]   ;;  %v764_v5 = vld [vmem:[%s1040_s1 + $0x10] sm:$0xff]  }
   0x3   :  { %680 = vmatpush3.bf16.msra.mxu0 %v760_v1  ;;  %751 = vmatpush3.bf16.msra.mxu1 %v760_v1  ;;  %v765_v6 = vld [vmem:[%s1040_s1 + $0x58] sm:$0xff]   ;;  %v767_v8 = vld [vmem:[%s1040_s1 + $0x60] sm:$0xff]   ;;  %v769_v10 = vld [vmem:[%s1040_s1 + $0x68] sm:$0xff]  }
   0x4   :  { %681 = vmatprep.subr.bf16.mxu0 %v761_v2  ;;  %744 = vmatprep.subr.bf16.mxu1 %v761_v2  ;;  %v766_v7 = vld [vmem:[%s1040_s1 + $0x18] sm:$0xff]   ;;  %v768_v9 = vld [vmem:[%s1040_s1 + $0x20] sm:$0xff]   ;;  %v770_v13 = vld [vmem:[%s1040_s1 + $0x28] sm:$0xff]  }
   0x5   :  { %v777_v11 = vld [vmem:[%s1041_s0 + $0x4] ss:$8 sps:$4 sm:$0xff]   ;;  %v771_v14 = vld [vmem:[%s1040_s1 + $0x70] sm:$0xff]   ;;  %v773_v16 = vld [vmem:[%s1040_s1 + $0x78] sm:$0xff]  }
   0x6   :  { %v780_v12 = vld [vmem:[%s1041_s0 + $0x44] ss:$8 sps:$4 sm:$0xff]   ;;  %314 = vmatprep.mubr.bf16.mxu0 %v777_v11  ;;  %v772_v15 = vld [vmem:[%s1040_s1 + $0x30] sm:$0xff]   ;;  %v774_v17 = vld [vmem:[%s1040_s1 + $0x38] sm:$0xff]  }
   0x7   :  { %682 = vmatpush3.bf16.msra.mxu0 %v762_v3  ;;  %752 = vmatpush3.bf16.msra.mxu1 %v762_v3  ;;  %v775_v18 = vld [vmem:[%s1041_s0] ss:$8 sps:$4 sm:$0xff]   ;;  %v781_v20 = vld [vmem:[%s1041_s0 + $0x14] ss:$8 sps:$4 sm:$0xff]   ;;  %v785_v22 = vld [vmem:[%s1041_s0 + $0x10] ss:$8 sps:$4 sm:$0xff]  }
   0x8   :  { %683 = vmatprep.subr.bf16.mxu0 %v763_v4  ;;  %745 = vmatprep.subr.bf16.mxu1 %v763_v4  ;;  %v778_v19 = vld [vmem:[%s1041_s0 + $0x40] ss:$8 sps:$4 sm:$0xff]   ;;  %v783_v21 = vld [vmem:[%s1041_s0 + $0x54] ss:$8 sps:$4 sm:$0xff]   ;;  %v786_v23 = vld [vmem:[%s1041_s0 + $0x50] ss:$8 sps:$4 sm:$0xff]  }
   0x9   :  { %346 = vmatprep.mubr.bf16.mxu1 %v780_v12  ;;  %v787_v24 = vld [vmem:[%s1041_s0 + $0x24] ss:$8 sps:$4 sm:$0xff]   ;;  %v791_v26 = vld [vmem:[%s1041_s0 + $0x20] ss:$8 sps:$4 sm:$0xff]   ;;  %v793_v28 = vld [vmem:[%s1041_s0 + $0x34] ss:$8 sps:$4 sm:$0xff]  }
   0xa   :  { %v789_v25 = vld [vmem:[%s1041_s0 + $0x64] ss:$8 sps:$4 sm:$0xff]   ;;  %v792_v27 = vld [vmem:[%s1041_s0 + $0x60] ss:$8 sps:$4 sm:$0xff]   ;;  %v795_v29 = vld [vmem:[%s1041_s0 + $0x74] ss:$8 sps:$4 sm:$0xff]  }
   0xb   :  { %684 = vmatpush3.bf16.msra.mxu0 %v764_v5  ;;  %753 = vmatpush3.bf16.msra.mxu1 %v764_v5  ;;  %v797_v30 = vld [vmem:[%s1041_s0 + $0x30] ss:$8 sps:$4 sm:$0xff]   ;;  %v510_v35 = vld [vmem:[%s1042_s2] sm:$0xff]  ;;  %v511_v43 = vld [vmem:[%s1042_s2 + $0x8] sm:$0xff] }
   0xc   :  { %685 = vmatprep.subr.bf16.mxu0 %v765_v6  ;;  %746 = vmatprep.subr.bf16.mxu1 %v765_v6  ;;  %v798_v31 = vld [vmem:[%s1041_s0 + $0x70] ss:$8 sps:$4 sm:$0xff]   ;;  %v518_v37 = vld [vmem:[%s1042_s2 + $0x40] sm:$0xff]  ;;  %v519_v45 = vld [vmem:[%s1042_s2 + $0x48] sm:$0xff] }
   0xf   :  { %686 = vmatpush3.bf16.msra.mxu0 %v766_v7  ;;  %754 = vmatpush3.bf16.msra.mxu1 %v766_v7 }
  0x10   :  { %687 = vmatprep.subr.bf16.mxu0 %v767_v8  ;;  %747 = vmatprep.subr.bf16.mxu1 %v767_v8 }
  0x13   :  { %688 = vmatpush3.bf16.msra.mxu0 %v768_v9  ;;  %755 = vmatpush3.bf16.msra.mxu1 %v768_v9 }
  0x14   :  { %689 = vmatprep.subr.bf16.mxu0 %v769_v10  ;;  %748 = vmatprep.subr.bf16.mxu1 %v769_v10 }
  0x17   :  { %690 = vmatpush3.bf16.msra.mxu0 %v770_v13  ;;  %756 = vmatpush3.bf16.msra.mxu1 %v770_v13 }
  0x18   :  { %691 = vmatprep.subr.bf16.mxu0 %v771_v14  ;;  %749 = vmatprep.subr.bf16.mxu1 %v771_v14 }
  0x1b   :  { %692 = vmatpush3.bf16.msra.mxu0 %v772_v15  ;;  %757 = vmatpush3.bf16.msra.mxu1 %v772_v15 }
  0x1c   :  { %693 = vmatprep.subr.bf16.mxu0 %v773_v16  ;;  %750 = vmatprep.subr.bf16.mxu1 %v773_v16 }
  0x1f   :  { %694 = vmatpush3.bf16.msra.mxu0 %v774_v17  ;;  %758 = vmatpush3.bf16.msra.mxu1 %v774_v17 }
  0x22   :  { %315 = vmatmul.mubr.bf16.vlgmr.msra.gmra.mrb[0].mxu0 %v775_v18  ;;  %347 = vmatmul.mubr.bf16.vlgmr.msra.gmra.mrb[0].mxu1 %v778_v19 }
  0x23   :  { %322 = vmatprep.mubr.bf16.mxu0 %v781_v20  ;;  %354 = vmatprep.mubr.bf16.mxu1 %v783_v21 }
  0x2a   :  { %323 = vmatmul.mubr.bf16.gmra.mrb[4].mxu0 %v785_v22  ;;  %355 = vmatmul.mubr.bf16.gmra.mrb[4].mxu1 %v786_v23 }
  0x2b   :  { %330 = vmatprep.mubr.bf16.mxu0 %v787_v24  ;;  %362 = vmatprep.mubr.bf16.mxu1 %v789_v25 }
  0x32   :  { %331 = vmatmul.mubr.bf16.gmra.mrb[8].mxu0 %v791_v26  ;;  %363 = vmatmul.mubr.bf16.gmra.mrb[8].mxu1 %v792_v27 }
  0x33   :  { %338 = vmatprep.mubr.bf16.mxu0 %v793_v28  ;;  %370 = vmatprep.mubr.bf16.mxu1 %v795_v29 }
  0x3a   :  { %339 = vmatmul.mubr.bf16.gmra.mrb[12].mxu0 %v797_v30  ;;  %371 = vmatmul.mubr.bf16.gmra.mrb[12].mxu1 %v798_v31 }
  0xf5   :  { %v695_v32 = vpop.f32.mrb[0].mxu0  ;;  %v719_v33 = vpop.f32.mrb[0].mxu1 }
  0xf6   :  { %v696_v34 = vpop.f32.mrb[1].mxu0  ;;  %v720_v36 = vpop.f32.mrb[1].mxu1 }
  0xf7   :  { %v697_v38 = vadd.f32 %v696_v34, %v695_v32  ;;  %v721_v39 = vadd.f32 %v720_v36, %v719_v33  ;;  %v698_v40 = vpop.f32.mrb[2].mxu0  ;;  %v722_v41 = vpop.f32.mrb[2].mxu1 }
  0xf8   :  { %v699_v42 = vpop.f32.mrb[3].mxu0  ;;  %v723_v44 = vpop.f32.mrb[3].mxu1 }
  0xf9   :  { %v526_v46 = vadd.f32 %v697_v38, %v510_v35  ;;  %v534_v47 = vadd.f32 %v721_v39, %v518_v37  ;;  %v700_v48 = vadd.f32 %v699_v42, %v698_v40  ;;  %v724_v49 = vadd.f32 %v723_v44, %v722_v41 }
  0xfb   :  { %542 = vst [vmem:[%s1043_s4] sm:$0xff] %v526_v46  ;;  %550 = vst [vmem:[%s1043_s4 + $0x40] sm:$0xff] %v534_v47  ;;  %v635_v50 = vpack.c.bf16 %v700_v48, %v697_v38  ;;  %v527_v51 = vadd.f32 %v700_v48, %v511_v43  ;;  %v655_v52 = vpack.c.bf16 %v724_v49, %v721_v39 }
  0xfc   :  { %v535_v53 = vadd.f32 %v724_v49, %v519_v45 }
  0xfd   :  { %636 = vst [vmem:[%s1044_s3] sm:$0xff] %v635_v50   ;;  %543 = vst [vmem:[%s1043_s4 + $0x8] sm:$0xff] %v527_v51  ;;  %v701_v54 = vpop.f32.mrb[4].mxu0  ;;  %v725_v55 = vpop.f32.mrb[4].mxu1 }
  0xfe   :  { %675 = vst [vmem:[%s1044_s3 + $0x20] sm:$0xff] %v655_v52   ;;  %551 = vst [vmem:[%s1043_s4 + $0x48] sm:$0xff] %v535_v53  ;;  %v702_v56 = vpop.f32.mrb[5].mxu0  ;;  %v726_v58 = vpop.f32.mrb[5].mxu1 }
  0xff   :  { %v703_v60 = vadd.f32 %v702_v56, %v701_v54  ;;  %v727_v61 = vadd.f32 %v726_v58, %v725_v55  ;;  %v704_v62 = vpop.f32.mrb[6].mxu0  ;;  %v728_v63 = vpop.f32.mrb[6].mxu1 }
 0x100   :  { %v705_v0 = vpop.f32.mrb[7].mxu0  ;;  %v729_v2 = vpop.f32.mrb[7].mxu1 }
 0x101   :  { %v706_v6 = vadd.f32 %v705_v0, %v704_v62  ;;  %v730_v7 = vadd.f32 %v729_v2, %v728_v63 }
 0x103   :  { %v640_v8 = vpack.c.bf16 %v706_v6, %v703_v60  ;;  %v660_v10 = vpack.c.bf16 %v730_v7, %v727_v61 }
 0x105   :  { %v512_v57 = vld [vmem:[%s1042_s2 + $0x10] sm:$0xff]  ;;  %v513_v1 = vld [vmem:[%s1042_s2 + $0x18] sm:$0xff]  ;;  %672 = vst [vmem:[%s1044_s3 + $0x8] sm:$0xff] %v640_v8   ;;  %676 = vst [vmem:[%s1044_s3 + $0x28] sm:$0xff] %v660_v10   ;;  %v707_v12 = vpop.f32.mrb[8].mxu0  ;;  %v731_v13 = vpop.f32.mrb[8].mxu1 }
 0x106   :  { %v520_v59 = vld [vmem:[%s1042_s2 + $0x50] sm:$0xff]  ;;  %v521_v3 = vld [vmem:[%s1042_s2 + $0x58] sm:$0xff]  ;;  %v528_v4 = vadd.f32 %v703_v60, %v512_v57  ;;  %v529_v9 = vadd.f32 %v706_v6, %v513_v1  ;;  %v708_v14 = vpop.f32.mrb[9].mxu0  ;;  %v732_v16 = vpop.f32.mrb[9].mxu1 }
 0x107   :  { %v536_v5 = vadd.f32 %v727_v61, %v520_v59  ;;  %v537_v11 = vadd.f32 %v730_v7, %v521_v3  ;;  %v709_v18 = vadd.f32 %v708_v14, %v707_v12  ;;  %v733_v19 = vadd.f32 %v732_v16, %v731_v13  ;;  %v710_v20 = vpop.f32.mrb[10].mxu0  ;;  %v734_v21 = vpop.f32.mrb[10].mxu1 }
 0x108   :  { %544 = vst [vmem:[%s1043_s4 + $0x10] sm:$0xff] %v528_v4  ;;  %545 = vst [vmem:[%s1043_s4 + $0x18] sm:$0xff] %v529_v9  ;;  %v711_v22 = vpop.f32.mrb[11].mxu0  ;;  %v735_v24 = vpop.f32.mrb[11].mxu1 }
 0x109   :  { %552 = vst [vmem:[%s1043_s4 + $0x50] sm:$0xff] %v536_v5  ;;  %553 = vst [vmem:[%s1043_s4 + $0x58] sm:$0xff] %v537_v11  ;;  %v712_v28 = vadd.f32 %v711_v22, %v710_v20  ;;  %v736_v29 = vadd.f32 %v735_v24, %v734_v21 }
 0x10b   :  { %v645_v30 = vpack.c.bf16 %v712_v28, %v709_v18  ;;  %v665_v32 = vpack.c.bf16 %v736_v29, %v733_v19 }
 0x10d   :  { %673 = vst [vmem:[%s1044_s3 + $0x10] sm:$0xff] %v645_v30   ;;  %677 = vst [vmem:[%s1044_s3 + $0x30] sm:$0xff] %v665_v32   ;;  %v713_v34 = vpop.f32.mrb[12].mxu0  ;;  %v737_v35 = vpop.f32.mrb[12].mxu1 }
 0x10e   :  { %v714_v36 = vpop.f32.mrb[13].mxu0  ;;  %v738_v38 = vpop.f32.mrb[13].mxu1 }
 0x10f   :  { %v715_v40 = vadd.f32 %v714_v36, %v713_v34  ;;  %v739_v41 = vadd.f32 %v738_v38, %v737_v35  ;;  %v716_v42 = vpop.f32.mrb[14].mxu0  ;;  %v740_v43 = vpop.f32.mrb[14].mxu1 }
 0x110   :  { %v514_v15 = vld [vmem:[%s1042_s2 + $0x20] sm:$0xff]  ;;  %v515_v23 = vld [vmem:[%s1042_s2 + $0x28] sm:$0xff]  ;;  %v717_v44 = vpop.f32.mrb[15].mxu0  ;;  %v741_v46 = vpop.f32.mrb[15].mxu1 }
 0x111   :  { %v522_v17 = vld [vmem:[%s1042_s2 + $0x60] sm:$0xff]  ;;  %v523_v25 = vld [vmem:[%s1042_s2 + $0x68] sm:$0xff]  ;;  %v530_v26 = vadd.f32 %v709_v18, %v514_v15  ;;  %v531_v31 = vadd.f32 %v712_v28, %v515_v23  ;;  %v718_v50 = vadd.f32 %v717_v44, %v716_v42  ;;  %v742_v51 = vadd.f32 %v741_v46, %v740_v43 }
 0x112   :  { %v538_v27 = vadd.f32 %v733_v19, %v522_v17  ;;  %v539_v33 = vadd.f32 %v736_v29, %v523_v25 }
 0x113   :  { %546 = vst [vmem:[%s1043_s4 + $0x20] sm:$0xff] %v530_v26  ;;  %547 = vst [vmem:[%s1043_s4 + $0x28] sm:$0xff] %v531_v31  ;;  %v650_v52 = vpack.c.bf16 %v718_v50, %v715_v40  ;;  %v670_v54 = vpack.c.bf16 %v742_v51, %v739_v41 }
 0x114   :  { %554 = vst [vmem:[%s1043_s4 + $0x60] sm:$0xff] %v538_v27  ;;  %555 = vst [vmem:[%s1043_s4 + $0x68] sm:$0xff] %v539_v33 }
 0x115   :  { %674 = vst [vmem:[%s1044_s3 + $0x18] sm:$0xff] %v650_v52   ;;  %678 = vst [vmem:[%s1044_s3 + $0x38] sm:$0xff] %v670_v54  }
 0x11b   :  { %v516_v37 = vld [vmem:[%s1042_s2 + $0x30] sm:$0xff]  ;;  %v517_v45 = vld [vmem:[%s1042_s2 + $0x38] sm:$0xff] }
 0x11c   :  { %v524_v39 = vld [vmem:[%s1042_s2 + $0x70] sm:$0xff]  ;;  %v525_v47 = vld [vmem:[%s1042_s2 + $0x78] sm:$0xff]  ;;  %v532_v48 = vadd.f32 %v715_v40, %v516_v37  ;;  %v533_v53 = vadd.f32 %v718_v50, %v517_v45 }
 0x11d   :  { %v540_v49 = vadd.f32 %v739_v41, %v524_v39  ;;  %v541_v55 = vadd.f32 %v742_v51, %v525_v47 }
 0x11e   :  { %548 = vst [vmem:[%s1043_s4 + $0x30] sm:$0xff] %v532_v48  ;;  %549 = vst [vmem:[%s1043_s4 + $0x38] sm:$0xff] %v533_v53 }
 0x11f   :  { %556 = vst [vmem:[%s1043_s4 + $0x70] sm:$0xff] %v540_v49  ;;  %557 = vst [vmem:[%s1043_s4 + $0x78] sm:$0xff] %v541_v55 }

// kernel: bimultigcn_forward.9
= control target key start
LH: loop header
LB: loop body
LE: loop exit
PB: predicated region body
PF: predicated region fallthrough
CT: control target
= control target key end

     0   :  { %s1448_s0 = inlined_call_operand.vmem [shape: bf16[128,256], index: 0, kind: input, shape index: {}]   ;;  %s1449_s1 = inlined_call_operand.vmem [shape: bf16[128,128], index: 1, kind: input, shape index: {}]   ;;  %s1450_s2 = inlined_call_operand.vmem [shape: f32[256,128], index: 2, kind: input, shape index: {}, may-alias: {2,4}]   ;;  %s1451_s4 = inlined_call_operand.vmem [shape: f32[256,128], index: 4, kind: output, shape index: {1}, may-alias: {2,4}]   ;;  %s1452_s3 = inlined_call_operand.vmem [shape: bf16[256,128], index: 3, kind: output, shape index: {0}]  }
   0x1   :  { %v1079_v0 = vld [vmem:[%s1448_s0 + $0x4] ss:$8 sps:$4 sm:$0xff]   ;;  %v1081_v1 = vld [vmem:[%s1448_s0] ss:$8 sps:$4 sm:$0xff]   ;;  %v1082_v2 = vld [vmem:[%s1448_s0 + $0x14] ss:$8 sps:$4 sm:$0xff]  }
   0x2   :  { %218 = vxpose.xlu1.c.b16.start [1/8] %v1079_v0, 128  ;;  %202 = vxpose.xlu0.c.b16.start [1/8] %v1081_v1, 128  ;;  %v1084_v3 = vld [vmem:[%s1448_s0 + $0x10] ss:$8 sps:$4 sm:$0xff]   ;;  %v1085_v4 = vld [vmem:[%s1448_s0 + $0x24] ss:$8 sps:$4 sm:$0xff]   ;;  %v1087_v5 = vld [vmem:[%s1448_s0 + $0x20] ss:$8 sps:$4 sm:$0xff]  }
   0x3   :  { %v1088_v6 = vld [vmem:[%s1448_s0 + $0x34] ss:$8 sps:$4 sm:$0xff]   ;;  %v1090_v7 = vld [vmem:[%s1448_s0 + $0x30] ss:$8 sps:$4 sm:$0xff]   ;;  %v1103_v8 = vld [vmem:[%s1449_s1] sm:$0xff]  }
   0x4   :  { %v1104_v9 = vld [vmem:[%s1449_s1 + $0x8] sm:$0xff]   ;;  %1015 = vmatprep.subr.bf16.mxu0 %v1103_v8  ;;  %1063 = vmatprep.subr.bf16.mxu1 %v1103_v8  ;;  %v1105_v12 = vld [vmem:[%s1449_s1 + $0x10] sm:$0xff]   ;;  %v1106_v15 = vld [vmem:[%s1449_s1 + $0x18] sm:$0xff]  }
   0x5   :  { %v1091_v10 = vld [vmem:[%s1448_s0 + $0x44] ss:$8 sps:$4 sm:$0xff]   ;;  %1016 = vmatpush3.bf16.msra.mxu0 %v1103_v8  ;;  %v1093_v11 = vld [vmem:[%s1448_s0 + $0x40] ss:$8 sps:$4 sm:$0xff]   ;;  %1071 = vmatpush3.bf16.msra.mxu1 %v1103_v8  ;;  %v1094_v13 = vld [vmem:[%s1448_s0 + $0x54] ss:$8 sps:$4 sm:$0xff]  }
   0x6   :  { %219 = vxpose.xlu1.c.b16.cont [2/8] %v1082_v2, 128  ;;  %203 = vxpose.xlu0.c.b16.cont [2/8] %v1084_v3, 128  ;;  %v1096_v14 = vld [vmem:[%s1448_s0 + $0x50] ss:$8 sps:$4 sm:$0xff]   ;;  %v1097_v16 = vld [vmem:[%s1448_s0 + $0x64] ss:$8 sps:$4 sm:$0xff]   ;;  %v1099_v17 = vld [vmem:[%s1448_s0 + $0x60] ss:$8 sps:$4 sm:$0xff]  }
   0x7   :  { %1017 = vmatprep.subr.bf16.mxu0 %v1104_v9  ;;  %1064 = vmatprep.subr.bf16.mxu1 %v1104_v9  ;;  %v1107_v18 = vld [vmem:[%s1449_s1 + $0x20] sm:$0xff]   ;;  %v1100_v19 = vld [vmem:[%s1448_s0 + $0x74] ss:$8 sps:$4 sm:$0xff]   ;;  %v1102_v20 = vld [vmem:[%s1448_s0 + $0x70] ss:$8 sps:$4 sm:$0xff]  }
   0x8   :  { %v1108_v21 = vld [vmem:[%s1449_s1 + $0x28] sm:$0xff]   ;;  %v1109_v22 = vld [vmem:[%s1449_s1 + $0x30] sm:$0xff]   ;;  %v1110_v23 = vld [vmem:[%s1449_s1 + $0x38] sm:$0xff]  }
   0x9   :  { %1018 = vmatpush3.bf16.msra.mxu0 %v1104_v9  ;;  %1072 = vmatpush3.bf16.msra.mxu1 %v1104_v9  ;;  %v720_v40 = vld [vmem:[%s1450_s2 + $0x90] sm:$0xff]  ;;  %v718_v42 = vld [vmem:[%s1450_s2 + $0x80] sm:$0xff]  ;;  %v721_v45 = vld [vmem:[%s1450_s2 + $0x98] sm:$0xff] }
   0xa   :  { %220 = vxpose.xlu1.c.b16.cont [3/8] %v1085_v4, 128  ;;  %204 = vxpose.xlu0.c.b16.cont [3/8] %v1087_v5, 128  ;;  %v704_v41 = vld [vmem:[%s1450_s2 + $0x10] sm:$0xff]  ;;  %v702_v44 = vld [vmem:[%s1450_s2] sm:$0xff]  ;;  %v705_v49 = vld [vmem:[%s1450_s2 + $0x18] sm:$0xff] }
   0xb   :  { %1019 = vmatprep.subr.bf16.mxu0 %v1105_v12  ;;  %1065 = vmatprep.subr.bf16.mxu1 %v1105_v12  ;;  %v719_v50 = vld [vmem:[%s1450_s2 + $0x88] sm:$0xff] }
   0xc   :  { %v703_v55 = vld [vmem:[%s1450_s2 + $0x8] sm:$0xff] }
   0xd   :  { %1020 = vmatpush3.bf16.msra.mxu0 %v1105_v12  ;;  %1073 = vmatpush3.bf16.msra.mxu1 %v1105_v12 }
   0xe   :  { %221 = vxpose.xlu1.c.b16.cont [4/8] %v1088_v6, 128  ;;  %205 = vxpose.xlu0.c.b16.cont [4/8] %v1090_v7, 128 }
   0xf   :  { %1021 = vmatprep.subr.bf16.mxu0 %v1106_v15  ;;  %1066 = vmatprep.subr.bf16.mxu1 %v1106_v15 }
  0x11   :  { %1022 = vmatpush3.bf16.msra.mxu0 %v1106_v15  ;;  %1074 = vmatpush3.bf16.msra.mxu1 %v1106_v15 }
  0x12   :  { %222 = vxpose.xlu1.c.b16.cont [5/8] %v1091_v10, 128  ;;  %206 = vxpose.xlu0.c.b16.cont [5/8] %v1093_v11, 128 }
  0x13   :  { %1023 = vmatprep.subr.bf16.mxu0 %v1107_v18  ;;  %1067 = vmatprep.subr.bf16.mxu1 %v1107_v18 }
  0x15   :  { %1024 = vmatpush3.bf16.msra.mxu0 %v1107_v18  ;;  %1075 = vmatpush3.bf16.msra.mxu1 %v1107_v18 }
  0x16   :  { %223 = vxpose.xlu1.c.b16.cont [6/8] %v1094_v13, 128  ;;  %207 = vxpose.xlu0.c.b16.cont [6/8] %v1096_v14, 128 }
  0x17   :  { %1025 = vmatprep.subr.bf16.mxu0 %v1108_v21  ;;  %1068 = vmatprep.subr.bf16.mxu1 %v1108_v21 }
  0x19   :  { %1026 = vmatpush3.bf16.msra.mxu0 %v1108_v21  ;;  %1076 = vmatpush3.bf16.msra.mxu1 %v1108_v21 }
  0x1a   :  { %224 = vxpose.xlu1.c.b16.cont [7/8] %v1097_v16, 128  ;;  %208 = vxpose.xlu0.c.b16.cont [7/8] %v1099_v17, 128 }
  0x1b   :  { %1027 = vmatprep.subr.bf16.mxu0 %v1109_v22  ;;  %1069 = vmatprep.subr.bf16.mxu1 %v1109_v22 }
  0x1d   :  { %1028 = vmatpush3.bf16.msra.mxu0 %v1109_v22  ;;  %1077 = vmatpush3.bf16.msra.mxu1 %v1109_v22 }
  0x1e   :  { %225 = vxpose.xlu1.c.b16.end [8/8] %v1100_v19, 128  ;;  %209 = vxpose.xlu0.c.b16.end [8/8] %v1102_v20, 128 }
  0x1f   :  { %1029 = vmatprep.subr.bf16.mxu0 %v1110_v23  ;;  %1070 = vmatprep.subr.bf16.mxu1 %v1110_v23 }
  0x21   :  { %1030 = vmatpush3.bf16.msra.mxu0 %v1110_v23  ;;  %1078 = vmatpush3.bf16.msra.mxu1 %v1110_v23 }
  0x68   :  { %v226_v24 = vpop.trf.xlu1  ;;  %v210_v25 = vpop.trf.xlu0 }
  0x69   :  { %1047 = vmatprep.mubr.bf16.mxu1 %v226_v24  ;;  %1031 = vmatprep.mubr.bf16.mxu0 %v210_v25 }
  0x6c   :  { %v227_v26 = vpop.trf.xlu1  ;;  %v211_v27 = vpop.trf.xlu0 }
  0x6d   :  { %1048 = vmatmul.mubr.bf16.vlgmr.msra.gmra.mrb[0].mxu1 %v227_v26  ;;  %1032 = vmatmul.mubr.bf16.vlgmr.msra.gmra.mrb[0].mxu0 %v211_v27 }
  0x70   :  { %v228_v28 = vpop.trf.xlu1  ;;  %v212_v29 = vpop.trf.xlu0 }
  0x71   :  { %1051 = vmatprep.mubr.bf16.mxu1 %v228_v28  ;;  %1035 = vmatprep.mubr.bf16.mxu0 %v212_v29 }
  0x74   :  { %v229_v30 = vpop.trf.xlu1  ;;  %v213_v31 = vpop.trf.xlu0 }
  0x75   :  { %1052 = vmatmul.mubr.bf16.gmra.mrb[4].mxu1 %v229_v30  ;;  %1036 = vmatmul.mubr.bf16.gmra.mrb[4].mxu0 %v213_v31 }
  0x78   :  { %v230_v32 = vpop.trf.xlu1  ;;  %v214_v33 = vpop.trf.xlu0 }
  0x79   :  { %1055 = vmatprep.mubr.bf16.mxu1 %v230_v32  ;;  %1039 = vmatprep.mubr.bf16.mxu0 %v214_v33 }
  0x7c   :  { %v231_v34 = vpop.trf.xlu1  ;;  %v215_v35 = vpop.trf.xlu0 }
  0x7d   :  { %1056 = vmatmul.mubr.bf16.gmra.mrb[8].mxu1 %v231_v34  ;;  %1040 = vmatmul.mubr.bf16.gmra.mrb[8].mxu0 %v215_v35 }
  0x80   :  { %v232_v36 = vpop.trf.xlu1  ;;  %v216_v37 = vpop.trf.xlu0 }
  0x81   :  { %1059 = vmatprep.mubr.bf16.mxu1 %v232_v36  ;;  %1043 = vmatprep.mubr.bf16.mxu0 %v216_v37 }
  0x84   :  { %v233_v38 = vpop.trf.xlu1  ;;  %v217_v39 = vpop.trf.xlu0 }
  0x85   :  { %1060 = vmatmul.mubr.bf16.gmra.mrb[12].mxu1 %v233_v38  ;;  %1044 = vmatmul.mubr.bf16.gmra.mrb[12].mxu0 %v217_v39 }
 0x140   :  { %v1049_v43 = vpop.f32.mrb[0].mxu1  ;;  %v1033_v46 = vpop.f32.mrb[0].mxu0 }
 0x141   :  { %v752_v47 = vadd.f32 %v1049_v43, %v720_v40  ;;  %v380_v48 = vpop.f32.mrb[1].mxu1  ;;  %v736_v51 = vadd.f32 %v1033_v46, %v704_v41  ;;  %v316_v52 = vpop.f32.mrb[1].mxu0 }
 0x142   :  { %v750_v53 = vadd.f32 %v718_v42, %v380_v48  ;;  %v1050_v54 = vpop.f32.mrb[2].mxu1  ;;  %v734_v56 = vadd.f32 %v702_v44, %v316_v52  ;;  %v1034_v57 = vpop.f32.mrb[2].mxu0 }
 0x143   :  { %784 = vst [vmem:[%s1451_s4 + $0x90] sm:$0xff] %v752_v47  ;;  %v944_v58 = vpack.c.bf16 %v1050_v54, %v1049_v43  ;;  %v753_v59 = vadd.f32 %v1050_v54, %v721_v45  ;;  %v383_v60 = vpop.f32.mrb[3].mxu1  ;;  %768 = vst [vmem:[%s1451_s4 + $0x10] sm:$0xff] %v736_v51  ;;  %v904_v61 = vpack.c.bf16 %v1034_v57, %v1033_v46  ;;  %v319_v63 = vpop.f32.mrb[3].mxu0 }
 0x144   :  { %782 = vst [vmem:[%s1451_s4 + $0x80] sm:$0xff] %v750_v53  ;;  %v737_v62 = vadd.f32 %v1034_v57, %v705_v49  ;;  %v939_v0 = vpack.c.bf16 %v383_v60, %v380_v48  ;;  %v751_v1 = vadd.f32 %v719_v50, %v383_v60  ;;  %766 = vst [vmem:[%s1451_s4] sm:$0xff] %v734_v56 }
 0x145   :  { %984 = vst [vmem:[%s1452_s3 + $0x48] sm:$0xff] %v944_v58   ;;  %785 = vst [vmem:[%s1451_s4 + $0x98] sm:$0xff] %v753_v59  ;;  %v899_v2 = vpack.c.bf16 %v319_v63, %v316_v52  ;;  %v735_v3 = vadd.f32 %v703_v55, %v319_v63 }
 0x146   :  { %976 = vst [vmem:[%s1452_s3 + $0x8] sm:$0xff] %v904_v61   ;;  %769 = vst [vmem:[%s1451_s4 + $0x18] sm:$0xff] %v737_v62 }
 0x147   :  { %983 = vst [vmem:[%s1452_s3 + $0x40] sm:$0xff] %v939_v0   ;;  %783 = vst [vmem:[%s1451_s4 + $0x88] sm:$0xff] %v751_v1 }
 0x148   :  { %900 = vst [vmem:[%s1452_s3] sm:$0xff] %v899_v2   ;;  %v1053_v7 = vpop.f32.mrb[4].mxu1  ;;  %v1037_v10 = vpop.f32.mrb[4].mxu0 }
 0x149   :  { %v396_v12 = vpop.f32.mrb[5].mxu1  ;;  %v332_v16 = vpop.f32.mrb[5].mxu0 }
 0x14a   :  { %v1054_v18 = vpop.f32.mrb[6].mxu1  ;;  %v1038_v21 = vpop.f32.mrb[6].mxu0 }
 0x14b   :  { %v954_v22 = vpack.c.bf16 %v1054_v18, %v1053_v7  ;;  %v399_v24 = vpop.f32.mrb[7].mxu1  ;;  %v914_v25 = vpack.c.bf16 %v1038_v21, %v1037_v10  ;;  %v335_v27 = vpop.f32.mrb[7].mxu0 }
 0x14c   :  { %v949_v28 = vpack.c.bf16 %v399_v24, %v396_v12  ;;  %v909_v30 = vpack.c.bf16 %v335_v27, %v332_v16 }
 0x14d   :  { %986 = vst [vmem:[%s1452_s3 + $0x58] sm:$0xff] %v954_v22   ;;  %978 = vst [vmem:[%s1452_s3 + $0x18] sm:$0xff] %v914_v25  }
 0x14e   :  { %v724_v4 = vld [vmem:[%s1450_s2 + $0xb0] sm:$0xff]  ;;  %985 = vst [vmem:[%s1452_s3 + $0x50] sm:$0xff] %v949_v28   ;;  %977 = vst [vmem:[%s1452_s3 + $0x10] sm:$0xff] %v909_v30  }
 0x14f   :  { %767 = vst [vmem:[%s1451_s4 + $0x8] sm:$0xff] %v735_v3  ;;  %v756_v11 = vadd.f32 %v1053_v7, %v724_v4 }
 0x150   :  { %v1057_v35 = vpop.f32.mrb[8].mxu1  ;;  %v1041_v38 = vpop.f32.mrb[8].mxu0 }
 0x151   :  { %v412_v40 = vpop.f32.mrb[9].mxu1  ;;  %v348_v44 = vpop.f32.mrb[9].mxu0 }
 0x152   :  { %v1058_v46 = vpop.f32.mrb[10].mxu1  ;;  %v1042_v49 = vpop.f32.mrb[10].mxu0 }
 0x153   :  { %v964_v50 = vpack.c.bf16 %v1058_v46, %v1057_v35  ;;  %v415_v52 = vpop.f32.mrb[11].mxu1  ;;  %v924_v53 = vpack.c.bf16 %v1042_v49, %v1041_v38  ;;  %v351_v55 = vpop.f32.mrb[11].mxu0 }
 0x154   :  { %v959_v56 = vpack.c.bf16 %v415_v52, %v412_v40  ;;  %v919_v58 = vpack.c.bf16 %v351_v55, %v348_v44 }
 0x155   :  { %988 = vst [vmem:[%s1452_s3 + $0x68] sm:$0xff] %v964_v50   ;;  %980 = vst [vmem:[%s1452_s3 + $0x28] sm:$0xff] %v924_v53  }
 0x156   :  { %v708_v5 = vld [vmem:[%s1450_s2 + $0x30] sm:$0xff]  ;;  %v722_v6 = vld [vmem:[%s1450_s2 + $0xa0] sm:$0xff]  ;;  %v725_v9 = vld [vmem:[%s1450_s2 + $0xb8] sm:$0xff]  ;;  %987 = vst [vmem:[%s1452_s3 + $0x60] sm:$0xff] %v959_v56  }
 0x157   :  { %v706_v8 = vld [vmem:[%s1450_s2 + $0x20] sm:$0xff]  ;;  %v709_v13 = vld [vmem:[%s1450_s2 + $0x38] sm:$0xff]  ;;  %v723_v14 = vld [vmem:[%s1450_s2 + $0xa8] sm:$0xff]  ;;  %v740_v15 = vadd.f32 %v1037_v10, %v708_v5  ;;  %v754_v17 = vadd.f32 %v722_v6, %v396_v12  ;;  %v757_v23 = vadd.f32 %v1054_v18, %v725_v9  ;;  %979 = vst [vmem:[%s1452_s3 + $0x20] sm:$0xff] %v919_v58  }
 0x158   :  { %v707_v19 = vld [vmem:[%s1450_s2 + $0x28] sm:$0xff]  ;;  %v738_v20 = vadd.f32 %v706_v8, %v332_v16  ;;  %v741_v26 = vadd.f32 %v1038_v21, %v709_v13  ;;  %v755_v29 = vadd.f32 %v723_v14, %v399_v24  ;;  %v1061_v63 = vpop.f32.mrb[12].mxu1  ;;  %v1045_v2 = vpop.f32.mrb[12].mxu0 }
 0x159   :  { %788 = vst [vmem:[%s1451_s4 + $0xb0] sm:$0xff] %v756_v11  ;;  %772 = vst [vmem:[%s1451_s4 + $0x30] sm:$0xff] %v740_v15  ;;  %v739_v31 = vadd.f32 %v707_v19, %v335_v27  ;;  %v428_v4 = vpop.f32.mrb[13].mxu1  ;;  %v364_v8 = vpop.f32.mrb[13].mxu0 }
 0x15a   :  { %786 = vst [vmem:[%s1451_s4 + $0xa0] sm:$0xff] %v754_v17  ;;  %770 = vst [vmem:[%s1451_s4 + $0x20] sm:$0xff] %v738_v20  ;;  %v1062_v10 = vpop.f32.mrb[14].mxu1  ;;  %v1046_v13 = vpop.f32.mrb[14].mxu0 }
 0x15b   :  { %789 = vst [vmem:[%s1451_s4 + $0xb8] sm:$0xff] %v757_v23  ;;  %773 = vst [vmem:[%s1451_s4 + $0x38] sm:$0xff] %v741_v26  ;;  %v974_v14 = vpack.c.bf16 %v1062_v10, %v1061_v63  ;;  %v431_v16 = vpop.f32.mrb[15].mxu1  ;;  %v934_v17 = vpack.c.bf16 %v1046_v13, %v1045_v2  ;;  %v367_v19 = vpop.f32.mrb[15].mxu0 }
 0x15c   :  { %787 = vst [vmem:[%s1451_s4 + $0xa8] sm:$0xff] %v755_v29  ;;  %v969_v20 = vpack.c.bf16 %v431_v16, %v428_v4  ;;  %v929_v22 = vpack.c.bf16 %v367_v19, %v364_v8 }
 0x15d   :  { %990 = vst [vmem:[%s1452_s3 + $0x78] sm:$0xff] %v974_v14   ;;  %982 = vst [vmem:[%s1452_s3 + $0x38] sm:$0xff] %v934_v17  }
 0x15e   :  { %989 = vst [vmem:[%s1452_s3 + $0x70] sm:$0xff] %v969_v20   ;;  %981 = vst [vmem:[%s1452_s3 + $0x30] sm:$0xff] %v929_v22  }
 0x163   :  { %v728_v32 = vld [vmem:[%s1450_s2 + $0xd0] sm:$0xff] }
 0x164   :  { %771 = vst [vmem:[%s1451_s4 + $0x28] sm:$0xff] %v739_v31  ;;  %v760_v39 = vadd.f32 %v1057_v35, %v728_v32 }
 0x16b   :  { %v712_v33 = vld [vmem:[%s1450_s2 + $0x50] sm:$0xff]  ;;  %v726_v34 = vld [vmem:[%s1450_s2 + $0xc0] sm:$0xff]  ;;  %v729_v37 = vld [vmem:[%s1450_s2 + $0xd8] sm:$0xff] }
 0x16c   :  { %v710_v36 = vld [vmem:[%s1450_s2 + $0x40] sm:$0xff]  ;;  %v713_v41 = vld [vmem:[%s1450_s2 + $0x58] sm:$0xff]  ;;  %v727_v42 = vld [vmem:[%s1450_s2 + $0xc8] sm:$0xff]  ;;  %v744_v43 = vadd.f32 %v1041_v38, %v712_v33  ;;  %v758_v45 = vadd.f32 %v726_v34, %v412_v40  ;;  %v761_v51 = vadd.f32 %v1058_v46, %v729_v37 }
 0x16d   :  { %v711_v47 = vld [vmem:[%s1450_s2 + $0x48] sm:$0xff]  ;;  %v742_v48 = vadd.f32 %v710_v36, %v348_v44  ;;  %v745_v54 = vadd.f32 %v1042_v49, %v713_v41  ;;  %v759_v57 = vadd.f32 %v727_v42, %v415_v52 }
 0x16e   :  { %792 = vst [vmem:[%s1451_s4 + $0xd0] sm:$0xff] %v760_v39  ;;  %776 = vst [vmem:[%s1451_s4 + $0x50] sm:$0xff] %v744_v43  ;;  %v743_v59 = vadd.f32 %v711_v47, %v351_v55 }
 0x16f   :  { %790 = vst [vmem:[%s1451_s4 + $0xc0] sm:$0xff] %v758_v45  ;;  %774 = vst [vmem:[%s1451_s4 + $0x40] sm:$0xff] %v742_v48 }
 0x170   :  { %793 = vst [vmem:[%s1451_s4 + $0xd8] sm:$0xff] %v761_v51  ;;  %777 = vst [vmem:[%s1451_s4 + $0x58] sm:$0xff] %v745_v54 }
 0x171   :  { %791 = vst [vmem:[%s1451_s4 + $0xc8] sm:$0xff] %v759_v57 }
 0x178   :  { %v732_v60 = vld [vmem:[%s1450_s2 + $0xf0] sm:$0xff] }
 0x179   :  { %775 = vst [vmem:[%s1451_s4 + $0x48] sm:$0xff] %v743_v59  ;;  %v764_v3 = vadd.f32 %v1061_v63, %v732_v60 }
 0x180   :  { %v716_v61 = vld [vmem:[%s1450_s2 + $0x70] sm:$0xff]  ;;  %v730_v62 = vld [vmem:[%s1450_s2 + $0xe0] sm:$0xff]  ;;  %v733_v1 = vld [vmem:[%s1450_s2 + $0xf8] sm:$0xff] }
 0x181   :  { %v714_v0 = vld [vmem:[%s1450_s2 + $0x60] sm:$0xff]  ;;  %v717_v5 = vld [vmem:[%s1450_s2 + $0x78] sm:$0xff]  ;;  %v731_v6 = vld [vmem:[%s1450_s2 + $0xe8] sm:$0xff]  ;;  %v748_v7 = vadd.f32 %v1045_v2, %v716_v61  ;;  %v762_v9 = vadd.f32 %v730_v62, %v428_v4  ;;  %v765_v15 = vadd.f32 %v1062_v10, %v733_v1 }
 0x182   :  { %v715_v11 = vld [vmem:[%s1450_s2 + $0x68] sm:$0xff]  ;;  %v746_v12 = vadd.f32 %v714_v0, %v364_v8  ;;  %v749_v18 = vadd.f32 %v1046_v13, %v717_v5  ;;  %v763_v21 = vadd.f32 %v731_v6, %v431_v16 }
 0x183   :  { %796 = vst [vmem:[%s1451_s4 + $0xf0] sm:$0xff] %v764_v3  ;;  %780 = vst [vmem:[%s1451_s4 + $0x70] sm:$0xff] %v748_v7  ;;  %v747_v23 = vadd.f32 %v715_v11, %v367_v19 }
 0x184   :  { %794 = vst [vmem:[%s1451_s4 + $0xe0] sm:$0xff] %v762_v9  ;;  %778 = vst [vmem:[%s1451_s4 + $0x60] sm:$0xff] %v746_v12 }
 0x185   :  { %797 = vst [vmem:[%s1451_s4 + $0xf8] sm:$0xff] %v765_v15  ;;  %781 = vst [vmem:[%s1451_s4 + $0x78] sm:$0xff] %v749_v18 }
 0x186   :  { %795 = vst [vmem:[%s1451_s4 + $0xe8] sm:$0xff] %v763_v21  ;;  %779 = vst [vmem:[%s1451_s4 + $0x68] sm:$0xff] %v747_v23 }

// kernel: bimultigcn_forward.6
= control target key start
LH: loop header
LB: loop body
LE: loop exit
PB: predicated region body
PF: predicated region fallthrough
CT: control target
= control target key end

     0   :  { %s2068_s3 = inlined_call_operand.vmem [shape: bf16[256,128], index: 3, kind: input, shape index: {}]   ;;  %s2069_s0 = inlined_call_operand.vmem [shape: bf16[256,256], index: 0, kind: input, shape index: {}]   ;;  %s2070_s1 = inlined_call_operand.vmem [shape: bf16[256,256], index: 1, kind: input, shape index: {}]   ;;  %s2071_s2 = inlined_call_operand.vmem [shape: bf16[256,256], index: 2, kind: input, shape index: {}]   ;;  %s2072_s4 = inlined_call_operand.vmem [shape: f32[256,128], index: 4, kind: input, shape index: {}]   ;;  %s2073_s6 = inlined_call_operand.vmem [shape: f32[256,128], index: 6, kind: output, shape index: {1}]   ;;  %s2074_s5 = inlined_call_operand.vmem [shape: bf16[256,128], index: 5, kind: output, shape index: {0}]  }
   0x1   :  { %v1437_v0 = vld [vmem:[%s2068_s3 + $0x40] sm:$0xff]   ;;  %v1439_v2 = vld [vmem:[%s2068_s3 + $0x48] sm:$0xff]   ;;  %v1441_v4 = vld [vmem:[%s2068_s3 + $0x50] sm:$0xff]  }
   0x2   :  { %v1438_v1 = vld [vmem:[%s2068_s3] sm:$0xff]   ;;  %1309 = vmatprep.subr.bf16.mxu0 %v1437_v0  ;;  %1421 = vmatprep.subr.bf16.mxu1 %v1437_v0  ;;  %v1440_v3 = vld [vmem:[%s2068_s3 + $0x8] sm:$0xff]   ;;  %v1442_v5 = vld [vmem:[%s2068_s3 + $0x10] sm:$0xff]  }
   0x3   :  { %1310 = vmatpush3.bf16.msra.mxu0 %v1438_v1  ;;  %1429 = vmatpush3.bf16.msra.mxu1 %v1438_v1  ;;  %v1443_v6 = vld [vmem:[%s2068_s3 + $0x58] sm:$0xff]   ;;  %v1445_v8 = vld [vmem:[%s2068_s3 + $0x60] sm:$0xff]   ;;  %v1447_v10 = vld [vmem:[%s2068_s3 + $0x68] sm:$0xff]  }
   0x4   :  { %1311 = vmatprep.subr.bf16.mxu0 %v1439_v2  ;;  %1422 = vmatprep.subr.bf16.mxu1 %v1439_v2  ;;  %v1444_v7 = vld [vmem:[%s2068_s3 + $0x18] sm:$0xff]   ;;  %v1446_v9 = vld [vmem:[%s2068_s3 + $0x20] sm:$0xff]   ;;  %v97_v12 = vld [vmem:[%s2069_s0 + $0x8] sm:$0xff] }
   0x5   :  { %v96_v11 = vld [vmem:[%s2069_s0] sm:$0xff]  ;;  %v1448_v14 = vld [vmem:[%s2068_s3 + $0x28] sm:$0xff]   ;;  %v1449_v19 = vld [vmem:[%s2068_s3 + $0x70] sm:$0xff]  }
   0x6   :  { %v128_v13 = vld [vmem:[%s2070_s1] sm:$0xff]  ;;  %v129_v15 = vld [vmem:[%s2070_s1 + $0x8] sm:$0xff]  ;;  %v98_v31 = vld [vmem:[%s2069_s0 + $0x10] sm:$0xff] }
   0x7   :  { %1312 = vmatpush3.bf16.msra.mxu0 %v1440_v3  ;;  %1430 = vmatpush3.bf16.msra.mxu1 %v1440_v3  ;;  %v160_v16 = vadd.bf16 %v128_v13, %v96_v11  ;;  %v192_v17 = vld [vmem:[%s2071_s2] sm:$0xff]  ;;  %v193_v18 = vld [vmem:[%s2071_s2 + $0x8] sm:$0xff]  ;;  %v161_v20 = vadd.bf16 %v129_v15, %v97_v12  ;;  %v99_v32 = vld [vmem:[%s2069_s0 + $0x18] sm:$0xff] }
   0x8   :  { %1313 = vmatprep.subr.bf16.mxu0 %v1441_v4  ;;  %1423 = vmatprep.subr.bf16.mxu1 %v1441_v4  ;;  %v112_v21 = vld [vmem:[%s2069_s0 + $0x80] sm:$0xff]  ;;  %v113_v22 = vld [vmem:[%s2069_s0 + $0x88] sm:$0xff]  ;;  %v130_v33 = vld [vmem:[%s2070_s1 + $0x10] sm:$0xff] }
   0x9   :  { %v144_v23 = vld [vmem:[%s2070_s1 + $0x80] sm:$0xff]  ;;  %v1554_v24 = vadd.bf16 %v192_v17, %v160_v16  ;;  %v145_v25 = vld [vmem:[%s2070_s1 + $0x88] sm:$0xff]  ;;  %v225_v29 = vadd.bf16 %v193_v18, %v161_v20  ;;  %v1450_v34 = vld [vmem:[%s2068_s3 + $0x30] sm:$0xff]   ;;  %v162_v39 = vadd.bf16 %v130_v33, %v98_v31 }
   0xa   :  { %v176_v26 = vadd.bf16 %v144_v23, %v112_v21  ;;  %v208_v27 = vld [vmem:[%s2071_s2 + $0x80] sm:$0xff]  ;;  %v209_v28 = vld [vmem:[%s2071_s2 + $0x88] sm:$0xff]  ;;  %v177_v30 = vadd.bf16 %v145_v25, %v113_v22  ;;  %v131_v36 = vld [vmem:[%s2070_s1 + $0x18] sm:$0xff] }
   0xb   :  { %1314 = vmatpush3.bf16.msra.mxu0 %v1442_v5  ;;  %1431 = vmatpush3.bf16.msra.mxu1 %v1442_v5  ;;  %v1103_v37 = vcombine.high %v1554_v24, %v225_v29  ;;  %v163_v40 = vadd.bf16 %v131_v36, %v99_v32  ;;  %v114_v41 = vld [vmem:[%s2069_s0 + $0x90] sm:$0xff]  ;;  %v115_v42 = vld [vmem:[%s2069_s0 + $0x98] sm:$0xff]  ;;  %v100_v56 = vld [vmem:[%s2069_s0 + $0x20] sm:$0xff]  ;;  %v1102_v2 = vcombine.low %v1554_v24, %v225_v29 }
   0xc   :  { %1315 = vmatprep.subr.bf16.mxu0 %v1443_v6  ;;  %1424 = vmatprep.subr.bf16.mxu1 %v1443_v6  ;;  %v240_v35 = vadd.bf16 %v208_v27, %v176_v26  ;;  %v241_v38 = vadd.bf16 %v209_v28, %v177_v30  ;;  %v146_v43 = vld [vmem:[%s2070_s1 + $0x90] sm:$0xff]  ;;  %v195_v45 = vld [vmem:[%s2071_s2 + $0x18] sm:$0xff]  ;;  %v101_v57 = vld [vmem:[%s2069_s0 + $0x28] sm:$0xff] }
   0xd   :  { %v194_v44 = vld [vmem:[%s2071_s2 + $0x10] sm:$0xff]  ;;  %v147_v46 = vld [vmem:[%s2070_s1 + $0x98] sm:$0xff]  ;;  %v178_v47 = vadd.bf16 %v146_v43, %v114_v41  ;;  %576 = vmatprep.mubr.bf16.mxu0 %v1103_v37  ;;  %v227_v55 = vadd.bf16 %v195_v45, %v163_v40  ;;  %v132_v60 = vld [vmem:[%s2070_s1 + $0x20] sm:$0xff] }
   0xe   :  { %v1451_v48 = vld [vmem:[%s2068_s3 + $0x78] sm:$0xff]   ;;  %v1119_v49 = vcombine.high %v240_v35, %v241_v38  ;;  %v210_v50 = vld [vmem:[%s2071_s2 + $0x90] sm:$0xff]  ;;  %v179_v52 = vadd.bf16 %v147_v46, %v115_v42  ;;  %v226_v54 = vadd.bf16 %v194_v44, %v162_v39  ;;  %v133_v61 = vld [vmem:[%s2070_s1 + $0x28] sm:$0xff]  ;;  %v1118_v3 = vcombine.low %v240_v35, %v241_v38 }
   0xf   :  { %1316 = vmatpush3.bf16.msra.mxu0 %v1444_v7  ;;  %1432 = vmatpush3.bf16.msra.mxu1 %v1444_v7  ;;  %v211_v51 = vld [vmem:[%s2071_s2 + $0x98] sm:$0xff]  ;;  %v242_v58 = vadd.bf16 %v210_v50, %v178_v47  ;;  %v116_v62 = vld [vmem:[%s2069_s0 + $0xa0] sm:$0xff]  ;;  %v117_v63 = vld [vmem:[%s2069_s0 + $0xa8] sm:$0xff]  ;;  %v164_v5 = vadd.bf16 %v132_v60, %v100_v56  ;;  %v165_v6 = vadd.bf16 %v133_v61, %v101_v57 }
  0x10   :  { %1317 = vmatprep.subr.bf16.mxu0 %v1445_v8  ;;  %1425 = vmatprep.subr.bf16.mxu1 %v1445_v8  ;;  %v1452_v53 = vld [vmem:[%s2068_s3 + $0x38] sm:$0xff]   ;;  %v243_v59 = vadd.bf16 %v211_v51, %v179_v52  ;;  %v148_v0 = vld [vmem:[%s2070_s1 + $0xa0] sm:$0xff]  ;;  %v149_v1 = vld [vmem:[%s2070_s1 + $0xa8] sm:$0xff]  ;;  %v1105_v4 = vcombine.high %v226_v54, %v227_v55  ;;  %v1104_v26 = vcombine.low %v226_v54, %v227_v55 }
  0x11   :  { %640 = vmatprep.mubr.bf16.mxu1 %v1119_v49  ;;  %v196_v8 = vld [vmem:[%s2071_s2 + $0x20] sm:$0xff]  ;;  %v197_v11 = vld [vmem:[%s2071_s2 + $0x28] sm:$0xff]  ;;  %v102_v15 = vld [vmem:[%s2069_s0 + $0x30] sm:$0xff] }
  0x12   :  { %v1121_v7 = vcombine.high %v242_v58, %v243_v59  ;;  %v212_v12 = vld [vmem:[%s2071_s2 + $0xa0] sm:$0xff]  ;;  %v213_v13 = vld [vmem:[%s2071_s2 + $0xa8] sm:$0xff]  ;;  %v103_v16 = vld [vmem:[%s2069_s0 + $0x38] sm:$0xff]  ;;  %v229_v17 = vadd.bf16 %v197_v11, %v165_v6  ;;  %v1120_v27 = vcombine.low %v242_v58, %v243_v59 }
  0x13   :  { %1318 = vmatpush3.bf16.msra.mxu0 %v1446_v9  ;;  %1433 = vmatpush3.bf16.msra.mxu1 %v1446_v9  ;;  %v180_v9 = vadd.bf16 %v148_v0, %v116_v62  ;;  %v134_v20 = vld [vmem:[%s2070_s1 + $0x30] sm:$0xff]  ;;  %v135_v21 = vld [vmem:[%s2070_s1 + $0x38] sm:$0xff]  ;;  %v104_v40 = vld [vmem:[%s2069_s0 + $0x40] sm:$0xff] }
  0x14   :  { %1319 = vmatprep.subr.bf16.mxu0 %v1447_v10  ;;  %1426 = vmatprep.subr.bf16.mxu1 %v1447_v10  ;;  %v181_v10 = vadd.bf16 %v149_v1, %v117_v63  ;;  %v118_v22 = vld [vmem:[%s2069_s0 + $0xb0] sm:$0xff]  ;;  %v119_v23 = vld [vmem:[%s2069_s0 + $0xb8] sm:$0xff]  ;;  %v166_v28 = vadd.bf16 %v134_v20, %v102_v15  ;;  %v167_v29 = vadd.bf16 %v135_v21, %v103_v16  ;;  %v105_v41 = vld [vmem:[%s2069_s0 + $0x48] sm:$0xff] }
  0x15   :  { %v244_v18 = vadd.bf16 %v212_v12, %v180_v9  ;;  %v150_v24 = vld [vmem:[%s2070_s1 + $0xb0] sm:$0xff]  ;;  %v151_v25 = vld [vmem:[%s2070_s1 + $0xb8] sm:$0xff]  ;;  %v136_v44 = vld [vmem:[%s2070_s1 + $0x40] sm:$0xff] }
  0x16   :  { %v198_v32 = vld [vmem:[%s2071_s2 + $0x30] sm:$0xff]  ;;  %v199_v33 = vld [vmem:[%s2071_s2 + $0x38] sm:$0xff]  ;;  %v183_v35 = vadd.bf16 %v151_v25, %v119_v23  ;;  %v137_v45 = vld [vmem:[%s2070_s1 + $0x48] sm:$0xff] }
  0x17   :  { %1320 = vmatpush3.bf16.msra.mxu0 %v1448_v14  ;;  %1434 = vmatpush3.bf16.msra.mxu1 %v1448_v14  ;;  %v228_v14 = vadd.bf16 %v196_v8, %v164_v5  ;;  %v214_v36 = vld [vmem:[%s2071_s2 + $0xb0] sm:$0xff]  ;;  %v215_v37 = vld [vmem:[%s2071_s2 + $0xb8] sm:$0xff]  ;;  %v230_v38 = vadd.bf16 %v198_v32, %v166_v28  ;;  %v231_v39 = vadd.bf16 %v199_v33, %v167_v29  ;;  %v120_v46 = vld [vmem:[%s2069_s0 + $0xc0] sm:$0xff] }
  0x18   :  { %1321 = vmatprep.subr.bf16.mxu0 %v1449_v19  ;;  %1427 = vmatprep.subr.bf16.mxu1 %v1449_v19  ;;  %v245_v19 = vadd.bf16 %v213_v13, %v181_v10  ;;  %v247_v43 = vadd.bf16 %v215_v37, %v183_v35  ;;  %v121_v47 = vld [vmem:[%s2069_s0 + $0xc8] sm:$0xff]  ;;  %v169_v55 = vadd.bf16 %v137_v45, %v105_v41  ;;  %v200_v56 = vld [vmem:[%s2071_s2 + $0x40] sm:$0xff]  ;;  %v106_v63 = vld [vmem:[%s2069_s0 + $0x50] sm:$0xff] }
  0x19   :  { %v1107_v30 = vcombine.high %v228_v14, %v229_v17  ;;  %v153_v49 = vld [vmem:[%s2070_s1 + $0xc8] sm:$0xff]  ;;  %v1106_v50 = vcombine.low %v228_v14, %v229_v17  ;;  %v1109_v52 = vcombine.high %v230_v38, %v231_v39  ;;  %v216_v60 = vld [vmem:[%s2071_s2 + $0xc0] sm:$0xff]  ;;  %v107_v0 = vld [vmem:[%s2069_s0 + $0x58] sm:$0xff]  ;;  %v1108_v10 = vcombine.low %v230_v38, %v231_v39 }
  0x1a   :  { %v1123_v31 = vcombine.high %v244_v18, %v245_v19  ;;  %v1122_v51 = vcombine.low %v244_v18, %v245_v19  ;;  %v185_v58 = vadd.bf16 %v153_v49, %v121_v47  ;;  %v201_v59 = vld [vmem:[%s2071_s2 + $0x48] sm:$0xff]  ;;  %v139_v5 = vld [vmem:[%s2070_s1 + $0x58] sm:$0xff]  ;;  %v122_v6 = vld [vmem:[%s2069_s0 + $0xd0] sm:$0xff] }
  0x1b   :  { %1322 = vmatpush3.bf16.msra.mxu0 %v1450_v34  ;;  %1435 = vmatpush3.bf16.msra.mxu1 %v1450_v34  ;;  %v182_v34 = vadd.bf16 %v150_v24, %v118_v22  ;;  %v217_v61 = vld [vmem:[%s2071_s2 + $0xc8] sm:$0xff]  ;;  %v233_v1 = vadd.bf16 %v201_v59, %v169_v55  ;;  %v154_v8 = vld [vmem:[%s2070_s1 + $0xd0] sm:$0xff]  ;;  %v155_v9 = vld [vmem:[%s2070_s1 + $0xd8] sm:$0xff]  ;;  %v171_v13 = vadd.bf16 %v139_v5, %v107_v0 }
  0x1c   :  { %1323 = vmatprep.subr.bf16.mxu0 %v1451_v48  ;;  %1428 = vmatprep.subr.bf16.mxu1 %v1451_v48  ;;  %v152_v48 = vld [vmem:[%s2070_s1 + $0xc0] sm:$0xff]  ;;  %v202_v16 = vld [vmem:[%s2071_s2 + $0x50] sm:$0xff]  ;;  %v203_v17 = vld [vmem:[%s2071_s2 + $0x58] sm:$0xff]  ;;  %v186_v18 = vadd.bf16 %v154_v8, %v122_v6 }
  0x1d   :  { %v246_v42 = vadd.bf16 %v214_v36, %v182_v34  ;;  %v184_v57 = vadd.bf16 %v152_v48, %v120_v46  ;;  %v218_v20 = vld [vmem:[%s2071_s2 + $0xd0] sm:$0xff]  ;;  %v219_v21 = vld [vmem:[%s2071_s2 + $0xd8] sm:$0xff]  ;;  %v235_v23 = vadd.bf16 %v203_v17, %v171_v13  ;;  %v108_v24 = vld [vmem:[%s2069_s0 + $0x60] sm:$0xff] }
  0x1e   :  { %v109_v25 = vld [vmem:[%s2069_s0 + $0x68] sm:$0xff]  ;;  %v140_v28 = vld [vmem:[%s2070_s1 + $0x60] sm:$0xff]  ;;  %v110_v47 = vld [vmem:[%s2069_s0 + $0x70] sm:$0xff] }
  0x1f   :  { %1324 = vmatpush3.bf16.msra.mxu0 %v1452_v53  ;;  %1436 = vmatpush3.bf16.msra.mxu1 %v1452_v53  ;;  %v168_v53 = vadd.bf16 %v136_v44, %v104_v40  ;;  %v1125_v54 = vcombine.high %v246_v42, %v247_v43  ;;  %v1124_v11 = vcombine.low %v246_v42, %v247_v43  ;;  %v141_v29 = vld [vmem:[%s2070_s1 + $0x68] sm:$0xff]  ;;  %v156_v32 = vld [vmem:[%s2070_s1 + $0xe0] sm:$0xff]  ;;  %v111_v48 = vld [vmem:[%s2069_s0 + $0x78] sm:$0xff] }
  0x20   :  { %v157_v33 = vld [vmem:[%s2070_s1 + $0xe8] sm:$0xff]  ;;  %v172_v37 = vadd.bf16 %v140_v28, %v108_v24  ;;  %v173_v39 = vadd.bf16 %v141_v29, %v109_v25  ;;  %v204_v40 = vld [vmem:[%s2071_s2 + $0x60] sm:$0xff]  ;;  %v127_v55 = vld [vmem:[%s2069_s0 + $0xf8] sm:$0xff] }
  0x21   :  { %v232_v62 = vadd.bf16 %v200_v56, %v168_v53  ;;  %v205_v43 = vld [vmem:[%s2071_s2 + $0x68] sm:$0xff]  ;;  %v220_v44 = vld [vmem:[%s2071_s2 + $0xe0] sm:$0xff]  ;;  %v143_v53 = vld [vmem:[%s2070_s1 + $0x78] sm:$0xff] }
  0x22   :  { %577 = vmatmul.mubr.bf16.vlgmr.msra.gmra.mrb[0].mxu0 %v1102_v2  ;;  %641 = vmatmul.mubr.bf16.vlgmr.msra.gmra.mrb[0].mxu1 %v1118_v3  ;;  %v248_v2 = vadd.bf16 %v216_v60, %v184_v57  ;;  %v249_v3 = vadd.bf16 %v217_v61, %v185_v58  ;;  %v221_v45 = vld [vmem:[%s2071_s2 + $0xe8] sm:$0xff]  ;;  %v236_v46 = vadd.bf16 %v204_v40, %v172_v37  ;;  %v158_v56 = vld [vmem:[%s2070_s1 + $0xf0] sm:$0xff]  ;;  %v159_v57 = vld [vmem:[%s2070_s1 + $0xf8] sm:$0xff] }
  0x23   :  { %584 = vmatprep.mubr.bf16.mxu0 %v1105_v4  ;;  %648 = vmatprep.mubr.bf16.mxu1 %v1121_v7  ;;  %v138_v4 = vld [vmem:[%s2070_s1 + $0x50] sm:$0xff]  ;;  %v123_v7 = vld [vmem:[%s2069_s0 + $0xd8] sm:$0xff]  ;;  %v1111_v14 = vcombine.high %v232_v62, %v233_v1  ;;  %v1110_v34 = vcombine.low %v232_v62, %v233_v1  ;;  %v237_v49 = vadd.bf16 %v205_v43, %v173_v39  ;;  %v772_v24 = vld [vmem:[%s2072_s4] sm:$0xff] }
  0x24   :  { %v170_v12 = vadd.bf16 %v138_v4, %v106_v63  ;;  %v1127_v15 = vcombine.high %v248_v2, %v249_v3  ;;  %v187_v19 = vadd.bf16 %v155_v9, %v123_v7  ;;  %v1126_v35 = vcombine.low %v248_v2, %v249_v3  ;;  %v206_v0 = vld [vmem:[%s2071_s2 + $0x70] sm:$0xff]  ;;  %v207_v3 = vld [vmem:[%s2071_s2 + $0x78] sm:$0xff]  ;;  %v788_v25 = vld [vmem:[%s2072_s4 + $0x80] sm:$0xff] }
  0x25   :  { %v175_v61 = vadd.bf16 %v143_v53, %v111_v48  ;;  %v1115_v62 = vcombine.high %v236_v46, %v237_v49  ;;  %v191_v2 = vadd.bf16 %v159_v57, %v127_v55  ;;  %v222_v4 = vld [vmem:[%s2071_s2 + $0xf0] sm:$0xff]  ;;  %v223_v5 = vld [vmem:[%s2071_s2 + $0xf8] sm:$0xff] }
  0x26   :  { %v234_v22 = vadd.bf16 %v202_v16, %v170_v12 }
  0x27   :  { %v239_v7 = vadd.bf16 %v207_v3, %v175_v61  ;;  %v255_v9 = vadd.bf16 %v223_v5, %v191_v2 }
  0x28   :  { %v1113_v36 = vcombine.high %v234_v22, %v235_v23  ;;  %v1112_v58 = vcombine.low %v234_v22, %v235_v23 }
  0x2a   :  { %585 = vmatmul.mubr.bf16.gmra.mrb[4].mxu0 %v1104_v26  ;;  %649 = vmatmul.mubr.bf16.gmra.mrb[4].mxu1 %v1120_v27  ;;  %v250_v26 = vadd.bf16 %v218_v20, %v186_v18  ;;  %v251_v27 = vadd.bf16 %v219_v21, %v187_v19 }
  0x2b   :  { %592 = vmatprep.mubr.bf16.mxu0 %v1107_v30  ;;  %656 = vmatprep.mubr.bf16.mxu1 %v1123_v31  ;;  %v124_v30 = vld [vmem:[%s2069_s0 + $0xe0] sm:$0xff]  ;;  %v125_v31 = vld [vmem:[%s2069_s0 + $0xe8] sm:$0xff] }
  0x2c   :  { %v1129_v38 = vcombine.high %v250_v26, %v251_v27  ;;  %v188_v41 = vadd.bf16 %v156_v32, %v124_v30  ;;  %v189_v42 = vadd.bf16 %v157_v33, %v125_v31  ;;  %v1128_v59 = vcombine.low %v250_v26, %v251_v27  ;;  %v773_v32 = vld [vmem:[%s2072_s4 + $0x8] sm:$0xff] }
  0x2d   :  { %v789_v33 = vld [vmem:[%s2072_s4 + $0x88] sm:$0xff] }
  0x32   :  { %593 = vmatmul.mubr.bf16.gmra.mrb[8].mxu0 %v1106_v50  ;;  %657 = vmatmul.mubr.bf16.gmra.mrb[8].mxu1 %v1122_v51  ;;  %v252_v50 = vadd.bf16 %v220_v44, %v188_v41  ;;  %v253_v51 = vadd.bf16 %v221_v45, %v189_v42 }
  0x33   :  { %600 = vmatprep.mubr.bf16.mxu0 %v1109_v52  ;;  %664 = vmatprep.mubr.bf16.mxu1 %v1125_v54  ;;  %v142_v52 = vld [vmem:[%s2070_s1 + $0x70] sm:$0xff] }
  0x34   :  { %v126_v54 = vld [vmem:[%s2069_s0 + $0xf0] sm:$0xff]  ;;  %v174_v60 = vadd.bf16 %v142_v52, %v110_v47  ;;  %v1131_v63 = vcombine.high %v252_v50, %v253_v51 }
  0x35   :  { %v190_v1 = vadd.bf16 %v158_v56, %v126_v54 }
  0x36   :  { %v238_v6 = vadd.bf16 %v206_v0, %v174_v60 }
  0x37   :  { %v254_v8 = vadd.bf16 %v222_v4, %v190_v1 }
  0x38   :  { %v1117_v12 = vcombine.high %v238_v6, %v239_v7 }
  0x39   :  { %v1133_v13 = vcombine.high %v254_v8, %v255_v9 }
  0x3a   :  { %601 = vmatmul.mubr.bf16.gmra.mrb[12].mxu0 %v1108_v10  ;;  %665 = vmatmul.mubr.bf16.gmra.mrb[12].mxu1 %v1124_v11  ;;  %v1114_v10 = vcombine.low %v236_v46, %v237_v49  ;;  %v1130_v11 = vcombine.low %v252_v50, %v253_v51  ;;  %v774_v50 = vld [vmem:[%s2072_s4 + $0x10] sm:$0xff] }
  0x3b   :  { %608 = vmatprep.mubr.bf16.mxu0 %v1111_v14  ;;  %672 = vmatprep.mubr.bf16.mxu1 %v1127_v15  ;;  %v1116_v14 = vcombine.low %v238_v6, %v239_v7  ;;  %v1132_v15 = vcombine.low %v254_v8, %v255_v9  ;;  %v790_v51 = vld [vmem:[%s2072_s4 + $0x90] sm:$0xff] }
  0x42   :  { %609 = vmatmul.mubr.bf16.gmra.mrb[16].mxu0 %v1110_v34  ;;  %673 = vmatmul.mubr.bf16.gmra.mrb[16].mxu1 %v1126_v35 }
  0x43   :  { %616 = vmatprep.mubr.bf16.mxu0 %v1113_v36  ;;  %680 = vmatprep.mubr.bf16.mxu1 %v1129_v38 }
  0x4a   :  { %617 = vmatmul.mubr.bf16.gmra.mrb[20].mxu0 %v1112_v58  ;;  %681 = vmatmul.mubr.bf16.gmra.mrb[20].mxu1 %v1128_v59  ;;  %v775_v58 = vld [vmem:[%s2072_s4 + $0x18] sm:$0xff] }
  0x4b   :  { %624 = vmatprep.mubr.bf16.mxu0 %v1115_v62  ;;  %688 = vmatprep.mubr.bf16.mxu1 %v1131_v63  ;;  %v791_v59 = vld [vmem:[%s2072_s4 + $0x98] sm:$0xff] }
  0x52   :  { %625 = vmatmul.mubr.bf16.gmra.mrb[24].mxu0 %v1114_v10  ;;  %689 = vmatmul.mubr.bf16.gmra.mrb[24].mxu1 %v1130_v11 }
  0x53   :  { %632 = vmatprep.mubr.bf16.mxu0 %v1117_v12  ;;  %696 = vmatprep.mubr.bf16.mxu1 %v1133_v13  ;;  %v776_v12 = vld [vmem:[%s2072_s4 + $0x20] sm:$0xff] }
  0x54   :  { %v792_v13 = vld [vmem:[%s2072_s4 + $0xa0] sm:$0xff] }
  0x5a   :  { %633 = vmatmul.mubr.bf16.gmra.mrb[28].mxu0 %v1116_v14  ;;  %697 = vmatmul.mubr.bf16.gmra.mrb[28].mxu1 %v1132_v15 }
  0xf5   :  { %v1325_v16 = vpop.f32.mrb[0].mxu0  ;;  %v1373_v17 = vpop.f32.mrb[0].mxu1 }
  0xf6   :  { %v1326_v18 = vpop.f32.mrb[1].mxu0  ;;  %v1374_v19 = vpop.f32.mrb[1].mxu1 }
  0xf7   :  { %v1327_v20 = vadd.f32 %v1326_v18, %v1325_v16  ;;  %v1375_v21 = vadd.f32 %v1374_v19, %v1373_v17  ;;  %v1328_v22 = vpop.f32.mrb[2].mxu0  ;;  %v1376_v23 = vpop.f32.mrb[2].mxu1 }
  0xf8   :  { %v1329_v26 = vpop.f32.mrb[3].mxu0  ;;  %v1377_v27 = vpop.f32.mrb[3].mxu1 }
  0xf9   :  { %v836_v28 = vmul.f32 0.33333334, %v1327_v20  ;;  %v852_v29 = vmul.f32 0.33333334, %v1375_v21  ;;  %v1330_v30 = vadd.f32 %v1329_v26, %v1328_v22  ;;  %v1378_v31 = vadd.f32 %v1377_v27, %v1376_v23  ;;  %v777_v20 = vld [vmem:[%s2072_s4 + $0x28] sm:$0xff] }
  0xfa   :  { %v793_v21 = vld [vmem:[%s2072_s4 + $0xa8] sm:$0xff] }
  0xfb   :  { %v868_v34 = vadd.f32 %v836_v28, %v772_v24  ;;  %v884_v35 = vadd.f32 %v852_v29, %v788_v25  ;;  %v837_v36 = vmul.f32 0.33333334, %v1330_v30  ;;  %v853_v37 = vmul.f32 0.33333334, %v1378_v31 }
  0xfd   :  { %1060 = vst [vmem:[%s2073_s6] sm:$0xff] %v868_v34  ;;  %1076 = vst [vmem:[%s2073_s6 + $0x80] sm:$0xff] %v884_v35  ;;  %v869_v38 = vadd.f32 %v837_v36, %v773_v32  ;;  %v885_v39 = vadd.f32 %v853_v37, %v789_v33  ;;  %v1331_v40 = vpop.f32.mrb[4].mxu0  ;;  %v1379_v41 = vpop.f32.mrb[4].mxu1 }
  0xfe   :  { %v1332_v42 = vpop.f32.mrb[5].mxu0  ;;  %v1380_v43 = vpop.f32.mrb[5].mxu1 }
  0xff   :  { %v1217_v44 = vpack.c.bf16 %v869_v38, %v868_v34  ;;  %1061 = vst [vmem:[%s2073_s6 + $0x8] sm:$0xff] %v869_v38  ;;  %v1257_v45 = vpack.c.bf16 %v885_v39, %v884_v35  ;;  %1077 = vst [vmem:[%s2073_s6 + $0x88] sm:$0xff] %v885_v39  ;;  %v1333_v46 = vadd.f32 %v1332_v42, %v1331_v40  ;;  %v1334_v48 = vpop.f32.mrb[6].mxu0  ;;  %v1382_v49 = vpop.f32.mrb[6].mxu1  ;;  %v778_v38 = vld [vmem:[%s2072_s4 + $0x30] sm:$0xff] }
 0x100   :  { %v1381_v47 = vadd.f32 %v1380_v43, %v1379_v41  ;;  %v1335_v52 = vpop.f32.mrb[7].mxu0  ;;  %v1383_v53 = vpop.f32.mrb[7].mxu1  ;;  %v794_v39 = vld [vmem:[%s2072_s4 + $0xb0] sm:$0xff] }
 0x101   :  { %1218 = vst [vmem:[%s2074_s5] sm:$0xff] %v1217_v44   ;;  %1301 = vst [vmem:[%s2074_s5 + $0x40] sm:$0xff] %v1257_v45   ;;  %v838_v54 = vmul.f32 0.33333334, %v1333_v46  ;;  %v1336_v56 = vadd.f32 %v1335_v52, %v1334_v48  ;;  %v1384_v57 = vadd.f32 %v1383_v53, %v1382_v49  ;;  %v779_v46 = vld [vmem:[%s2072_s4 + $0x38] sm:$0xff] }
 0x102   :  { %v854_v55 = vmul.f32 0.33333334, %v1381_v47  ;;  %v795_v47 = vld [vmem:[%s2072_s4 + $0xb8] sm:$0xff] }
 0x103   :  { %v870_v60 = vadd.f32 %v838_v54, %v774_v50  ;;  %v839_v62 = vmul.f32 0.33333334, %v1336_v56  ;;  %v855_v63 = vmul.f32 0.33333334, %v1384_v57 }
 0x104   :  { %v886_v61 = vadd.f32 %v854_v55, %v790_v51 }
 0x105   :  { %1062 = vst [vmem:[%s2073_s6 + $0x10] sm:$0xff] %v870_v60  ;;  %v871_v0 = vadd.f32 %v839_v62, %v775_v58  ;;  %v887_v1 = vadd.f32 %v855_v63, %v791_v59  ;;  %v1337_v2 = vpop.f32.mrb[8].mxu0  ;;  %v1385_v3 = vpop.f32.mrb[8].mxu1 }
 0x106   :  { %1078 = vst [vmem:[%s2073_s6 + $0x90] sm:$0xff] %v886_v61  ;;  %v1338_v4 = vpop.f32.mrb[9].mxu0  ;;  %v1386_v5 = vpop.f32.mrb[9].mxu1 }
 0x107   :  { %v1222_v6 = vpack.c.bf16 %v871_v0, %v870_v60  ;;  %1063 = vst [vmem:[%s2073_s6 + $0x18] sm:$0xff] %v871_v0  ;;  %v1262_v7 = vpack.c.bf16 %v887_v1, %v886_v61  ;;  %1079 = vst [vmem:[%s2073_s6 + $0x98] sm:$0xff] %v887_v1  ;;  %v1339_v8 = vadd.f32 %v1338_v4, %v1337_v2  ;;  %v1340_v10 = vpop.f32.mrb[10].mxu0  ;;  %v1388_v11 = vpop.f32.mrb[10].mxu1  ;;  %v780_v0 = vld [vmem:[%s2072_s4 + $0x40] sm:$0xff] }
 0x108   :  { %v1387_v9 = vadd.f32 %v1386_v5, %v1385_v3  ;;  %v1341_v14 = vpop.f32.mrb[11].mxu0  ;;  %v1389_v15 = vpop.f32.mrb[11].mxu1  ;;  %v796_v1 = vld [vmem:[%s2072_s4 + $0xc0] sm:$0xff] }
 0x109   :  { %1294 = vst [vmem:[%s2074_s5 + $0x8] sm:$0xff] %v1222_v6   ;;  %1302 = vst [vmem:[%s2074_s5 + $0x48] sm:$0xff] %v1262_v7   ;;  %v840_v16 = vmul.f32 0.33333334, %v1339_v8  ;;  %v1342_v18 = vadd.f32 %v1341_v14, %v1340_v10  ;;  %v1390_v19 = vadd.f32 %v1389_v15, %v1388_v11  ;;  %v781_v8 = vld [vmem:[%s2072_s4 + $0x48] sm:$0xff] }
 0x10a   :  { %v856_v17 = vmul.f32 0.33333334, %v1387_v9  ;;  %v797_v9 = vld [vmem:[%s2072_s4 + $0xc8] sm:$0xff] }
 0x10b   :  { %v872_v22 = vadd.f32 %v840_v16, %v776_v12  ;;  %v841_v24 = vmul.f32 0.33333334, %v1342_v18  ;;  %v857_v25 = vmul.f32 0.33333334, %v1390_v19 }
 0x10c   :  { %v888_v23 = vadd.f32 %v856_v17, %v792_v13 }
 0x10d   :  { %1064 = vst [vmem:[%s2073_s6 + $0x20] sm:$0xff] %v872_v22  ;;  %v873_v26 = vadd.f32 %v841_v24, %v777_v20  ;;  %v889_v27 = vadd.f32 %v857_v25, %v793_v21  ;;  %v1343_v28 = vpop.f32.mrb[12].mxu0  ;;  %v1391_v29 = vpop.f32.mrb[12].mxu1 }
 0x10e   :  { %1080 = vst [vmem:[%s2073_s6 + $0xa0] sm:$0xff] %v888_v23  ;;  %v1344_v30 = vpop.f32.mrb[13].mxu0  ;;  %v1392_v31 = vpop.f32.mrb[13].mxu1 }
 0x10f   :  { %v1227_v32 = vpack.c.bf16 %v873_v26, %v872_v22  ;;  %1065 = vst [vmem:[%s2073_s6 + $0x28] sm:$0xff] %v873_v26  ;;  %v1267_v33 = vpack.c.bf16 %v889_v27, %v888_v23  ;;  %1081 = vst [vmem:[%s2073_s6 + $0xa8] sm:$0xff] %v889_v27  ;;  %v1345_v34 = vadd.f32 %v1344_v30, %v1343_v28  ;;  %v1346_v36 = vpop.f32.mrb[14].mxu0  ;;  %v1394_v37 = vpop.f32.mrb[14].mxu1  ;;  %v782_v26 = vld [vmem:[%s2072_s4 + $0x50] sm:$0xff] }
 0x110   :  { %v1393_v35 = vadd.f32 %v1392_v31, %v1391_v29  ;;  %v1347_v40 = vpop.f32.mrb[15].mxu0  ;;  %v1395_v41 = vpop.f32.mrb[15].mxu1  ;;  %v798_v27 = vld [vmem:[%s2072_s4 + $0xd0] sm:$0xff] }
 0x111   :  { %1295 = vst [vmem:[%s2074_s5 + $0x10] sm:$0xff] %v1227_v32   ;;  %1303 = vst [vmem:[%s2074_s5 + $0x50] sm:$0xff] %v1267_v33   ;;  %v842_v42 = vmul.f32 0.33333334, %v1345_v34  ;;  %v1348_v44 = vadd.f32 %v1347_v40, %v1346_v36  ;;  %v1396_v45 = vadd.f32 %v1395_v41, %v1394_v37  ;;  %v783_v34 = vld [vmem:[%s2072_s4 + $0x58] sm:$0xff] }
 0x112   :  { %v858_v43 = vmul.f32 0.33333334, %v1393_v35  ;;  %v799_v35 = vld [vmem:[%s2072_s4 + $0xd8] sm:$0xff] }
 0x113   :  { %v874_v48 = vadd.f32 %v842_v42, %v778_v38  ;;  %v843_v50 = vmul.f32 0.33333334, %v1348_v44  ;;  %v859_v51 = vmul.f32 0.33333334, %v1396_v45 }
 0x114   :  { %v890_v49 = vadd.f32 %v858_v43, %v794_v39 }
 0x115   :  { %1066 = vst [vmem:[%s2073_s6 + $0x30] sm:$0xff] %v874_v48  ;;  %v875_v52 = vadd.f32 %v843_v50, %v779_v46  ;;  %v891_v53 = vadd.f32 %v859_v51, %v795_v47  ;;  %v1349_v54 = vpop.f32.mrb[16].mxu0  ;;  %v1397_v55 = vpop.f32.mrb[16].mxu1 }
 0x116   :  { %1082 = vst [vmem:[%s2073_s6 + $0xb0] sm:$0xff] %v890_v49  ;;  %v1350_v56 = vpop.f32.mrb[17].mxu0  ;;  %v1398_v57 = vpop.f32.mrb[17].mxu1 }
 0x117   :  { %v1232_v58 = vpack.c.bf16 %v875_v52, %v874_v48  ;;  %1067 = vst [vmem:[%s2073_s6 + $0x38] sm:$0xff] %v875_v52  ;;  %v1272_v59 = vpack.c.bf16 %v891_v53, %v890_v49  ;;  %1083 = vst [vmem:[%s2073_s6 + $0xb8] sm:$0xff] %v891_v53  ;;  %v1351_v60 = vadd.f32 %v1350_v56, %v1349_v54  ;;  %v1352_v62 = vpop.f32.mrb[18].mxu0  ;;  %v1400_v63 = vpop.f32.mrb[18].mxu1  ;;  %v784_v52 = vld [vmem:[%s2072_s4 + $0x60] sm:$0xff] }
 0x118   :  { %v1399_v61 = vadd.f32 %v1398_v57, %v1397_v55  ;;  %v1353_v2 = vpop.f32.mrb[19].mxu0  ;;  %v1401_v3 = vpop.f32.mrb[19].mxu1  ;;  %v800_v53 = vld [vmem:[%s2072_s4 + $0xe0] sm:$0xff] }
 0x119   :  { %1296 = vst [vmem:[%s2074_s5 + $0x18] sm:$0xff] %v1232_v58   ;;  %1304 = vst [vmem:[%s2074_s5 + $0x58] sm:$0xff] %v1272_v59   ;;  %v844_v4 = vmul.f32 0.33333334, %v1351_v60  ;;  %v1354_v6 = vadd.f32 %v1353_v2, %v1352_v62  ;;  %v1402_v7 = vadd.f32 %v1401_v3, %v1400_v63  ;;  %v785_v60 = vld [vmem:[%s2072_s4 + $0x68] sm:$0xff] }
 0x11a   :  { %v860_v5 = vmul.f32 0.33333334, %v1399_v61  ;;  %v801_v61 = vld [vmem:[%s2072_s4 + $0xe8] sm:$0xff] }
 0x11b   :  { %v876_v10 = vadd.f32 %v844_v4, %v780_v0  ;;  %v845_v12 = vmul.f32 0.33333334, %v1354_v6  ;;  %v861_v13 = vmul.f32 0.33333334, %v1402_v7 }
 0x11c   :  { %v892_v11 = vadd.f32 %v860_v5, %v796_v1 }
 0x11d   :  { %1068 = vst [vmem:[%s2073_s6 + $0x40] sm:$0xff] %v876_v10  ;;  %v877_v14 = vadd.f32 %v845_v12, %v781_v8  ;;  %v893_v15 = vadd.f32 %v861_v13, %v797_v9  ;;  %v1355_v16 = vpop.f32.mrb[20].mxu0  ;;  %v1403_v17 = vpop.f32.mrb[20].mxu1 }
 0x11e   :  { %1084 = vst [vmem:[%s2073_s6 + $0xc0] sm:$0xff] %v892_v11  ;;  %v1356_v18 = vpop.f32.mrb[21].mxu0  ;;  %v1404_v19 = vpop.f32.mrb[21].mxu1 }
 0x11f   :  { %v1237_v20 = vpack.c.bf16 %v877_v14, %v876_v10  ;;  %1069 = vst [vmem:[%s2073_s6 + $0x48] sm:$0xff] %v877_v14  ;;  %v1277_v21 = vpack.c.bf16 %v893_v15, %v892_v11  ;;  %1085 = vst [vmem:[%s2073_s6 + $0xc8] sm:$0xff] %v893_v15  ;;  %v1357_v22 = vadd.f32 %v1356_v18, %v1355_v16  ;;  %v1358_v24 = vpop.f32.mrb[22].mxu0  ;;  %v1406_v25 = vpop.f32.mrb[22].mxu1  ;;  %v786_v14 = vld [vmem:[%s2072_s4 + $0x70] sm:$0xff] }
 0x120   :  { %v1405_v23 = vadd.f32 %v1404_v19, %v1403_v17  ;;  %v1359_v28 = vpop.f32.mrb[23].mxu0  ;;  %v1407_v29 = vpop.f32.mrb[23].mxu1  ;;  %v802_v15 = vld [vmem:[%s2072_s4 + $0xf0] sm:$0xff] }
 0x121   :  { %1297 = vst [vmem:[%s2074_s5 + $0x20] sm:$0xff] %v1237_v20   ;;  %1305 = vst [vmem:[%s2074_s5 + $0x60] sm:$0xff] %v1277_v21   ;;  %v846_v30 = vmul.f32 0.33333334, %v1357_v22  ;;  %v1360_v32 = vadd.f32 %v1359_v28, %v1358_v24  ;;  %v1408_v33 = vadd.f32 %v1407_v29, %v1406_v25  ;;  %v787_v22 = vld [vmem:[%s2072_s4 + $0x78] sm:$0xff] }
 0x122   :  { %v862_v31 = vmul.f32 0.33333334, %v1405_v23  ;;  %v803_v23 = vld [vmem:[%s2072_s4 + $0xf8] sm:$0xff] }
 0x123   :  { %v878_v36 = vadd.f32 %v846_v30, %v782_v26  ;;  %v847_v38 = vmul.f32 0.33333334, %v1360_v32  ;;  %v863_v39 = vmul.f32 0.33333334, %v1408_v33 }
 0x124   :  { %v894_v37 = vadd.f32 %v862_v31, %v798_v27 }
 0x125   :  { %1070 = vst [vmem:[%s2073_s6 + $0x50] sm:$0xff] %v878_v36  ;;  %v879_v40 = vadd.f32 %v847_v38, %v783_v34  ;;  %v895_v41 = vadd.f32 %v863_v39, %v799_v35  ;;  %v1361_v42 = vpop.f32.mrb[24].mxu0  ;;  %v1409_v43 = vpop.f32.mrb[24].mxu1 }
 0x126   :  { %1086 = vst [vmem:[%s2073_s6 + $0xd0] sm:$0xff] %v894_v37  ;;  %v1362_v44 = vpop.f32.mrb[25].mxu0  ;;  %v1410_v45 = vpop.f32.mrb[25].mxu1 }
 0x127   :  { %v1242_v46 = vpack.c.bf16 %v879_v40, %v878_v36  ;;  %1071 = vst [vmem:[%s2073_s6 + $0x58] sm:$0xff] %v879_v40  ;;  %v1282_v47 = vpack.c.bf16 %v895_v41, %v894_v37  ;;  %1087 = vst [vmem:[%s2073_s6 + $0xd8] sm:$0xff] %v895_v41  ;;  %v1363_v48 = vadd.f32 %v1362_v44, %v1361_v42  ;;  %v1364_v50 = vpop.f32.mrb[26].mxu0  ;;  %v1412_v51 = vpop.f32.mrb[26].mxu1 }
 0x128   :  { %v1411_v49 = vadd.f32 %v1410_v45, %v1409_v43  ;;  %v1365_v54 = vpop.f32.mrb[27].mxu0  ;;  %v1413_v55 = vpop.f32.mrb[27].mxu1 }
 0x129   :  { %1298 = vst [vmem:[%s2074_s5 + $0x28] sm:$0xff] %v1242_v46   ;;  %1306 = vst [vmem:[%s2074_s5 + $0x68] sm:$0xff] %v1282_v47   ;;  %v848_v56 = vmul.f32 0.33333334, %v1363_v48  ;;  %v1366_v58 = vadd.f32 %v1365_v54, %v1364_v50  ;;  %v1414_v59 = vadd.f32 %v1413_v55, %v1412_v51 }
 0x12a   :  { %v864_v57 = vmul.f32 0.33333334, %v1411_v49 }
 0x12b   :  { %v880_v62 = vadd.f32 %v848_v56, %v784_v52  ;;  %v849_v0 = vmul.f32 0.33333334, %v1366_v58  ;;  %v865_v1 = vmul.f32 0.33333334, %v1414_v59 }
 0x12c   :  { %v896_v63 = vadd.f32 %v864_v57, %v800_v53 }
 0x12d   :  { %1072 = vst [vmem:[%s2073_s6 + $0x60] sm:$0xff] %v880_v62  ;;  %v881_v2 = vadd.f32 %v849_v0, %v785_v60  ;;  %v897_v3 = vadd.f32 %v865_v1, %v801_v61  ;;  %v1367_v4 = vpop.f32.mrb[28].mxu0  ;;  %v1415_v5 = vpop.f32.mrb[28].mxu1 }
 0x12e   :  { %1088 = vst [vmem:[%s2073_s6 + $0xe0] sm:$0xff] %v896_v63  ;;  %v1368_v6 = vpop.f32.mrb[29].mxu0  ;;  %v1416_v7 = vpop.f32.mrb[29].mxu1 }
 0x12f   :  { %v1247_v8 = vpack.c.bf16 %v881_v2, %v880_v62  ;;  %1073 = vst [vmem:[%s2073_s6 + $0x68] sm:$0xff] %v881_v2  ;;  %v1287_v9 = vpack.c.bf16 %v897_v3, %v896_v63  ;;  %1089 = vst [vmem:[%s2073_s6 + $0xe8] sm:$0xff] %v897_v3  ;;  %v1369_v10 = vadd.f32 %v1368_v6, %v1367_v4  ;;  %v1370_v12 = vpop.f32.mrb[30].mxu0  ;;  %v1418_v13 = vpop.f32.mrb[30].mxu1 }
 0x130   :  { %v1417_v11 = vadd.f32 %v1416_v7, %v1415_v5  ;;  %v1371_v16 = vpop.f32.mrb[31].mxu0  ;;  %v1419_v17 = vpop.f32.mrb[31].mxu1 }
 0x131   :  { %1299 = vst [vmem:[%s2074_s5 + $0x30] sm:$0xff] %v1247_v8   ;;  %1307 = vst [vmem:[%s2074_s5 + $0x70] sm:$0xff] %v1287_v9   ;;  %v850_v18 = vmul.f32 0.33333334, %v1369_v10  ;;  %v1372_v20 = vadd.f32 %v1371_v16, %v1370_v12  ;;  %v1420_v21 = vadd.f32 %v1419_v17, %v1418_v13 }
 0x132   :  { %v866_v19 = vmul.f32 0.33333334, %v1417_v11 }
 0x133   :  { %v882_v24 = vadd.f32 %v850_v18, %v786_v14  ;;  %v851_v26 = vmul.f32 0.33333334, %v1372_v20  ;;  %v867_v27 = vmul.f32 0.33333334, %v1420_v21 }
 0x134   :  { %v898_v25 = vadd.f32 %v866_v19, %v802_v15 }
 0x135   :  { %1074 = vst [vmem:[%s2073_s6 + $0x70] sm:$0xff] %v882_v24  ;;  %v883_v28 = vadd.f32 %v851_v26, %v787_v22  ;;  %v899_v29 = vadd.f32 %v867_v27, %v803_v23 }
 0x136   :  { %1090 = vst [vmem:[%s2073_s6 + $0xf0] sm:$0xff] %v898_v25 }
 0x137   :  { %v1252_v30 = vpack.c.bf16 %v883_v28, %v882_v24  ;;  %1075 = vst [vmem:[%s2073_s6 + $0x78] sm:$0xff] %v883_v28  ;;  %v1292_v31 = vpack.c.bf16 %v899_v29, %v898_v25  ;;  %1091 = vst [vmem:[%s2073_s6 + $0xf8] sm:$0xff] %v899_v29 }
 0x139   :  { %1300 = vst [vmem:[%s2074_s5 + $0x38] sm:$0xff] %v1252_v30   ;;  %1308 = vst [vmem:[%s2074_s5 + $0x78] sm:$0xff] %v1292_v31  }

// kernel: bimultigcn_forward.10
= control target key start
LH: loop header
LB: loop body
LE: loop exit
PB: predicated region body
PF: predicated region fallthrough
CT: control target
= control target key end

     0   :  { %s1087_s0 = inlined_call_operand.vmem [shape: bf16[128,256], index: 0, kind: input, shape index: {}]   ;;  %s1088_s1 = inlined_call_operand.vmem [shape: bf16[256,128], index: 1, kind: input, shape index: {}]   ;;  %s1089_s2 = inlined_call_operand.vmem [shape: f32[128,128], index: 2, kind: input, shape index: {}, may-alias: {2,4}]   ;;  %s1090_s3 = inlined_call_operand.hbm [shape: bf16[128,128], index: 3, kind: output, shape index: {0}]   ;;  %s1091_s4 = inlined_call_operand.vmem [shape: f32[128,128], index: 4, kind: output, shape index: {1}, may-alias: {2,4}]  }
   0x1   :  { %v791_v0 = vld [vmem:[%s1088_s1 + $0x40] sm:$0xff]   ;;  %v793_v2 = vld [vmem:[%s1088_s1 + $0x48] sm:$0xff]   ;;  %v795_v4 = vld [vmem:[%s1088_s1 + $0x50] sm:$0xff]  }
   0x2   :  { %v792_v1 = vld [vmem:[%s1088_s1] sm:$0xff]   ;;  %708 = vmatprep.subr.bf16.mxu0 %v791_v0  ;;  %772 = vmatprep.subr.bf16.mxu1 %v791_v0  ;;  %v794_v3 = vld [vmem:[%s1088_s1 + $0x8] sm:$0xff]   ;;  %v796_v5 = vld [vmem:[%s1088_s1 + $0x10] sm:$0xff]  }
   0x3   :  { %709 = vmatpush3.bf16.msra.mxu0 %v792_v1  ;;  %780 = vmatpush3.bf16.msra.mxu1 %v792_v1  ;;  %v797_v6 = vld [vmem:[%s1088_s1 + $0x58] sm:$0xff]   ;;  %v799_v8 = vld [vmem:[%s1088_s1 + $0x60] sm:$0xff]   ;;  %v801_v10 = vld [vmem:[%s1088_s1 + $0x68] sm:$0xff]  }
   0x4   :  { %710 = vmatprep.subr.bf16.mxu0 %v793_v2  ;;  %773 = vmatprep.subr.bf16.mxu1 %v793_v2  ;;  %v798_v7 = vld [vmem:[%s1088_s1 + $0x18] sm:$0xff]   ;;  %v800_v9 = vld [vmem:[%s1088_s1 + $0x20] sm:$0xff]   ;;  %v802_v13 = vld [vmem:[%s1088_s1 + $0x28] sm:$0xff]  }
   0x5   :  { %v809_v11 = vld [vmem:[%s1087_s0 + $0x4] ss:$8 sps:$4 sm:$0xff]   ;;  %v803_v14 = vld [vmem:[%s1088_s1 + $0x70] sm:$0xff]   ;;  %v805_v16 = vld [vmem:[%s1088_s1 + $0x78] sm:$0xff]  }
   0x6   :  { %v812_v12 = vld [vmem:[%s1087_s0 + $0x44] ss:$8 sps:$4 sm:$0xff]   ;;  %315 = vmatprep.mubr.bf16.mxu0 %v809_v11  ;;  %v804_v15 = vld [vmem:[%s1088_s1 + $0x30] sm:$0xff]  }
   0x7   :  { %711 = vmatpush3.bf16.msra.mxu0 %v794_v3  ;;  %781 = vmatpush3.bf16.msra.mxu1 %v794_v3 }
   0x8   :  { %712 = vmatprep.subr.bf16.mxu0 %v795_v4  ;;  %774 = vmatprep.subr.bf16.mxu1 %v795_v4 }
   0x9   :  { %347 = vmatprep.mubr.bf16.mxu1 %v812_v12 }
   0xb   :  { %713 = vmatpush3.bf16.msra.mxu0 %v796_v5  ;;  %782 = vmatpush3.bf16.msra.mxu1 %v796_v5 }
   0xc   :  { %714 = vmatprep.subr.bf16.mxu0 %v797_v6  ;;  %775 = vmatprep.subr.bf16.mxu1 %v797_v6 }
   0xf   :  { %715 = vmatpush3.bf16.msra.mxu0 %v798_v7  ;;  %783 = vmatpush3.bf16.msra.mxu1 %v798_v7 }
  0x10   :  { %716 = vmatprep.subr.bf16.mxu0 %v799_v8  ;;  %776 = vmatprep.subr.bf16.mxu1 %v799_v8 }
  0x13   :  { %717 = vmatpush3.bf16.msra.mxu0 %v800_v9  ;;  %784 = vmatpush3.bf16.msra.mxu1 %v800_v9 }
  0x14   :  { %718 = vmatprep.subr.bf16.mxu0 %v801_v10  ;;  %777 = vmatprep.subr.bf16.mxu1 %v801_v10 }
  0x17   :  { %719 = vmatpush3.bf16.msra.mxu0 %v802_v13  ;;  %785 = vmatpush3.bf16.msra.mxu1 %v802_v13 }
  0x18   :  { %720 = vmatprep.subr.bf16.mxu0 %v803_v14  ;;  %778 = vmatprep.subr.bf16.mxu1 %v803_v14 }
  0x19   :  { %10 = vsyncpa [#allocation4], 0  ;;  %v806_v17 = vld [vmem:[%s1088_s1 + $0x38] sm:$0xff]   ;;  %v807_v18 = vld [vmem:[%s1087_s0] ss:$8 sps:$4 sm:$0xff]   ;;  %s855_s24 = smov [#allocation3]  }
  0x1a   :  { %v810_v19 = vld [vmem:[%s1087_s0 + $0x40] ss:$8 sps:$4 sm:$0xff]   ;;  %v813_v20 = vld [vmem:[%s1087_s0 + $0x14] ss:$8 sps:$4 sm:$0xff]   ;;  %v817_v22 = vld [vmem:[%s1087_s0 + $0x10] ss:$8 sps:$4 sm:$0xff]  }
  0x1b   :  { %721 = vmatpush3.bf16.msra.mxu0 %v804_v15  ;;  %786 = vmatpush3.bf16.msra.mxu1 %v804_v15  ;;  %v815_v21 = vld [vmem:[%s1087_s0 + $0x54] ss:$8 sps:$4 sm:$0xff]   ;;  %v818_v23 = vld [vmem:[%s1087_s0 + $0x50] ss:$8 sps:$4 sm:$0xff]   ;;  %v819_v24 = vld [vmem:[%s1087_s0 + $0x24] ss:$8 sps:$4 sm:$0xff]  }
  0x1c   :  { %722 = vmatprep.subr.bf16.mxu0 %v805_v16  ;;  %779 = vmatprep.subr.bf16.mxu1 %v805_v16  ;;  %v821_v25 = vld [vmem:[%s1087_s0 + $0x64] ss:$8 sps:$4 sm:$0xff]   ;;  %v823_v26 = vld [vmem:[%s1087_s0 + $0x20] ss:$8 sps:$4 sm:$0xff]   ;;  %v825_v28 = vld [vmem:[%s1087_s0 + $0x34] ss:$8 sps:$4 sm:$0xff]  }
  0x1d   :  { %v824_v27 = vld [vmem:[%s1087_s0 + $0x60] ss:$8 sps:$4 sm:$0xff]   ;;  %v827_v29 = vld [vmem:[%s1087_s0 + $0x74] ss:$8 sps:$4 sm:$0xff]   ;;  %v829_v30 = vld [vmem:[%s1087_s0 + $0x30] ss:$8 sps:$4 sm:$0xff]  }
  0x1e   :  { %v830_v31 = vld [vmem:[%s1087_s0 + $0x70] ss:$8 sps:$4 sm:$0xff]   ;;  %v511_v35 = vld [vmem:[%s1089_s2] sm:$0xff]  ;;  %v512_v43 = vld [vmem:[%s1089_s2 + $0x8] sm:$0xff]  ;;  %s580_s25 = sshll.u32 %s855_s24, 4  ;;  %s581_s25 = int_to_ptr.vmem [resolvable:$true] %s580_s25 }
  0x1f   :  { %723 = vmatpush3.bf16.msra.mxu0 %v806_v17  ;;  %787 = vmatpush3.bf16.msra.mxu1 %v806_v17  ;;  %v519_v37 = vld [vmem:[%s1089_s2 + $0x40] sm:$0xff]  ;;  %v520_v49 = vld [vmem:[%s1089_s2 + $0x48] sm:$0xff]  ;;  %s831_s6 = scalar_lea.vmem %s581_s25, 1024  ;;  %p836_p1 = scmp.lt.s32.totalorder %s581_s25, %s581_s25 }
  0x20   :  { %p832_p0 = scmp.ne.s32.totalorder %s581_s25, %s831_s6  ;;  %p837_p2 = scmp.lt.s32.totalorder %s831_s6, %s831_s6 }
  0x22   :  { %316 = vmatmul.mubr.bf16.vlgmr.msra.gmra.mrb[0].mxu0 %v807_v18  ;;  %348 = vmatmul.mubr.bf16.vlgmr.msra.gmra.mrb[0].mxu1 %v810_v19  ;;  %p838_p3 = por %p837_p2, %p836_p1 }
  0x23   :  { %323 = vmatprep.mubr.bf16.mxu0 %v813_v20  ;;  %355 = vmatprep.mubr.bf16.mxu1 %v815_v21 }
  0x24   :  { %p839_p4 = pnand %p838_p3, %p832_p0 }
  0x2a   :  { %324 = vmatmul.mubr.bf16.gmra.mrb[4].mxu0 %v817_v22  ;;  %356 = vmatmul.mubr.bf16.gmra.mrb[4].mxu1 %v818_v23 }
  0x2b   :  { %331 = vmatprep.mubr.bf16.mxu0 %v819_v24  ;;  %363 = vmatprep.mubr.bf16.mxu1 %v821_v25 }
  0x32   :  { %332 = vmatmul.mubr.bf16.gmra.mrb[8].mxu0 %v823_v26  ;;  %364 = vmatmul.mubr.bf16.gmra.mrb[8].mxu1 %v824_v27 }
  0x33   :  { %339 = vmatprep.mubr.bf16.mxu0 %v825_v28  ;;  %371 = vmatprep.mubr.bf16.mxu1 %v827_v29 }
  0x3a   :  { %340 = vmatmul.mubr.bf16.gmra.mrb[12].mxu0 %v829_v30  ;;  %372 = vmatmul.mubr.bf16.gmra.mrb[12].mxu1 %v830_v31 }
  0xf5   :  { %v724_v32 = vpop.f32.mrb[0].mxu0  ;;  %v748_v33 = vpop.f32.mrb[0].mxu1 }
  0xf6   :  { %v725_v34 = vpop.f32.mrb[1].mxu0  ;;  %v749_v36 = vpop.f32.mrb[1].mxu1 }
  0xf7   :  { %v726_v38 = vadd.f32 %v725_v34, %v724_v32  ;;  %v750_v39 = vadd.f32 %v749_v36, %v748_v33  ;;  %v727_v40 = vpop.f32.mrb[2].mxu0  ;;  %v751_v41 = vpop.f32.mrb[2].mxu1 }
  0xf8   :  { %v728_v42 = vpop.f32.mrb[3].mxu0  ;;  %v752_v44 = vpop.f32.mrb[3].mxu1 }
  0xf9   :  { %v527_v45 = vadd.f32 %v726_v38, %v511_v35  ;;  %v535_v46 = vadd.f32 %v750_v39, %v519_v37  ;;  %v729_v47 = vadd.f32 %v728_v42, %v727_v40  ;;  %v753_v48 = vadd.f32 %v752_v44, %v751_v41 }
  0xfb   :  { %v543_v50 = vmul.f32 0.33333334, %v527_v45  ;;  %v551_v51 = vmul.f32 0.33333334, %v535_v46  ;;  %v664_v52 = vpack.c.bf16 %v729_v47, %v726_v38  ;;  %v528_v53 = vadd.f32 %v729_v47, %v512_v43 }
  0xfc   :  { %v684_v54 = vpack.c.bf16 %v753_v48, %v750_v39  ;;  %v536_v55 = vadd.f32 %v753_v48, %v520_v49 }
  0xfd   :  { %559 = vst [vmem:[%s1091_s4] sm:$0xff] %v543_v50  ;;  %567 = vst [vmem:[%s1091_s4 + $0x40] sm:$0xff] %v551_v51  ;;  %v544_v56 = vmul.f32 0.33333334, %v528_v53  ;;  %v730_v57 = vpop.f32.mrb[4].mxu0  ;;  %v754_v58 = vpop.f32.mrb[4].mxu1 }
  0xfe   :  { %665 = vst [vmem:[#allocation3] sm:$0xff] %v664_v52   ;;  %704 = vst [vmem:[#allocation3 + $0x20] sm:$0xff] %v684_v54   ;;  %v552_v59 = vmul.f32 0.33333334, %v536_v55  ;;  %v731_v60 = vpop.f32.mrb[5].mxu0  ;;  %v755_v62 = vpop.f32.mrb[5].mxu1 }
  0xff   :  { %v732_v0 = vadd.f32 %v731_v60, %v730_v57  ;;  %v756_v1 = vadd.f32 %v755_v62, %v754_v58  ;;  %v733_v2 = vpop.f32.mrb[6].mxu0  ;;  %v757_v3 = vpop.f32.mrb[6].mxu1 }
 0x100   :  { %v734_v4 = vpop.f32.mrb[7].mxu0  ;;  %v758_v6 = vpop.f32.mrb[7].mxu1 }
 0x101   :  { %v735_v9 = vadd.f32 %v734_v4, %v733_v2  ;;  %v759_v10 = vadd.f32 %v758_v6, %v757_v3 }
 0x103   :  { %v669_v14 = vpack.c.bf16 %v735_v9, %v732_v0  ;;  %v689_v16 = vpack.c.bf16 %v759_v10, %v756_v1 }
 0x104   :  { %v513_v61 = vld [vmem:[%s1089_s2 + $0x10] sm:$0xff] }
 0x105   :  { %v521_v63 = vld [vmem:[%s1089_s2 + $0x50] sm:$0xff]  ;;  %v529_v7 = vadd.f32 %v732_v0, %v513_v61  ;;  %701 = vst [vmem:[#allocation3 + $0x8] sm:$0xff] %v669_v14   ;;  %v736_v19 = vpop.f32.mrb[8].mxu0  ;;  %v760_v20 = vpop.f32.mrb[8].mxu1  ;;  %705 = vst [vmem:[#allocation3 + $0x28] sm:$0xff] %v689_v16  }
 0x106   :  { %560 = vst [vmem:[%s1091_s4 + $0x8] sm:$0xff] %v544_v56  ;;  %568 = vst [vmem:[%s1091_s4 + $0x48] sm:$0xff] %v552_v59  ;;  %v537_v8 = vadd.f32 %v756_v1, %v521_v63  ;;  %v737_v22 = vpop.f32.mrb[9].mxu0  ;;  %v761_v24 = vpop.f32.mrb[9].mxu1 }
 0x107   :  { %v545_v12 = vmul.f32 0.33333334, %v529_v7  ;;  %v738_v26 = vadd.f32 %v737_v22, %v736_v19  ;;  %v762_v27 = vadd.f32 %v761_v24, %v760_v20  ;;  %v739_v28 = vpop.f32.mrb[10].mxu0  ;;  %v763_v29 = vpop.f32.mrb[10].mxu1 }
 0x108   :  { %v553_v13 = vmul.f32 0.33333334, %v537_v8  ;;  %v740_v30 = vpop.f32.mrb[11].mxu0  ;;  %v764_v32 = vpop.f32.mrb[11].mxu1 }
 0x109   :  { %v741_v35 = vadd.f32 %v740_v30, %v739_v28  ;;  %v765_v36 = vadd.f32 %v764_v32, %v763_v29 }
 0x10b   :  { %v674_v40 = vpack.c.bf16 %v741_v35, %v738_v26  ;;  %v694_v42 = vpack.c.bf16 %v765_v36, %v762_v27 }
 0x10d   :  { %v514_v5 = vld [vmem:[%s1089_s2 + $0x18] sm:$0xff]  ;;  %702 = vst [vmem:[#allocation3 + $0x10] sm:$0xff] %v674_v40   ;;  %v742_v45 = vpop.f32.mrb[12].mxu0  ;;  %v766_v46 = vpop.f32.mrb[12].mxu1  ;;  %706 = vst [vmem:[#allocation3 + $0x30] sm:$0xff] %v694_v42  }
 0x10e   :  { %v522_v11 = vld [vmem:[%s1089_s2 + $0x58] sm:$0xff]  ;;  %v530_v15 = vadd.f32 %v735_v9, %v514_v5  ;;  %v743_v48 = vpop.f32.mrb[13].mxu0  ;;  %v767_v50 = vpop.f32.mrb[13].mxu1 }
 0x10f   :  { %v538_v17 = vadd.f32 %v759_v10, %v522_v11  ;;  %561 = vst [vmem:[%s1091_s4 + $0x10] sm:$0xff] %v545_v12  ;;  %569 = vst [vmem:[%s1091_s4 + $0x50] sm:$0xff] %v553_v13  ;;  %v744_v52 = vadd.f32 %v743_v48, %v742_v45  ;;  %v768_v53 = vadd.f32 %v767_v50, %v766_v46  ;;  %v745_v54 = vpop.f32.mrb[14].mxu0  ;;  %v769_v55 = vpop.f32.mrb[14].mxu1 }
 0x110   :  { %v546_v18 = vmul.f32 0.33333334, %v530_v15  ;;  %v746_v56 = vpop.f32.mrb[15].mxu0  ;;  %v770_v58 = vpop.f32.mrb[15].mxu1 }
 0x111   :  { %v554_v21 = vmul.f32 0.33333334, %v538_v17  ;;  %v747_v61 = vadd.f32 %v746_v56, %v745_v54  ;;  %v771_v62 = vadd.f32 %v770_v58, %v769_v55 }
 0x113   :  { %v679_v2 = vpack.c.bf16 %v747_v61, %v744_v52  ;;  %v699_v4 = vpack.c.bf16 %v771_v62, %v768_v53 }
 0x115   :  { %703 = vst [vmem:[#allocation3 + $0x18] sm:$0xff] %v679_v2   ;;  %707 = vst [vmem:[#allocation3 + $0x38] sm:$0xff] %v699_v4  }
 0x116   :  { %v515_v23 = vld [vmem:[%s1089_s2 + $0x20] sm:$0xff] }
 0x117   :  { %v523_v25 = vld [vmem:[%s1089_s2 + $0x60] sm:$0xff]  ;;  %v531_v33 = vadd.f32 %v738_v26, %v515_v23 }
 0x118   :  { %562 = vst [vmem:[%s1091_s4 + $0x18] sm:$0xff] %v546_v18  ;;  %570 = vst [vmem:[%s1091_s4 + $0x58] sm:$0xff] %v554_v21  ;;  %v539_v34 = vadd.f32 %v762_v27, %v523_v25 }
 0x119   :  { %v547_v38 = vmul.f32 0.33333334, %v531_v33 }
 0x11a   :  { %v555_v39 = vmul.f32 0.33333334, %v539_v34 }
 0x11f   :  { %v516_v31 = vld [vmem:[%s1089_s2 + $0x28] sm:$0xff] }
 0x120   :  { %v524_v37 = vld [vmem:[%s1089_s2 + $0x68] sm:$0xff]  ;;  %v532_v41 = vadd.f32 %v741_v35, %v516_v31 }
 0x121   :  { %v540_v43 = vadd.f32 %v765_v36, %v524_v37  ;;  %563 = vst [vmem:[%s1091_s4 + $0x20] sm:$0xff] %v547_v38  ;;  %571 = vst [vmem:[%s1091_s4 + $0x60] sm:$0xff] %v555_v39 }
 0x122   :  { %v548_v44 = vmul.f32 0.33333334, %v532_v41 }
 0x123   :  { %v556_v47 = vmul.f32 0.33333334, %v540_v43 }
 0x128   :  { %v517_v49 = vld [vmem:[%s1089_s2 + $0x30] sm:$0xff] }
 0x129   :  { %v525_v51 = vld [vmem:[%s1089_s2 + $0x70] sm:$0xff]  ;;  %v533_v59 = vadd.f32 %v744_v52, %v517_v49 }
 0x12a   :  { %564 = vst [vmem:[%s1091_s4 + $0x28] sm:$0xff] %v548_v44  ;;  %572 = vst [vmem:[%s1091_s4 + $0x68] sm:$0xff] %v556_v47  ;;  %v541_v60 = vadd.f32 %v768_v53, %v525_v51 }
 0x12b   :  { %v549_v0 = vmul.f32 0.33333334, %v533_v59 }
 0x12c   :  { %v557_v1 = vmul.f32 0.33333334, %v541_v60 }
 0x131   :  { %v518_v57 = vld [vmem:[%s1089_s2 + $0x38] sm:$0xff] }
 0x132   :  { %v526_v63 = vld [vmem:[%s1089_s2 + $0x78] sm:$0xff]  ;;  %v534_v3 = vadd.f32 %v747_v61, %v518_v57 }
 0x133   :  { %v542_v5 = vadd.f32 %v771_v62, %v526_v63  ;;  %565 = vst [vmem:[%s1091_s4 + $0x30] sm:$0xff] %v549_v0  ;;  %573 = vst [vmem:[%s1091_s4 + $0x70] sm:$0xff] %v557_v1 }
 0x134   :  { %v550_v6 = vmul.f32 0.33333334, %v534_v3 }
 0x135   :  { %v558_v7 = vmul.f32 0.33333334, %v542_v5 }
 0x136   :  { %566 = vst [vmem:[%s1091_s4 + $0x38] sm:$0xff] %v550_v6 }
 0x137   :  { %842 = shalt.err (!%p839_p4)
}
 0x138   :  { %s843_s8 = scalar_lea.hbm %s1090_s3, 1024 }
 0x139   :  { %p844_p5 = scmp.ne.s32.totalorder %s1090_s3, %s843_s8  ;;  %p847_p6 = scmp.lt.u32.totalorder %s843_s8, %s1090_s3 }
 0x13b   :  { %p849_p7 = pnand %p847_p6, %p844_p5 }
 0x13d   :  { %852 = shalt.err (!%p849_p7)
}
 0x13e   :  { %s856_s13 = smov 64   ;;  %s857_s14 = smov 4   ;;  %574 = vst [vmem:[%s1091_s4 + $0x78] sm:$0xff] %v558_v7 }
 0x13f   :  { %586 = dma.vmem_to_hbm [thread:$0]  %s581_s25, 1024, %s1090_s3, [#allocation4], %s856_s13, %s856_s13, %s857_s14  }
 0x140   :  { %853 = dma.done.wait [#allocation4], 1024  }
 0x141   :  { %854 = vsyncadd [#allocation4], 4294966272 }
 0x142   :  { %594 = vsyncpa [#allocation4], 1 }

// kernel: bimultigcn_forward.11
= control target key start
LH: loop header
LB: loop body
LE: loop exit
PB: predicated region body
PF: predicated region fallthrough
CT: control target
= control target key end

     0   :  { %s1494_s0 = inlined_call_operand.vmem [shape: bf16[128,256], index: 0, kind: input, shape index: {}]   ;;  %s1495_s1 = inlined_call_operand.vmem [shape: bf16[128,128], index: 1, kind: input, shape index: {}]   ;;  %s1496_s2 = inlined_call_operand.vmem [shape: f32[256,128], index: 2, kind: input, shape index: {}, may-alias: {2,4}]   ;;  %s1497_s3 = inlined_call_operand.hbm [shape: bf16[256,128], index: 3, kind: output, shape index: {0}]   ;;  %s1498_s4 = inlined_call_operand.vmem [shape: f32[256,128], index: 4, kind: output, shape index: {1}, may-alias: {2,4}]  }
   0x1   :  { %v1127_v0 = vld [vmem:[%s1494_s0 + $0x4] ss:$8 sps:$4 sm:$0xff]   ;;  %v1129_v1 = vld [vmem:[%s1494_s0] ss:$8 sps:$4 sm:$0xff]   ;;  %v1130_v2 = vld [vmem:[%s1494_s0 + $0x14] ss:$8 sps:$4 sm:$0xff]  }
   0x2   :  { %219 = vxpose.xlu1.c.b16.start [1/8] %v1127_v0, 128  ;;  %203 = vxpose.xlu0.c.b16.start [1/8] %v1129_v1, 128  ;;  %v1132_v3 = vld [vmem:[%s1494_s0 + $0x10] ss:$8 sps:$4 sm:$0xff]   ;;  %v1133_v4 = vld [vmem:[%s1494_s0 + $0x24] ss:$8 sps:$4 sm:$0xff]   ;;  %v1135_v5 = vld [vmem:[%s1494_s0 + $0x20] ss:$8 sps:$4 sm:$0xff]  }
   0x3   :  { %v1136_v6 = vld [vmem:[%s1494_s0 + $0x34] ss:$8 sps:$4 sm:$0xff]   ;;  %v1138_v7 = vld [vmem:[%s1494_s0 + $0x30] ss:$8 sps:$4 sm:$0xff]   ;;  %v1151_v8 = vld [vmem:[%s1495_s1] sm:$0xff]  }
   0x4   :  { %v1152_v9 = vld [vmem:[%s1495_s1 + $0x8] sm:$0xff]   ;;  %1060 = vmatprep.subr.bf16.mxu0 %v1151_v8  ;;  %1108 = vmatprep.subr.bf16.mxu1 %v1151_v8  ;;  %v1153_v12 = vld [vmem:[%s1495_s1 + $0x10] sm:$0xff]  }
   0x5   :  { %v1139_v10 = vld [vmem:[%s1494_s0 + $0x44] ss:$8 sps:$4 sm:$0xff]   ;;  %1061 = vmatpush3.bf16.msra.mxu0 %v1151_v8  ;;  %v1141_v11 = vld [vmem:[%s1494_s0 + $0x40] ss:$8 sps:$4 sm:$0xff]   ;;  %1116 = vmatpush3.bf16.msra.mxu1 %v1151_v8  ;;  %v1142_v13 = vld [vmem:[%s1494_s0 + $0x54] ss:$8 sps:$4 sm:$0xff]  }
   0x6   :  { %220 = vxpose.xlu1.c.b16.cont [2/8] %v1130_v2, 128  ;;  %204 = vxpose.xlu0.c.b16.cont [2/8] %v1132_v3, 128 }
   0x7   :  { %1062 = vmatprep.subr.bf16.mxu0 %v1152_v9  ;;  %1109 = vmatprep.subr.bf16.mxu1 %v1152_v9 }
   0x9   :  { %1063 = vmatpush3.bf16.msra.mxu0 %v1152_v9 }
   0xa   :  { %221 = vxpose.xlu1.c.b16.cont [3/8] %v1133_v4, 128  ;;  %205 = vxpose.xlu0.c.b16.cont [3/8] %v1135_v5, 128 }
   0xe   :  { %222 = vxpose.xlu1.c.b16.cont [4/8] %v1136_v6, 128  ;;  %206 = vxpose.xlu0.c.b16.cont [4/8] %v1138_v7, 128 }
  0x12   :  { %223 = vxpose.xlu1.c.b16.cont [5/8] %v1139_v10, 128 }
  0x13   :  { %10 = vsyncpa [#allocation4], 0  ;;  %207 = vxpose.xlu0.c.b16.cont [5/8] %v1141_v11, 128  ;;  %v1144_v14 = vld [vmem:[%s1494_s0 + $0x50] ss:$8 sps:$4 sm:$0xff]   ;;  %1117 = vmatpush3.bf16.msra.mxu1 %v1152_v9  ;;  %v1145_v16 = vld [vmem:[%s1494_s0 + $0x64] ss:$8 sps:$4 sm:$0xff]  }
  0x14   :  { %1064 = vmatprep.subr.bf16.mxu0 %v1153_v12  ;;  %1110 = vmatprep.subr.bf16.mxu1 %v1153_v12  ;;  %v1154_v15 = vld [vmem:[%s1495_s1 + $0x18] sm:$0xff]   ;;  %v1147_v17 = vld [vmem:[%s1494_s0 + $0x60] ss:$8 sps:$4 sm:$0xff]   ;;  %v1157_v22 = vld [vmem:[%s1495_s1 + $0x30] sm:$0xff]  }
  0x15   :  { %1065 = vmatpush3.bf16.msra.mxu0 %v1153_v12  ;;  %v1155_v18 = vld [vmem:[%s1495_s1 + $0x20] sm:$0xff]   ;;  %v1148_v19 = vld [vmem:[%s1494_s0 + $0x74] ss:$8 sps:$4 sm:$0xff]   ;;  %v1150_v20 = vld [vmem:[%s1494_s0 + $0x70] ss:$8 sps:$4 sm:$0xff]   ;;  %s1183_s0 = smov [#allocation3]  }
  0x16   :  { %224 = vxpose.xlu1.c.b16.cont [6/8] %v1142_v13, 128  ;;  %1066 = vmatprep.subr.bf16.mxu0 %v1154_v15  ;;  %v1156_v21 = vld [vmem:[%s1495_s1 + $0x28] sm:$0xff]   ;;  %v1158_v23 = vld [vmem:[%s1495_s1 + $0x38] sm:$0xff]   ;;  %v721_v40 = vld [vmem:[%s1496_s2 + $0x90] sm:$0xff]  ;;  %s836_s9 = sshll.u32 %s1183_s0, 4  ;;  %s1454_s9 = int_to_ptr.vmem [resolvable:$true] %s836_s9 }
  0x17   :  { %208 = vxpose.xlu0.c.b16.cont [6/8] %v1144_v14, 128  ;;  %1118 = vmatpush3.bf16.msra.mxu1 %v1153_v12  ;;  %v705_v41 = vld [vmem:[%s1496_s2 + $0x10] sm:$0xff]  ;;  %v719_v42 = vld [vmem:[%s1496_s2 + $0x80] sm:$0xff]  ;;  %v722_v45 = vld [vmem:[%s1496_s2 + $0x98] sm:$0xff]  ;;  %s1159_s24 = scalar_lea.vmem %s1454_s9, 2048  ;;  %p1164_p1 = scmp.lt.s32.totalorder %s1454_s9, %s1454_s9 }
  0x18   :  { %1111 = vmatprep.subr.bf16.mxu1 %v1154_v15  ;;  %v703_v44 = vld [vmem:[%s1496_s2] sm:$0xff]  ;;  %v706_v49 = vld [vmem:[%s1496_s2 + $0x18] sm:$0xff]  ;;  %v704_v54 = vld [vmem:[%s1496_s2 + $0x8] sm:$0xff]  ;;  %p1160_p0 = scmp.ne.s32.totalorder %s1454_s9, %s1159_s24  ;;  %p1165_p2 = scmp.lt.s32.totalorder %s1159_s24, %s1159_s24 }
  0x19   :  { %1067 = vmatpush3.bf16.msra.mxu0 %v1154_v15  ;;  %v720_v61 = vld [vmem:[%s1496_s2 + $0x88] sm:$0xff] }
  0x1a   :  { %225 = vxpose.xlu1.c.b16.cont [7/8] %v1145_v16, 128  ;;  %1068 = vmatprep.subr.bf16.mxu0 %v1155_v18  ;;  %p1166_p3 = por %p1165_p2, %p1164_p1 }
  0x1b   :  { %209 = vxpose.xlu0.c.b16.cont [7/8] %v1147_v17, 128  ;;  %1119 = vmatpush3.bf16.msra.mxu1 %v1154_v15 }
  0x1c   :  { %1112 = vmatprep.subr.bf16.mxu1 %v1155_v18  ;;  %p1167_p4 = pnand %p1166_p3, %p1160_p0 }
  0x1d   :  { %1069 = vmatpush3.bf16.msra.mxu0 %v1155_v18 }
  0x1e   :  { %226 = vxpose.xlu1.c.b16.end [8/8] %v1148_v19, 128  ;;  %1070 = vmatprep.subr.bf16.mxu0 %v1156_v21 }
  0x1f   :  { %210 = vxpose.xlu0.c.b16.end [8/8] %v1150_v20, 128  ;;  %1120 = vmatpush3.bf16.msra.mxu1 %v1155_v18 }
  0x20   :  { %1113 = vmatprep.subr.bf16.mxu1 %v1156_v21 }
  0x21   :  { %1071 = vmatpush3.bf16.msra.mxu0 %v1156_v21 }
  0x22   :  { %1072 = vmatprep.subr.bf16.mxu0 %v1157_v22 }
  0x23   :  { %1121 = vmatpush3.bf16.msra.mxu1 %v1156_v21 }
  0x24   :  { %1114 = vmatprep.subr.bf16.mxu1 %v1157_v22 }
  0x25   :  { %1073 = vmatpush3.bf16.msra.mxu0 %v1157_v22 }
  0x26   :  { %1074 = vmatprep.subr.bf16.mxu0 %v1158_v23 }
  0x27   :  { %1122 = vmatpush3.bf16.msra.mxu1 %v1157_v22 }
  0x28   :  { %1115 = vmatprep.subr.bf16.mxu1 %v1158_v23 }
  0x29   :  { %1075 = vmatpush3.bf16.msra.mxu0 %v1158_v23 }
  0x2b   :  { %1123 = vmatpush3.bf16.msra.mxu1 %v1158_v23 }
  0x68   :  { %v227_v24 = vpop.trf.xlu1 }
  0x69   :  { %v211_v25 = vpop.trf.xlu0  ;;  %1092 = vmatprep.mubr.bf16.mxu1 %v227_v24 }
  0x6a   :  { %1076 = vmatprep.mubr.bf16.mxu0 %v211_v25 }
  0x6c   :  { %v228_v26 = vpop.trf.xlu1 }
  0x6d   :  { %v212_v27 = vpop.trf.xlu0  ;;  %1093 = vmatmul.mubr.bf16.vlgmr.msra.gmra.mrb[0].mxu1 %v228_v26 }
  0x6e   :  { %1077 = vmatmul.mubr.bf16.vlgmr.msra.gmra.mrb[0].mxu0 %v212_v27 }
  0x70   :  { %v229_v28 = vpop.trf.xlu1 }
  0x71   :  { %v213_v29 = vpop.trf.xlu0  ;;  %1096 = vmatprep.mubr.bf16.mxu1 %v229_v28 }
  0x72   :  { %1080 = vmatprep.mubr.bf16.mxu0 %v213_v29 }
  0x74   :  { %v230_v30 = vpop.trf.xlu1 }
  0x75   :  { %v214_v31 = vpop.trf.xlu0  ;;  %1097 = vmatmul.mubr.bf16.gmra.mrb[4].mxu1 %v230_v30 }
  0x76   :  { %1081 = vmatmul.mubr.bf16.gmra.mrb[4].mxu0 %v214_v31 }
  0x78   :  { %v231_v32 = vpop.trf.xlu1 }
  0x79   :  { %v215_v33 = vpop.trf.xlu0  ;;  %1100 = vmatprep.mubr.bf16.mxu1 %v231_v32 }
  0x7a   :  { %1084 = vmatprep.mubr.bf16.mxu0 %v215_v33 }
  0x7c   :  { %v232_v34 = vpop.trf.xlu1 }
  0x7d   :  { %v216_v35 = vpop.trf.xlu0  ;;  %1101 = vmatmul.mubr.bf16.gmra.mrb[8].mxu1 %v232_v34 }
  0x7e   :  { %1085 = vmatmul.mubr.bf16.gmra.mrb[8].mxu0 %v216_v35 }
  0x80   :  { %v233_v36 = vpop.trf.xlu1 }
  0x81   :  { %v217_v37 = vpop.trf.xlu0  ;;  %1104 = vmatprep.mubr.bf16.mxu1 %v233_v36 }
  0x82   :  { %1088 = vmatprep.mubr.bf16.mxu0 %v217_v37 }
  0x84   :  { %v234_v38 = vpop.trf.xlu1 }
  0x85   :  { %v218_v39 = vpop.trf.xlu0  ;;  %1105 = vmatmul.mubr.bf16.gmra.mrb[12].mxu1 %v234_v38 }
  0x86   :  { %1089 = vmatmul.mubr.bf16.gmra.mrb[12].mxu0 %v218_v39 }
 0x140   :  { %v1094_v43 = vpop.f32.mrb[0].mxu1 }
 0x141   :  { %v1078_v46 = vpop.f32.mrb[0].mxu0  ;;  %v753_v47 = vadd.f32 %v1094_v43, %v721_v40  ;;  %v381_v48 = vpop.f32.mrb[1].mxu1 }
 0x142   :  { %v737_v50 = vadd.f32 %v1078_v46, %v705_v41  ;;  %v317_v51 = vpop.f32.mrb[1].mxu0  ;;  %v751_v52 = vadd.f32 %v719_v42, %v381_v48  ;;  %v1095_v53 = vpop.f32.mrb[2].mxu1 }
 0x143   :  { %v785_v55 = vmul.f32 0.33333334, %v753_v47  ;;  %v735_v56 = vadd.f32 %v703_v44, %v317_v51  ;;  %v1079_v57 = vpop.f32.mrb[2].mxu0  ;;  %v989_v58 = vpack.c.bf16 %v1095_v53, %v1094_v43  ;;  %v754_v59 = vadd.f32 %v1095_v53, %v722_v45  ;;  %v384_v60 = vpop.f32.mrb[3].mxu1 }
 0x144   :  { %v769_v62 = vmul.f32 0.33333334, %v737_v50  ;;  %v783_v63 = vmul.f32 0.33333334, %v751_v52  ;;  %v949_v0 = vpack.c.bf16 %v1079_v57, %v1078_v46  ;;  %v738_v1 = vadd.f32 %v1079_v57, %v706_v49  ;;  %v320_v2 = vpop.f32.mrb[3].mxu0 }
 0x145   :  { %817 = vst [vmem:[%s1498_s4 + $0x90] sm:$0xff] %v785_v55  ;;  %v767_v3 = vmul.f32 0.33333334, %v735_v56  ;;  %1029 = vst [vmem:[#allocation3 + $0x48] sm:$0xff] %v989_v58   ;;  %v786_v4 = vmul.f32 0.33333334, %v754_v59  ;;  %v944_v5 = vpack.c.bf16 %v320_v2, %v317_v51  ;;  %v736_v6 = vadd.f32 %v704_v54, %v320_v2 }
 0x146   :  { %801 = vst [vmem:[%s1498_s4 + $0x10] sm:$0xff] %v769_v62  ;;  %815 = vst [vmem:[%s1498_s4 + $0x80] sm:$0xff] %v783_v63  ;;  %v770_v7 = vmul.f32 0.33333334, %v738_v1  ;;  %v984_v8 = vpack.c.bf16 %v384_v60, %v381_v48  ;;  %v752_v9 = vadd.f32 %v720_v61, %v384_v60 }
 0x147   :  { %1021 = vst [vmem:[#allocation3 + $0x8] sm:$0xff] %v949_v0   ;;  %945 = vst [vmem:[#allocation3] sm:$0xff] %v944_v5   ;;  %v768_v11 = vmul.f32 0.33333334, %v736_v6 }
 0x148   :  { %1028 = vst [vmem:[#allocation3 + $0x40] sm:$0xff] %v984_v8   ;;  %v784_v14 = vmul.f32 0.33333334, %v752_v9  ;;  %v1098_v15 = vpop.f32.mrb[4].mxu1 }
 0x149   :  { %v1082_v18 = vpop.f32.mrb[4].mxu0  ;;  %v397_v20 = vpop.f32.mrb[5].mxu1 }
 0x14a   :  { %v333_v23 = vpop.f32.mrb[5].mxu0  ;;  %v1099_v25 = vpop.f32.mrb[6].mxu1 }
 0x14b   :  { %v1083_v29 = vpop.f32.mrb[6].mxu0  ;;  %v999_v30 = vpack.c.bf16 %v1099_v25, %v1098_v15  ;;  %v400_v32 = vpop.f32.mrb[7].mxu1 }
 0x14c   :  { %v959_v36 = vpack.c.bf16 %v1083_v29, %v1082_v18  ;;  %v336_v38 = vpop.f32.mrb[7].mxu0  ;;  %v994_v44 = vpack.c.bf16 %v400_v32, %v397_v20 }
 0x14d   :  { %v725_v10 = vld [vmem:[%s1496_s2 + $0xb0] sm:$0xff]  ;;  %1031 = vst [vmem:[#allocation3 + $0x58] sm:$0xff] %v999_v30   ;;  %v954_v41 = vpack.c.bf16 %v336_v38, %v333_v23 }
 0x14e   :  { %799 = vst [vmem:[%s1498_s4] sm:$0xff] %v767_v3  ;;  %818 = vst [vmem:[%s1498_s4 + $0x98] sm:$0xff] %v786_v4  ;;  %v757_v19 = vadd.f32 %v1098_v15, %v725_v10 }
 0x14f   :  { %1023 = vst [vmem:[#allocation3 + $0x18] sm:$0xff] %v959_v36   ;;  %1022 = vst [vmem:[#allocation3 + $0x10] sm:$0xff] %v954_v41  }
 0x150   :  { %v789_v27 = vmul.f32 0.33333334, %v757_v19  ;;  %1030 = vst [vmem:[#allocation3 + $0x50] sm:$0xff] %v994_v44   ;;  %v1102_v51 = vpop.f32.mrb[8].mxu1 }
 0x151   :  { %v1086_v54 = vpop.f32.mrb[8].mxu0  ;;  %v413_v56 = vpop.f32.mrb[9].mxu1 }
 0x152   :  { %v349_v59 = vpop.f32.mrb[9].mxu0  ;;  %v1103_v61 = vpop.f32.mrb[10].mxu1 }
 0x153   :  { %v1087_v1 = vpop.f32.mrb[10].mxu0  ;;  %v1009_v2 = vpack.c.bf16 %v1103_v61, %v1102_v51  ;;  %v416_v4 = vpop.f32.mrb[11].mxu1 }
 0x154   :  { %v969_v8 = vpack.c.bf16 %v1087_v1, %v1086_v54  ;;  %v352_v10 = vpop.f32.mrb[11].mxu0 }
 0x155   :  { %v709_v12 = vld [vmem:[%s1496_s2 + $0x30] sm:$0xff]  ;;  %v723_v13 = vld [vmem:[%s1496_s2 + $0xa0] sm:$0xff]  ;;  %1033 = vst [vmem:[#allocation3 + $0x68] sm:$0xff] %v1009_v2  }
 0x156   :  { %802 = vst [vmem:[%s1498_s4 + $0x18] sm:$0xff] %v770_v7  ;;  %v741_v22 = vadd.f32 %v1082_v18, %v709_v12  ;;  %v755_v24 = vadd.f32 %v723_v13, %v397_v20  ;;  %v964_v13 = vpack.c.bf16 %v352_v10, %v349_v59  ;;  %1025 = vst [vmem:[#allocation3 + $0x28] sm:$0xff] %v969_v8  }
 0x158   :  { %v773_v34 = vmul.f32 0.33333334, %v741_v22  ;;  %v787_v35 = vmul.f32 0.33333334, %v755_v24  ;;  %1024 = vst [vmem:[#allocation3 + $0x20] sm:$0xff] %v964_v13  }
 0x15d   :  { %v707_v16 = vld [vmem:[%s1496_s2 + $0x20] sm:$0xff]  ;;  %v726_v17 = vld [vmem:[%s1496_s2 + $0xb8] sm:$0xff] }
 0x15e   :  { %800 = vst [vmem:[%s1498_s4 + $0x8] sm:$0xff] %v768_v11  ;;  %v739_v28 = vadd.f32 %v707_v16, %v333_v23  ;;  %v758_v31 = vadd.f32 %v1099_v25, %v726_v17  ;;  %v1004_v16 = vpack.c.bf16 %v416_v4, %v413_v56  ;;  %v1106_v23 = vpop.f32.mrb[12].mxu1 }
 0x160   :  { %v771_v39 = vmul.f32 0.33333334, %v739_v28  ;;  %v790_v40 = vmul.f32 0.33333334, %v758_v31  ;;  %1032 = vst [vmem:[#allocation3 + $0x60] sm:$0xff] %v1004_v16   ;;  %v429_v28 = vpop.f32.mrb[13].mxu1 }
 0x165   :  { %v710_v21 = vld [vmem:[%s1496_s2 + $0x38] sm:$0xff] }
 0x166   :  { %816 = vst [vmem:[%s1498_s4 + $0x88] sm:$0xff] %v784_v14  ;;  %v742_v37 = vadd.f32 %v1083_v29, %v710_v21 }
 0x168   :  { %v774_v43 = vmul.f32 0.33333334, %v742_v37 }
 0x16d   :  { %v708_v26 = vld [vmem:[%s1496_s2 + $0x28] sm:$0xff] }
 0x16e   :  { %v724_v33 = vld [vmem:[%s1496_s2 + $0xa8] sm:$0xff]  ;;  %v740_v42 = vadd.f32 %v708_v26, %v336_v38  ;;  %v1090_v26 = vpop.f32.mrb[12].mxu0 }
 0x16f   :  { %821 = vst [vmem:[%s1498_s4 + $0xb0] sm:$0xff] %v789_v27  ;;  %805 = vst [vmem:[%s1498_s4 + $0x30] sm:$0xff] %v773_v34  ;;  %v756_v45 = vadd.f32 %v724_v33, %v400_v32  ;;  %v365_v31 = vpop.f32.mrb[13].mxu0  ;;  %v1107_v33 = vpop.f32.mrb[14].mxu1 }
 0x170   :  { %819 = vst [vmem:[%s1498_s4 + $0xa0] sm:$0xff] %v787_v35  ;;  %v772_v47 = vmul.f32 0.33333334, %v740_v42  ;;  %v1091_v37 = vpop.f32.mrb[14].mxu0  ;;  %v1019_v38 = vpack.c.bf16 %v1107_v33, %v1106_v23 }
 0x171   :  { %v788_v50 = vmul.f32 0.33333334, %v756_v45  ;;  %v979_v44 = vpack.c.bf16 %v1091_v37, %v1090_v26 }
 0x172   :  { %1035 = vst [vmem:[#allocation3 + $0x78] sm:$0xff] %v1019_v38  }
 0x173   :  { %1027 = vst [vmem:[#allocation3 + $0x38] sm:$0xff] %v979_v44  }
 0x177   :  { %v729_v46 = vld [vmem:[%s1496_s2 + $0xd0] sm:$0xff] }
 0x178   :  { %803 = vst [vmem:[%s1498_s4 + $0x20] sm:$0xff] %v771_v39  ;;  %822 = vst [vmem:[%s1498_s4 + $0xb8] sm:$0xff] %v790_v40  ;;  %v761_v55 = vadd.f32 %v1102_v51, %v729_v46  ;;  %v432_v40 = vpop.f32.mrb[15].mxu1  ;;  %v368_v46 = vpop.f32.mrb[15].mxu0 }
 0x17a   :  { %v793_v63 = vmul.f32 0.33333334, %v761_v55 }
 0x17f   :  { %v713_v48 = vld [vmem:[%s1496_s2 + $0x50] sm:$0xff]  ;;  %v727_v49 = vld [vmem:[%s1496_s2 + $0xc0] sm:$0xff] }
 0x180   :  { %806 = vst [vmem:[%s1498_s4 + $0x38] sm:$0xff] %v774_v43  ;;  %v745_v58 = vadd.f32 %v1086_v54, %v713_v48  ;;  %v759_v60 = vadd.f32 %v727_v49, %v413_v56  ;;  %v974_v49 = vpack.c.bf16 %v368_v46, %v365_v31 }
 0x182   :  { %v777_v6 = vmul.f32 0.33333334, %v745_v58  ;;  %v791_v7 = vmul.f32 0.33333334, %v759_v60  ;;  %1026 = vst [vmem:[#allocation3 + $0x30] sm:$0xff] %v974_v49  }
 0x187   :  { %v711_v52 = vld [vmem:[%s1496_s2 + $0x40] sm:$0xff]  ;;  %v730_v53 = vld [vmem:[%s1496_s2 + $0xd8] sm:$0xff] }
 0x188   :  { %804 = vst [vmem:[%s1498_s4 + $0x28] sm:$0xff] %v772_v47  ;;  %v743_v0 = vadd.f32 %v711_v52, %v349_v59  ;;  %v762_v3 = vadd.f32 %v1103_v61, %v730_v53  ;;  %v1014_v52 = vpack.c.bf16 %v432_v40, %v429_v28 }
 0x18a   :  { %v775_v11 = vmul.f32 0.33333334, %v743_v0  ;;  %v794_v12 = vmul.f32 0.33333334, %v762_v3  ;;  %1034 = vst [vmem:[#allocation3 + $0x70] sm:$0xff] %v1014_v52  }
 0x18f   :  { %v714_v57 = vld [vmem:[%s1496_s2 + $0x58] sm:$0xff] }
 0x190   :  { %820 = vst [vmem:[%s1498_s4 + $0xa8] sm:$0xff] %v788_v50  ;;  %v746_v9 = vadd.f32 %v1087_v1, %v714_v57 }
 0x192   :  { %v778_v15 = vmul.f32 0.33333334, %v746_v9 }
 0x197   :  { %v712_v62 = vld [vmem:[%s1496_s2 + $0x48] sm:$0xff] }
 0x198   :  { %v728_v5 = vld [vmem:[%s1496_s2 + $0xc8] sm:$0xff]  ;;  %v744_v14 = vadd.f32 %v712_v62, %v352_v10 }
 0x199   :  { %825 = vst [vmem:[%s1498_s4 + $0xd0] sm:$0xff] %v793_v63  ;;  %809 = vst [vmem:[%s1498_s4 + $0x50] sm:$0xff] %v777_v6  ;;  %v760_v17 = vadd.f32 %v728_v5, %v416_v4 }
 0x19a   :  { %823 = vst [vmem:[%s1498_s4 + $0xc0] sm:$0xff] %v791_v7  ;;  %v776_v19 = vmul.f32 0.33333334, %v744_v14 }
 0x19b   :  { %v792_v22 = vmul.f32 0.33333334, %v760_v17 }
 0x1a1   :  { %v733_v18 = vld [vmem:[%s1496_s2 + $0xf0] sm:$0xff] }
 0x1a2   :  { %807 = vst [vmem:[%s1498_s4 + $0x40] sm:$0xff] %v775_v11  ;;  %826 = vst [vmem:[%s1498_s4 + $0xd8] sm:$0xff] %v794_v12  ;;  %v765_v27 = vadd.f32 %v1106_v23, %v733_v18 }
 0x1a4   :  { %v797_v35 = vmul.f32 0.33333334, %v765_v27 }
 0x1a9   :  { %v717_v20 = vld [vmem:[%s1496_s2 + $0x70] sm:$0xff]  ;;  %v731_v21 = vld [vmem:[%s1496_s2 + $0xe0] sm:$0xff] }
 0x1aa   :  { %810 = vst [vmem:[%s1498_s4 + $0x58] sm:$0xff] %v778_v15  ;;  %v749_v30 = vadd.f32 %v1090_v26, %v717_v20  ;;  %v763_v32 = vadd.f32 %v731_v21, %v429_v28 }
 0x1ac   :  { %v781_v42 = vmul.f32 0.33333334, %v749_v30  ;;  %v795_v43 = vmul.f32 0.33333334, %v763_v32 }
 0x1b1   :  { %v715_v24 = vld [vmem:[%s1496_s2 + $0x60] sm:$0xff]  ;;  %v734_v25 = vld [vmem:[%s1496_s2 + $0xf8] sm:$0xff] }
 0x1b2   :  { %808 = vst [vmem:[%s1498_s4 + $0x48] sm:$0xff] %v776_v19  ;;  %v747_v36 = vadd.f32 %v715_v24, %v365_v31  ;;  %v766_v39 = vadd.f32 %v1107_v33, %v734_v25 }
 0x1b4   :  { %v779_v47 = vmul.f32 0.33333334, %v747_v36  ;;  %v798_v48 = vmul.f32 0.33333334, %v766_v39 }
 0x1b9   :  { %v718_v29 = vld [vmem:[%s1496_s2 + $0x78] sm:$0xff] }
 0x1ba   :  { %824 = vst [vmem:[%s1498_s4 + $0xc8] sm:$0xff] %v792_v22  ;;  %v750_v45 = vadd.f32 %v1091_v37, %v718_v29 }
 0x1bc   :  { %v782_v51 = vmul.f32 0.33333334, %v750_v45 }
 0x1c1   :  { %v716_v34 = vld [vmem:[%s1496_s2 + $0x68] sm:$0xff] }
 0x1c2   :  { %v732_v41 = vld [vmem:[%s1496_s2 + $0xe8] sm:$0xff]  ;;  %v748_v50 = vadd.f32 %v716_v34, %v368_v46 }
 0x1c3   :  { %829 = vst [vmem:[%s1498_s4 + $0xf0] sm:$0xff] %v797_v35  ;;  %813 = vst [vmem:[%s1498_s4 + $0x70] sm:$0xff] %v781_v42  ;;  %v764_v53 = vadd.f32 %v732_v41, %v432_v40 }
 0x1c4   :  { %827 = vst [vmem:[%s1498_s4 + $0xe0] sm:$0xff] %v795_v43  ;;  %811 = vst [vmem:[%s1498_s4 + $0x60] sm:$0xff] %v779_v47  ;;  %v780_v54 = vmul.f32 0.33333334, %v748_v50 }
 0x1c5   :  { %830 = vst [vmem:[%s1498_s4 + $0xf8] sm:$0xff] %v798_v48  ;;  %814 = vst [vmem:[%s1498_s4 + $0x78] sm:$0xff] %v782_v51  ;;  %v796_v55 = vmul.f32 0.33333334, %v764_v53 }
 0x1c6   :  { %812 = vst [vmem:[%s1498_s4 + $0x68] sm:$0xff] %v780_v54 }
 0x1c7   :  { %1170 = shalt.err (!%p1167_p4)
}
 0x1c8   :  { %s1171_s27 = scalar_lea.hbm %s1497_s3, 2048 }
 0x1c9   :  { %p1172_p5 = scmp.ne.s32.totalorder %s1497_s3, %s1171_s27  ;;  %p1175_p6 = scmp.lt.u32.totalorder %s1171_s27, %s1497_s3 }
 0x1cb   :  { %p1177_p7 = pnand %p1175_p6, %p1172_p5 }
 0x1cd   :  { %1180 = shalt.err (!%p1177_p7)
}
 0x1ce   :  { %s1184_s6 = smov 64   ;;  %s1185_s7 = smov 4   ;;  %828 = vst [vmem:[%s1498_s4 + $0xe8] sm:$0xff] %v796_v55 }
 0x1cf   :  { %842 = dma.vmem_to_hbm [thread:$0]  %s1454_s9, 2048, %s1497_s3, [#allocation4], %s1184_s6, %s1184_s6, %s1185_s7  }
 0x1d0   :  { %1181 = dma.done.wait [#allocation4], 2048  }
 0x1d1   :  { %1182 = vsyncadd [#allocation4], 4294965248 }
 0x1d2   :  { %850 = vsyncpa [#allocation4], 1 }

</bundles_post_ra>
